<compile_context>
chip_gen: v7x
topology: tpu7x:2x2x1
jax: 0.10.0
libtpu: 0.0.40
codegen_flags: <defaults>
</compile_context>

<pallas_src>
import numpy as np

import jax
import jax.numpy as jnp
from jax import lax
from jax.experimental import pallas as pl
from jax.experimental.pallas import tpu as pltpu

K = 4
STRIDE = 2
PAD = 1


# ----------------------------------------------------------------------------
# Host-side constant construction.
#
# For a k=4 / s=2 / p=1 transposed conv:
#   out[2m+py, 2n+px, co] uses input rows {m, m-1} (py=0, ky in {1,3}) or
#   {m+1, m} (py=1, ky in {0,2}), and input cols {n, n-1} (px=0, kx in {1,3})
#   or {n+1, n} (px=1, kx in {0,2}).
# With the layer activation stored as a slab X[m, ci*w + j] = x[ci, m, j],
# the even output rows are   r_even = [X | X(m-1)] @ B_even   and the odd
# output rows are            r_odd  = [X(m+1) | X] @ B_odd,
# where B_* already contains the weights, the column taps, the boundary
# zeroing and the even/odd column interleave (output layout co*(2w) + o).
# ----------------------------------------------------------------------------
def _layer_matrices(wp, bp, h, w):
    """Constant matrices for one ConvTranspose2d layer at input size (h, w)."""
    cin, cout = int(wp.shape[0]), int(wp.shape[1])
    wout = 2 * w

    # pcol[kx, j, o] = 1 iff output column o reads input column j through
    # kernel column kx (0/1 constant, built in numpy at trace time).
    pcol = np.zeros((K, w, wout), np.float32)
    for o in range(wout):
        n, par = divmod(o, 2)
        taps = ((1, 0), (3, -1)) if par == 0 else ((0, 1), (2, 0))
        for kx, dc in taps:
            j = n + dc
            if 0 <= j < w:
                pcol[kx, j, o] = 1.0

    w32 = wp.astype(jnp.float32)

    def blk(ky):
        # B_blk[ci*w + j, co*wout + o] = sum_kx pcol[kx, j, o] * W[ci, co, ky, kx]
        # (pure broadcast/add so the weights stay exactly f32).
        b = jnp.zeros((cin, w, cout, wout), jnp.float32)
        for kx in range(K):
            b = b + (jnp.asarray(pcol[kx])[None, :, None, :]
                     * w32[:, :, ky, kx][:, None, :, None])
        return b.reshape(cin * w, cout * wout)

    b_even = jnp.concatenate([blk(1), blk(3)], axis=0)   # blocks: [x(m), x(m-1)]
    b_odd = jnp.concatenate([blk(0), blk(2)], axis=0)    # blocks: [x(m+1), x(m)]

    # Row interleave: Y[2m] = r_even[m], Y[2m+1] = r_odd[m]  ->  Y = F @ [r_e; r_o]
    frow = np.zeros((2 * h, 2 * h), np.float32)
    frow[0::2, :h] = np.eye(h, dtype=np.float32)
    frow[1::2, h:] = np.eye(h, dtype=np.float32)

    # Lane-segmented bias: segment co (width 2w) holds bias[co].
    bias_vec = jnp.repeat(bp.astype(jnp.float32), wout)[None, :]   # (1, cout*wout)

    return b_even, b_odd, jnp.asarray(frow), bias_vec


def _build_constants(params, h0, w0):
    consts = []
    h, w = h0, w0
    for (wp, bp) in params:
        consts.extend(_layer_matrices(wp, bp, h, w))
        h, w = 2 * h, 2 * w
    return consts


# ----------------------------------------------------------------------------
# Fused kernel: one batch element per grid step, all layers in VMEM.
# ----------------------------------------------------------------------------
def _make_fused_kernel(channels, h0, w0):
    n_layers = len(channels) - 1

    def kernel(*refs):
        x_ref = refs[0]
        layer_refs = refs[1:1 + 4 * n_layers]
        o_ref = refs[1 + 4 * n_layers]

        h, w = h0, w0
        x = x_ref[0]                                   # (h0, c0*w0) slab
        for li in range(n_layers):
            be_ref, bo_ref, f_ref, b_ref = layer_refs[4 * li: 4 * li + 4]
            cin = channels[li]
            last = li == n_layers - 1

            # +-1 row-shifted copies of the packed slab (sublane direction).
            zrow = jnp.zeros((1, cin * w), jnp.float32)
            x_up = jnp.concatenate([zrow, x[:-1, :]], axis=0)   # x[m-1]
            x_dn = jnp.concatenate([x[1:, :], zrow], axis=0)    # x[m+1]

            # Channel contraction + column taps + column interleave: one MXU
            # matmul per output-row parity (weights/masks baked into B_*).
            lhs_e = jnp.concatenate([x, x_up], axis=1)          # (h, 2*cin*w)
            lhs_o = jnp.concatenate([x_dn, x], axis=1)
            r_e = jnp.dot(lhs_e, be_ref[...],
                          preferred_element_type=jnp.float32)   # (h, cout*2w)
            r_o = jnp.dot(lhs_o, bo_ref[...],
                          preferred_element_type=jnp.float32)

            # Row interleave (and phase stacking) in a single matmul.
            y = jnp.dot(f_ref[...], jnp.concatenate([r_e, r_o], axis=0),
                        preferred_element_type=jnp.float32)     # (2h, cout*2w)

            # One bias add + activation per layer (lane-segmented bias vector).
            y = y + b_ref[...]
            y = jax.nn.sigmoid(y) if last else jnp.maximum(y, 0.0)

            x = y                                               # stays in VMEM
            h, w = 2 * h, 2 * w

        # Final slab x: (Hf, Cf*Wf); per-channel slices are 128-lane aligned
        # here (Wf = 128), giving contiguous lane-dense stores.
        cf = channels[-1]
        for co in range(cf):
            o_ref[0, co, :, :] = x[:, co * w:(co + 1) * w]

    return kernel


def conv_trans_block(x_nchw, params):
    """Forward pass of ConvTransBlock.

    x_nchw: (N, C0, H, W) float32
    params: [(w, b), ...] with w in PyTorch ConvTranspose2d layout
            (Cin, Cout, 4, 4) and b of shape (Cout,).
    """
    n, c0, h0, w0 = x_nchw.shape
    channels = [c0] + [int(wp.shape[1]) for (wp, _) in params]
    n_layers = len(params)
    hf, wf = h0 * STRIDE ** n_layers, w0 * STRIDE ** n_layers
    cf = channels[-1]

    # Per-layer constant matrices (weights / interleave / bias), built once
    # outside the kernel and fed as VMEM inputs with constant index maps.
    const_args = _build_constants(params, h0, w0)

    # Input slab: (N, H, C0*W) with channel ci at lane columns [ci*W, (ci+1)*W).
    x_slab = jnp.transpose(x_nchw.astype(jnp.float32),
                           (0, 2, 1, 3)).reshape(n, h0, c0 * w0)

    kernel = _make_fused_kernel(channels, h0, w0)

    const_map = lambda i: (0, 0)          # same block every grid step
    in_specs = [pl.BlockSpec((1, h0, c0 * w0), lambda i: (i, 0, 0))]
    in_specs += [pl.BlockSpec(arr.shape, const_map) for arr in const_args]

    return pl.pallas_call(
        kernel,
        out_shape=jax.ShapeDtypeStruct((n, cf, hf, wf), jnp.float32),
        grid=(n,),
        in_specs=in_specs,
        out_specs=pl.BlockSpec((1, cf, hf, wf), lambda i: (i, 0, 0, 0)),
        compiler_params=pltpu.CompilerParams(
            dimension_semantics=("parallel",)),   # v7x megacore splits batch
    )(x_slab, *const_args)


def init_params(channels, key):
    """Deterministic parameter init matching the module's layer shapes."""
    params = []
    for cin, cout in zip(channels[:-1], channels[1:]):
        key, kw, kb = jax.random.split(key, 3)
        wp = 0.1 * jax.random.normal(kw, (cin, cout, K, K), jnp.float32)
        bp = 0.05 * jax.random.normal(kb, (cout,), jnp.float32)
        params.append((wp, bp))
    return params


def reference_forward(x_nchw, params):
    """Pure-JAX reference using the scatter definition of ConvTranspose2d
    (independent of the kernel's matrix formulation)."""
    x = jnp.transpose(x_nchw, (0, 2, 3, 1)).astype(jnp.float32)
    n_layers = len(params)
    for li, (wp, bp) in enumerate(params):
        n, h, w, cin = x.shape
        cout = wp.shape[1]
        full = jnp.zeros((n, 2 * h + 2, 2 * w + 2, cout), jnp.float32)
        for ky in range(K):
            for kx in range(K):
                contrib = jnp.einsum("nhwc,cd->nhwd", x, wp[:, :, ky, kx],
                                     precision=lax.Precision.HIGHEST)
                full = full.at[:, ky:ky + 2 * h:2, kx:kx + 2 * w:2, :].add(contrib)
        y = full[:, PAD:PAD + 2 * h, PAD:PAD + 2 * w, :] + bp
        y = jax.nn.sigmoid(y) if li == n_layers - 1 else jnp.maximum(y, 0.0)
        x = y
    return jnp.transpose(x, (0, 3, 1, 2))


if __name__ == "__main__":
    channels = [4, 8, 4, 2]                      # 3 deconv layers: 4 -> 8 -> 4 -> 2
    key = jax.random.PRNGKey(0)
    key, kx, kp = jax.random.split(key, 3)
    x = jax.random.normal(kx, (2, channels[0], 16, 16), jnp.float32)   # NCHW input
    params = init_params(channels, kp)

    fused = jax.jit(conv_trans_block)
    out = jax.block_until_ready(fused(x, params))
    ref = jax.block_until_ready(reference_forward(x, params))

    n_layers = len(channels) - 1
    expected = (2, channels[-1], 16 * STRIDE ** n_layers, 16 * STRIDE ** n_layers)
    assert out.shape == expected, (out.shape, expected)
    # 1e-4 is tight enough to catch a bf16-truncated matmul path (~1e-3 error)
    # while allowing for the MXU's multi-pass f32 accumulation differences.
    max_err = float(jnp.max(jnp.abs(out - ref)))
    assert max_err < 1e-4, max_err
    print("KERNEL_OK")
</pallas_src>

<mosaic_0001>
module attributes {stable_mosaic.version = 11 : i64} {
  func.func @kernel(%arg0: i32, %arg1: memref<1x16x64xf32, #tpu.memory_space<vmem>>, %arg2: memref<128x256xf32, #tpu.memory_space<vmem>>, %arg3: memref<128x256xf32, #tpu.memory_space<vmem>>, %arg4: memref<32x32xf32, #tpu.memory_space<vmem>>, %arg5: memref<1x256xf32, #tpu.memory_space<vmem>>, %arg6: memref<512x256xf32, #tpu.memory_space<vmem>>, %arg7: memref<512x256xf32, #tpu.memory_space<vmem>>, %arg8: memref<64x64xf32, #tpu.memory_space<vmem>>, %arg9: memref<1x256xf32, #tpu.memory_space<vmem>>, %arg10: memref<512x256xf32, #tpu.memory_space<vmem>>, %arg11: memref<512x256xf32, #tpu.memory_space<vmem>>, %arg12: memref<128x128xf32, #tpu.memory_space<vmem>>, %arg13: memref<1x256xf32, #tpu.memory_space<vmem>>, %arg14: memref<1x2x128x128xf32, #tpu.memory_space<vmem>>) attributes {dimension_semantics = [#tpu.dimension_semantics<parallel>], iteration_bounds = array<i64: 2>, scalar_prefetch = 0 : i64, scratch_operands = 0 : i64, tpu.core_type = #tpu.core_type<tc>, window_params = [{transform_indices = @transform_0, window_bounds = array<i64: 1, 16, 64>}, {pipeline_mode = #tpu.pipeline_mode<synchronous>, transform_indices = @transform_1, window_bounds = array<i64: 128, 256>}, {pipeline_mode = #tpu.pipeline_mode<synchronous>, transform_indices = @transform_2, window_bounds = array<i64: 128, 256>}, {pipeline_mode = #tpu.pipeline_mode<synchronous>, transform_indices = @transform_3, window_bounds = array<i64: 32, 32>}, {pipeline_mode = #tpu.pipeline_mode<synchronous>, transform_indices = @transform_4, window_bounds = array<i64: 1, 256>}, {pipeline_mode = #tpu.pipeline_mode<synchronous>, transform_indices = @transform_5, window_bounds = array<i64: 512, 256>}, {pipeline_mode = #tpu.pipeline_mode<synchronous>, transform_indices = @transform_6, window_bounds = array<i64: 512, 256>}, {pipeline_mode = #tpu.pipeline_mode<synchronous>, transform_indices = @transform_7, window_bounds = array<i64: 64, 64>}, {pipeline_mode = #tpu.pipeline_mode<synchronous>, transform_indices = @transform_8, window_bounds = array<i64: 1, 256>}, {pipeline_mode = #tpu.pipeline_mode<synchronous>, transform_indices = @transform_9, window_bounds = array<i64: 512, 256>}, {pipeline_mode = #tpu.pipeline_mode<synchronous>, transform_indices = @transform_10, window_bounds = array<i64: 512, 256>}, {pipeline_mode = #tpu.pipeline_mode<synchronous>, transform_indices = @transform_11, window_bounds = array<i64: 128, 128>}, {pipeline_mode = #tpu.pipeline_mode<synchronous>, transform_indices = @transform_12, window_bounds = array<i64: 1, 256>}, {transform_indices = @transform_13, window_bounds = array<i64: 1, 2, 128, 128>}]} {
    %c0 = arith.constant 0 : index
    %c0_0 = arith.constant 0 : index
    %c0_1 = arith.constant 0 : index
    %0 = vector.load %arg1[%c0, %c0_0, %c0_1] : memref<1x16x64xf32, #tpu.memory_space<vmem>>, vector<1x16x64xf32>
    %1 = vector.shape_cast %0 : vector<1x16x64xf32> to vector<16x64xf32>
    %cst = arith.constant 0.000000e+00 : f32
    %2 = vector.broadcast %cst : f32 to vector<1x64xf32>
    %3 = vector.extract_strided_slice %1 {offsets = [0, 0], sizes = [15, 64], strides = [1, 1]} : vector<16x64xf32> to vector<15x64xf32>
    %4 = tpu.concatenate %2, %3 in 0 : vector<1x64xf32>, vector<15x64xf32> -> vector<16x64xf32>
    %5 = vector.extract_strided_slice %1 {offsets = [1, 0], sizes = [15, 64], strides = [1, 1]} : vector<16x64xf32> to vector<15x64xf32>
    %6 = tpu.concatenate %5, %2 in 0 : vector<15x64xf32>, vector<1x64xf32> -> vector<16x64xf32>
    %7 = tpu.concatenate %1, %4 in 1 : vector<16x64xf32>, vector<16x64xf32> -> vector<16x128xf32>
    %8 = tpu.concatenate %6, %1 in 1 : vector<16x64xf32>, vector<16x64xf32> -> vector<16x128xf32>
    %c0_2 = arith.constant 0 : index
    %c0_3 = arith.constant 0 : index
    %9 = vector.load %arg2[%c0_2, %c0_3] : memref<128x256xf32, #tpu.memory_space<vmem>>, vector<128x256xf32>
    %cst_4 = arith.constant dense<0.000000e+00> : vector<16x256xf32>
    %10 = tpu.matmul %7, %9, %cst_4 {dimension_numbers = #tpu.dot_dimension_numbers<[1], [0], [0], [1], [0, 0, 1, 1], [], []>} : vector<16x128xf32>, vector<128x256xf32>, vector<16x256xf32> -> vector<16x256xf32>
    %c0_5 = arith.constant 0 : index
    %c0_6 = arith.constant 0 : index
    %11 = vector.load %arg3[%c0_5, %c0_6] : memref<128x256xf32, #tpu.memory_space<vmem>>, vector<128x256xf32>
    %cst_7 = arith.constant dense<0.000000e+00> : vector<16x256xf32>
    %12 = tpu.matmul %8, %11, %cst_7 {dimension_numbers = #tpu.dot_dimension_numbers<[1], [0], [0], [1], [0, 0, 1, 1], [], []>} : vector<16x128xf32>, vector<128x256xf32>, vector<16x256xf32> -> vector<16x256xf32>
    %c0_8 = arith.constant 0 : index
    %c0_9 = arith.constant 0 : index
    %13 = vector.load %arg4[%c0_8, %c0_9] : memref<32x32xf32, #tpu.memory_space<vmem>>, vector<32x32xf32>
    %14 = tpu.concatenate %10, %12 in 0 : vector<16x256xf32>, vector<16x256xf32> -> vector<32x256xf32>
    %cst_10 = arith.constant dense<0.000000e+00> : vector<32x256xf32>
    %15 = tpu.matmul %13, %14, %cst_10 {dimension_numbers = #tpu.dot_dimension_numbers<[1], [0], [0], [1], [0, 0, 1, 1], [], []>} : vector<32x32xf32>, vector<32x256xf32>, vector<32x256xf32> -> vector<32x256xf32>
    %c0_11 = arith.constant 0 : index
    %c0_12 = arith.constant 0 : index
    %16 = vector.load %arg5[%c0_11, %c0_12] : memref<1x256xf32, #tpu.memory_space<vmem>>, vector<1x256xf32>
    %17 = vector.broadcast %16 : vector<1x256xf32> to vector<32x256xf32>
    %18 = arith.addf %15, %17 : vector<32x256xf32>
    %cst_13 = arith.constant 0.000000e+00 : f32
    %19 = vector.broadcast %cst_13 : f32 to vector<32x256xf32>
    %20 = arith.maximumf %18, %19 : vector<32x256xf32>
    %cst_14 = arith.constant 0.000000e+00 : f32
    %21 = vector.broadcast %cst_14 : f32 to vector<1x256xf32>
    %22 = vector.extract_strided_slice %20 {offsets = [0, 0], sizes = [31, 256], strides = [1, 1]} : vector<32x256xf32> to vector<31x256xf32>
    %23 = tpu.concatenate %21, %22 in 0 : vector<1x256xf32>, vector<31x256xf32> -> vector<32x256xf32>
    %24 = vector.extract_strided_slice %20 {offsets = [1, 0], sizes = [31, 256], strides = [1, 1]} : vector<32x256xf32> to vector<31x256xf32>
    %25 = tpu.concatenate %24, %21 in 0 : vector<31x256xf32>, vector<1x256xf32> -> vector<32x256xf32>
    %26 = tpu.concatenate %20, %23 in 1 : vector<32x256xf32>, vector<32x256xf32> -> vector<32x512xf32>
    %27 = tpu.concatenate %25, %20 in 1 : vector<32x256xf32>, vector<32x256xf32> -> vector<32x512xf32>
    %c0_15 = arith.constant 0 : index
    %c0_16 = arith.constant 0 : index
    %28 = vector.load %arg6[%c0_15, %c0_16] : memref<512x256xf32, #tpu.memory_space<vmem>>, vector<512x256xf32>
    %cst_17 = arith.constant dense<0.000000e+00> : vector<32x256xf32>
    %29 = tpu.matmul %26, %28, %cst_17 {dimension_numbers = #tpu.dot_dimension_numbers<[1], [0], [0], [1], [0, 0, 1, 1], [], []>} : vector<32x512xf32>, vector<512x256xf32>, vector<32x256xf32> -> vector<32x256xf32>
    %c0_18 = arith.constant 0 : index
    %c0_19 = arith.constant 0 : index
    %30 = vector.load %arg7[%c0_18, %c0_19] : memref<512x256xf32, #tpu.memory_space<vmem>>, vector<512x256xf32>
    %cst_20 = arith.constant dense<0.000000e+00> : vector<32x256xf32>
    %31 = tpu.matmul %27, %30, %cst_20 {dimension_numbers = #tpu.dot_dimension_numbers<[1], [0], [0], [1], [0, 0, 1, 1], [], []>} : vector<32x512xf32>, vector<512x256xf32>, vector<32x256xf32> -> vector<32x256xf32>
    %c0_21 = arith.constant 0 : index
    %c0_22 = arith.constant 0 : index
    %32 = vector.load %arg8[%c0_21, %c0_22] : memref<64x64xf32, #tpu.memory_space<vmem>>, vector<64x64xf32>
    %33 = tpu.concatenate %29, %31 in 0 : vector<32x256xf32>, vector<32x256xf32> -> vector<64x256xf32>
    %cst_23 = arith.constant dense<0.000000e+00> : vector<64x256xf32>
    %34 = tpu.matmul %32, %33, %cst_23 {dimension_numbers = #tpu.dot_dimension_numbers<[1], [0], [0], [1], [0, 0, 1, 1], [], []>} : vector<64x64xf32>, vector<64x256xf32>, vector<64x256xf32> -> vector<64x256xf32>
    %c0_24 = arith.constant 0 : index
    %c0_25 = arith.constant 0 : index
    %35 = vector.load %arg9[%c0_24, %c0_25] : memref<1x256xf32, #tpu.memory_space<vmem>>, vector<1x256xf32>
    %36 = vector.broadcast %35 : vector<1x256xf32> to vector<64x256xf32>
    %37 = arith.addf %34, %36 : vector<64x256xf32>
    %cst_26 = arith.constant 0.000000e+00 : f32
    %38 = vector.broadcast %cst_26 : f32 to vector<64x256xf32>
    %39 = arith.maximumf %37, %38 : vector<64x256xf32>
    %cst_27 = arith.constant 0.000000e+00 : f32
    %40 = vector.broadcast %cst_27 : f32 to vector<1x256xf32>
    %41 = vector.extract_strided_slice %39 {offsets = [0, 0], sizes = [63, 256], strides = [1, 1]} : vector<64x256xf32> to vector<63x256xf32>
    %42 = tpu.concatenate %40, %41 in 0 : vector<1x256xf32>, vector<63x256xf32> -> vector<64x256xf32>
    %43 = vector.extract_strided_slice %39 {offsets = [1, 0], sizes = [63, 256], strides = [1, 1]} : vector<64x256xf32> to vector<63x256xf32>
    %44 = tpu.concatenate %43, %40 in 0 : vector<63x256xf32>, vector<1x256xf32> -> vector<64x256xf32>
    %45 = tpu.concatenate %39, %42 in 1 : vector<64x256xf32>, vector<64x256xf32> -> vector<64x512xf32>
    %46 = tpu.concatenate %44, %39 in 1 : vector<64x256xf32>, vector<64x256xf32> -> vector<64x512xf32>
    %c0_28 = arith.constant 0 : index
    %c0_29 = arith.constant 0 : index
    %47 = vector.load %arg10[%c0_28, %c0_29] : memref<512x256xf32, #tpu.memory_space<vmem>>, vector<512x256xf32>
    %cst_30 = arith.constant dense<0.000000e+00> : vector<64x256xf32>
    %48 = tpu.matmul %45, %47, %cst_30 {dimension_numbers = #tpu.dot_dimension_numbers<[1], [0], [0], [1], [0, 0, 1, 1], [], []>} : vector<64x512xf32>, vector<512x256xf32>, vector<64x256xf32> -> vector<64x256xf32>
    %c0_31 = arith.constant 0 : index
    %c0_32 = arith.constant 0 : index
    %49 = vector.load %arg11[%c0_31, %c0_32] : memref<512x256xf32, #tpu.memory_space<vmem>>, vector<512x256xf32>
    %cst_33 = arith.constant dense<0.000000e+00> : vector<64x256xf32>
    %50 = tpu.matmul %46, %49, %cst_33 {dimension_numbers = #tpu.dot_dimension_numbers<[1], [0], [0], [1], [0, 0, 1, 1], [], []>} : vector<64x512xf32>, vector<512x256xf32>, vector<64x256xf32> -> vector<64x256xf32>
    %c0_34 = arith.constant 0 : index
    %c0_35 = arith.constant 0 : index
    %51 = vector.load %arg12[%c0_34, %c0_35] : memref<128x128xf32, #tpu.memory_space<vmem>>, vector<128x128xf32>
    %52 = tpu.concatenate %48, %50 in 0 : vector<64x256xf32>, vector<64x256xf32> -> vector<128x256xf32>
    %cst_36 = arith.constant dense<0.000000e+00> : vector<128x256xf32>
    %53 = tpu.matmul %51, %52, %cst_36 {dimension_numbers = #tpu.dot_dimension_numbers<[1], [0], [0], [1], [0, 0, 1, 1], [], []>} : vector<128x128xf32>, vector<128x256xf32>, vector<128x256xf32> -> vector<128x256xf32>
    %c0_37 = arith.constant 0 : index
    %c0_38 = arith.constant 0 : index
    %54 = vector.load %arg13[%c0_37, %c0_38] : memref<1x256xf32, #tpu.memory_space<vmem>>, vector<1x256xf32>
    %55 = vector.broadcast %54 : vector<1x256xf32> to vector<128x256xf32>
    %56 = arith.addf %53, %55 : vector<128x256xf32>
    %57 = arith.negf %56 : vector<128x256xf32>
    %58 = math.exp %57 : vector<128x256xf32>
    %cst_39 = arith.constant 1.000000e+00 : f32
    %59 = vector.broadcast %cst_39 : f32 to vector<128x256xf32>
    %60 = arith.addf %59, %58 : vector<128x256xf32>
    %61 = arith.divf %59, %60 : vector<128x256xf32>
    %62 = vector.extract_strided_slice %61 {offsets = [0, 0], sizes = [128, 128], strides = [1, 1]} : vector<128x256xf32> to vector<128x128xf32>
    %c0_40 = arith.constant 0 : index
    %c0_41 = arith.constant 0 : index
    %c0_42 = arith.constant 0 : index
    %c0_43 = arith.constant 0 : index
    %63 = vector.load %arg14[%c0_40, %c0_41, %c0_42, %c0_43] : memref<1x2x128x128xf32, #tpu.memory_space<vmem>>, vector<1x1x128x128xf32>
    %64 = vector.shape_cast %63 : vector<1x1x128x128xf32> to vector<128x128xf32>
    %65 = vector.shape_cast %62 : vector<128x128xf32> to vector<1x1x128x128xf32>
    tpu.vector_store %arg14[%c0_40, %c0_41, %c0_42, %c0_43], %65 {strides = array<i32>} : memref<1x2x128x128xf32, #tpu.memory_space<vmem>>, vector<1x1x128x128xf32>,
    %66 = vector.extract_strided_slice %61 {offsets = [0, 128], sizes = [128, 128], strides = [1, 1]} : vector<128x256xf32> to vector<128x128xf32>
    %c0_44 = arith.constant 0 : index
    %c1 = arith.constant 1 : index
    %c0_45 = arith.constant 0 : index
    %c0_46 = arith.constant 0 : index
    %67 = vector.load %arg14[%c0_44, %c1, %c0_45, %c0_46] : memref<1x2x128x128xf32, #tpu.memory_space<vmem>>, vector<1x1x128x128xf32>
    %68 = vector.shape_cast %67 : vector<1x1x128x128xf32> to vector<128x128xf32>
    %69 = vector.shape_cast %66 : vector<128x128xf32> to vector<1x1x128x128xf32>
    tpu.vector_store %arg14[%c0_44, %c1, %c0_45, %c0_46], %69 {strides = array<i32>} : memref<1x2x128x128xf32, #tpu.memory_space<vmem>>, vector<1x1x128x128xf32>,
    return
  }
  func.func @transform_0(%arg0: i32) -> (i32, i32, i32) {
    %c0_i32 = arith.constant 0 : i32
    %c0_i32_0 = arith.constant 0 : i32
    %c0_i32_1 = arith.constant 0 : i32
    return %arg0, %c0_i32, %c0_i32_0 : i32, i32, i32
  }
  func.func @transform_1(%arg0: i32) -> (i32, i32) {
    %c0_i32 = arith.constant 0 : i32
    %c0_i32_0 = arith.constant 0 : i32
    %c0_i32_1 = arith.constant 0 : i32
    return %c0_i32, %c0_i32_0 : i32, i32
  }
  func.func @transform_2(%arg0: i32) -> (i32, i32) {
    %c0_i32 = arith.constant 0 : i32
    %c0_i32_0 = arith.constant 0 : i32
    %c0_i32_1 = arith.constant 0 : i32
    return %c0_i32, %c0_i32_0 : i32, i32
  }
  func.func @transform_3(%arg0: i32) -> (i32, i32) {
    %c0_i32 = arith.constant 0 : i32
    %c0_i32_0 = arith.constant 0 : i32
    %c0_i32_1 = arith.constant 0 : i32
    return %c0_i32, %c0_i32_0 : i32, i32
  }
  func.func @transform_4(%arg0: i32) -> (i32, i32) {
    %c0_i32 = arith.constant 0 : i32
    %c0_i32_0 = arith.constant 0 : i32
    %c0_i32_1 = arith.constant 0 : i32
    return %c0_i32, %c0_i32_0 : i32, i32
  }
  func.func @transform_5(%arg0: i32) -> (i32, i32) {
    %c0_i32 = arith.constant 0 : i32
    %c0_i32_0 = arith.constant 0 : i32
    %c0_i32_1 = arith.constant 0 : i32
    return %c0_i32, %c0_i32_0 : i32, i32
  }
  func.func @transform_6(%arg0: i32) -> (i32, i32) {
    %c0_i32 = arith.constant 0 : i32
    %c0_i32_0 = arith.constant 0 : i32
    %c0_i32_1 = arith.constant 0 : i32
    return %c0_i32, %c0_i32_0 : i32, i32
  }
  func.func @transform_7(%arg0: i32) -> (i32, i32) {
    %c0_i32 = arith.constant 0 : i32
    %c0_i32_0 = arith.constant 0 : i32
    %c0_i32_1 = arith.constant 0 : i32
    return %c0_i32, %c0_i32_0 : i32, i32
  }
  func.func @transform_8(%arg0: i32) -> (i32, i32) {
    %c0_i32 = arith.constant 0 : i32
    %c0_i32_0 = arith.constant 0 : i32
    %c0_i32_1 = arith.constant 0 : i32
    return %c0_i32, %c0_i32_0 : i32, i32
  }
  func.func @transform_9(%arg0: i32) -> (i32, i32) {
    %c0_i32 = arith.constant 0 : i32
    %c0_i32_0 = arith.constant 0 : i32
    %c0_i32_1 = arith.constant 0 : i32
    return %c0_i32, %c0_i32_0 : i32, i32
  }
  func.func @transform_10(%arg0: i32) -> (i32, i32) {
    %c0_i32 = arith.constant 0 : i32
    %c0_i32_0 = arith.constant 0 : i32
    %c0_i32_1 = arith.constant 0 : i32
    return %c0_i32, %c0_i32_0 : i32, i32
  }
  func.func @transform_11(%arg0: i32) -> (i32, i32) {
    %c0_i32 = arith.constant 0 : i32
    %c0_i32_0 = arith.constant 0 : i32
    %c0_i32_1 = arith.constant 0 : i32
    return %c0_i32, %c0_i32_0 : i32, i32
  }
  func.func @transform_12(%arg0: i32) -> (i32, i32) {
    %c0_i32 = arith.constant 0 : i32
    %c0_i32_0 = arith.constant 0 : i32
    %c0_i32_1 = arith.constant 0 : i32
    return %c0_i32, %c0_i32_0 : i32, i32
  }
  func.func @transform_13(%arg0: i32) -> (i32, i32, i32, i32) {
    %c0_i32 = arith.constant 0 : i32
    %c0_i32_0 = arith.constant 0 : i32
    %c0_i32_1 = arith.constant 0 : i32
    %c0_i32_2 = arith.constant 0 : i32
    return %arg0, %c0_i32, %c0_i32_0, %c0_i32_1 : i32, i32, i32, i32
  }
}

</mosaic_0001>

<bundles_post_ra>
// kernel: conv_trans_block.1
= control target key start
LH: loop header
LB: loop body
LE: loop exit
PB: predicated region body
PF: predicated region fallthrough
CT: control target
= control target key end

     0   :  { %18 = vsyncpa [#allocation3], 0  ;;  %s6410_s0 = inlined_call_operand.vmem [shape: f32[2,16,64], index: 0, kind: input, shape index: {}]   ;;  %s6411_s1 = inlined_call_operand.vmem [shape: f32[128,256], index: 1, kind: input, shape index: {}]   ;;  %s6412_s2 = inlined_call_operand.vmem [shape: f32[128,256], index: 2, kind: input, shape index: {}]   ;;  %s6413_s3 = inlined_call_operand.vmem [shape: f32[32,32], index: 3, kind: input, shape index: {}]   ;;  %s6414_s4 = inlined_call_operand.vmem [shape: f32[1,256], index: 4, kind: input, shape index: {}]   ;;  %s6415_s5 = inlined_call_operand.vmem [shape: f32[512,256], index: 5, kind: input, shape index: {}]   ;;  %s6416_s6 = inlined_call_operand.vmem [shape: f32[512,256], index: 6, kind: input, shape index: {}]   ;;  %s6417_s7 = inlined_call_operand.vmem [shape: f32[64,64], index: 7, kind: input, shape index: {}]   ;;  %s6418_s8 = inlined_call_operand.vmem [shape: f32[1,256], index: 8, kind: input, shape index: {}]   ;;  %s6419_s9 = inlined_call_operand.vmem [shape: f32[512,256], index: 9, kind: input, shape index: {}]   ;;  %s6420_s10 = inlined_call_operand.vmem [shape: f32[512,256], index: 10, kind: input, shape index: {}]   ;;  %s6421_s11 = inlined_call_operand.vmem [shape: f32[128,128], index: 11, kind: input, shape index: {}]   ;;  %s6422_s12 = inlined_call_operand.vmem [shape: f32[1,256], index: 12, kind: input, shape index: {}]   ;;  %s6423_s13 = inlined_call_operand.hbm [shape: f32[2,2,128,128], index: 13, kind: output, shape index: {}]  }
   0x1   :  { %20 = vsyncpa [#allocation3 + $0x1], 0  ;;  %s4066_s25 = smov 0   ;;  %s4068_s26 = smov 0  }
   0x2   :  { %s4070_s27 = smov 0   ;;  %s4072_s28 = smov 0  }
   0x3 LB: > { %6428 = sst [smem:[#allocation5_spill]] %s3985_s27  ;;  %s4087_s29 = sadd.s32 4294967295, %s3989_s28   ;;  %s3989_s28 = sphi %s4072_s28, %s6437_s28   ;;  %s3985_s27 = sphi %s4070_s27, %s6439_s27   ;;  %s3981_s26 = sphi %s4068_s26, %s6441_s26   ;;  %s3977_s25 = sphi %s4066_s25, %s6440_s25  }
   0x4   : > { %s2969_s30 = sadd.s32 4294967294, %s3989_s28   ;;  %s4091_s14 = sadd.s32 1, %s3989_s28  }
   0x5   : > { %6429 = sst [smem:[#allocation6_spill]] %s4091_s14  ;;  %s311_s15 = sadd.s32 1, %s3985_s27 }
   0x6   : > { %s308_s16 = ssub.s32 %s3989_s28, %s4091_s14  ;;  %p321_p0 = scmp.ne.s32.totalorder %s3985_s27, %s3981_s26 }
   0x7   : > { %p309_p1 = scmp.eq.s32.totalorder %s308_s16, 0  ;;  %p322_p2 = scmp.eq.s32.totalorder %s4087_s29, 1 }
   0x8   : > { %p327_p3 = scmp.ne.s32.totalorder %s3981_s26, %s3977_s25  ;;  %p328_p4 = scmp.eq.s32.totalorder %s2969_s30, 1 }
   0x9   : > { %s4102_s17 = scalar_select %p309_p1, %s3985_s27, %s311_s15  }
   0xa   : > { %p4104_p5 = por %p322_p2, %p321_p0  ;;  %p4108_p6 = por %p328_p4, %p327_p3 }
   0xb   : > { %6430 = sst [smem:[#allocation7_spill]] %s4102_s17  ;;  %p2972_p7 = scmp.ge.s32.totalorder %s3989_s28, 1 }
   0xc   : > { %s6432_s19 = scalar_select %p4108_p6, 1, 0 }
   0xd   : > { %p390_p8 = scmp.lt.s32.totalorder %s3989_s28, 3 }
   0xe   : > { %6433 = sst [smem:[#allocation8_spill]] %s6432_s19 }
   0xf   : > { %p391_p9 = pnand %p2972_p7, %p390_p8 }
  0x10   : > { %p434_p10 = scmp.lt.s32.totalorder (!%p391_p9), %s4087_s29, 1  ;;  %v475_v0 = vld [vmem:[%s6411_s1 + $0x8] sm:$0xff] (!%p391_p9)  ;;  %v477_v1 = vld [vmem:[%s6411_s1 + $0x18] sm:$0xff] (!%p391_p9)  ;;  %v474_v2 = vld [vmem:[%s6411_s1] sm:$0xff] (!%p391_p9)  ;;  %v3991_v12 = vmov (!%p391_p9), 0.0   ;;  %vm443_vm0 = vcmask (!%p391_p9), 1040384  }
  0x11   : > { %394 = sbr.rel (%p391_p9) target bundleno = 1755 (0x6db), region = 72  ;;  %v3055_v3 = vpack.c.bf16 (!%p391_p9), %v477_v1, %v475_v0  ;;  %v476_v4 = vld [vmem:[%s6411_s1 + $0x10] sm:$0xff] (!%p391_p9)  ;;  %v479_v5 = vld [vmem:[%s6411_s1 + $0x28] sm:$0xff] (!%p391_p9)  ;;  %v481_v6 = vld [vmem:[%s6411_s1 + $0x38] sm:$0xff] (!%p391_p9)  ;;  %570 = vmatprep.mubr.f32.mxu0 (!%p391_p9), %v3991_v12  ;;  %679 = vmatprep.mubr.f32.mxu1 (!%p391_p9), %v3991_v12  ;;  %s3992_s19 = smov (!%p391_p9), 64   ;;  %vm463_vm1 = vcmask (!%p391_p9), 523264  }
  0x12   : > { %v3057_v7 = vpack.c.bf16 (!%p391_p9), %v476_v4, %v474_v2  ;;  %v3059_v8 = vpack.c.bf16 (!%p391_p9), %v481_v6, %v479_v5  ;;  %v478_v9 = vld [vmem:[%s6411_s1 + $0x20] sm:$0xff] (!%p391_p9)  ;;  %v480_v10 = vld [vmem:[%s6411_s1 + $0x30] sm:$0xff] (!%p391_p9)  ;;  %v584_v11 = vld [vmem:[%s6412_s2 + $0x8] sm:$0xff] (!%p391_p9)  ;;  %vm449_vm2 = vcmask (!%p391_p9), 1046528   ;;  %vm708_vm3 = vcmask (!%p391_p9), 261120   ;;  %s3054_s15 = sshll.u32 (!%p391_p9), %s4087_s29, 12 }
  0x13   : > { %3056 = vmatprep.subr.bf16.mxu0 (!%p391_p9), %v3055_v3  ;;  %v586_v13 = vld [vmem:[%s6412_s2 + $0x18] sm:$0xff] (!%p391_p9)  ;;  %v583_v14 = vld [vmem:[%s6412_s2] sm:$0xff] (!%p391_p9)  ;;  %v585_v15 = vld [vmem:[%s6412_s2 + $0x10] sm:$0xff] (!%p391_p9)  ;;  %v3061_v16 = vpack.c.bf16 (!%p391_p9), %v480_v10, %v478_v9  ;;  %s6360_s14 = scalar_lea.hbm (!%p391_p9), %s6423_s13, %s3054_s15  ;;  %s3993_s17 = smov (!%p391_p9), [#allocation2]  }
  0x14   : > { %3058 = vmatpush1.bf16.msra.mxu0 (!%p391_p9), %v3057_v7  ;;  %v3087_v17 = vpack.c.bf16 (!%p391_p9), %v586_v13, %v584_v11  ;;  %v3089_v18 = vpack.c.bf16 (!%p391_p9), %v585_v15, %v583_v14  ;;  %v483_v19 = vld [vmem:[%s6411_s1 + $0x48] sm:$0xff] (!%p391_p9)  ;;  %v485_v20 = vld [vmem:[%s6411_s1 + $0x58] sm:$0xff] (!%p391_p9)  ;;  %v482_v21 = vld [vmem:[%s6411_s1 + $0x40] sm:$0xff] (!%p391_p9)  ;;  %s3931_s20 = sshll.u32 (!%p391_p9), %s3993_s17, 4  ;;  %s3932_s20 = int_to_ptr.vmem [resolvable:$false] %s3931_s20 }
  0x15   : > { %3060 = vmatprep.subr.bf16.mxu0 (!%p391_p9), %v3059_v8  ;;  %v3063_v22 = vpack.c.bf16 (!%p391_p9), %v485_v20, %v483_v19  ;;  %v484_v23 = vld [vmem:[%s6411_s1 + $0x50] sm:$0xff] (!%p391_p9)  ;;  %v588_v24 = vld [vmem:[%s6412_s2 + $0x28] sm:$0xff] (!%p391_p9)  ;;  %v590_v25 = vld [vmem:[%s6412_s2 + $0x38] sm:$0xff] (!%p391_p9)  ;;  %s3933_s22 = scalar_lea.vmem (!%p391_p9), %s3932_s20, 8192 }
  0x16   : > { %3088 = vmatprep.subr.bf16.mxu1 (!%p391_p9), %v3087_v17  ;;  %v3091_v28 = vpack.c.bf16 (!%p391_p9), %v590_v25, %v588_v24  ;;  %v587_v29 = vld [vmem:[%s6412_s2 + $0x20] sm:$0xff] (!%p391_p9)  ;;  %v589_v32 = vld [vmem:[%s6412_s2 + $0x30] sm:$0xff] (!%p391_p9)  ;;  %v487_v33 = vld [vmem:[%s6411_s1 + $0x68] sm:$0xff] (!%p391_p9)  ;;  %v3065_v35 = vpack.c.bf16 (!%p391_p9), %v484_v23, %v482_v21 }
  0x17   : > { %3090 = vmatpush1.bf16.msra.mxu1 (!%p391_p9), %v3089_v18  ;;  %v489_v34 = vld [vmem:[%s6411_s1 + $0x78] sm:$0xff] (!%p391_p9)  ;;  %v3093_v36 = vpack.c.bf16 (!%p391_p9), %v589_v32, %v587_v29  ;;  %v486_v37 = vld [vmem:[%s6411_s1 + $0x60] sm:$0xff] (!%p391_p9)  ;;  %v488_v38 = vld [vmem:[%s6411_s1 + $0x70] sm:$0xff] (!%p391_p9) }
  0x18   : > { %s435_s21 = scalar_select %p434_p10, %s4087_s29, 1  ;;  %3062 = vmatpush1.bf16.msra.mxu0 %v3061_v16  ;;  %3092 = vmatprep.subr.bf16.mxu1 %v3091_v28  ;;  %v592_v39 = vld [vmem:[%s6412_s2 + $0x48] sm:$0xff]  ;;  %v3067_v42 = vpack.c.bf16 %v489_v34, %v487_v33  ;;  %v594_v43 = vld [vmem:[%s6412_s2 + $0x58] sm:$0xff]  ;;  %v591_v44 = vld [vmem:[%s6412_s2 + $0x40] sm:$0xff]  ;;  %v3069_v53 = vpack.c.bf16 %v488_v38, %v486_v37 }
  0x19   : > { %3064 = vmatprep.subr.bf16.mxu0 %v3063_v22  ;;  %v593_v45 = vld [vmem:[%s6412_s2 + $0x50] sm:$0xff]  ;;  %v3095_v47 = vpack.c.bf16 %v594_v43, %v592_v39  ;;  %v491_v48 = vld [vmem:[%s6411_s1 + $0x88] sm:$0xff]  ;;  %v493_v49 = vld [vmem:[%s6411_s1 + $0x98] sm:$0xff] }
  0x1a   : > { %s3053_s24 = sshll.u32 %s435_s21, 4  ;;  %v3097_v50 = vpack.c.bf16 %v593_v45, %v591_v44  ;;  %v596_v51 = vld [vmem:[%s6412_s2 + $0x68] sm:$0xff]  ;;  %v598_v52 = vld [vmem:[%s6412_s2 + $0x78] sm:$0xff]  ;;  %v595_v55 = vld [vmem:[%s6412_s2 + $0x60] sm:$0xff]  ;;  %v3071_v57 = vpack.c.bf16 %v493_v49, %v491_v48 }
  0x1b   : > { %s438_s21 = scalar_lea.vmem %s6410_s0, %s3053_s24  ;;  %3094 = vmatpush1.bf16.msra.mxu1 %v3093_v36  ;;  %v3099_v54 = vpack.c.bf16 %v598_v52, %v596_v51  ;;  %v597_v56 = vld [vmem:[%s6412_s2 + $0x70] sm:$0xff]  ;;  %v490_v58 = vld [vmem:[%s6411_s1 + $0x80] sm:$0xff]  ;;  %v495_v60 = vld [vmem:[%s6411_s1 + $0xa8] sm:$0xff] }
  0x1c   : > { %v4175_v26 = vld [vmem:[%s438_s21] sm:$0xff]  ;;  %v4177_v27 = vld [vmem:[%s438_s21 + $0x8] sm:$0xff]  ;;  %3066 = vmatpush1.bf16.msra.mxu0 %v3065_v35  ;;  %3096 = vmatprep.subr.bf16.mxu1 %v3095_v47  ;;  %v492_v59 = vld [vmem:[%s6411_s1 + $0x90] sm:$0xff]  ;;  %v3101_v0 = vpack.c.bf16 %v597_v56, %v595_v55  ;;  %s431_s21 = sand.u32 1, %s3981_s26  }
  0x1d   : > { %v444_v30 = vrot.slane %v4175_v26, 7  ;;  %v445_v31 = vrot.slane %v4177_v27, 7  ;;  %468 = vrot.lane.b32.xlu1 %v4177_v27, %s3992_s19  ;;  %3068 = vmatprep.subr.bf16.mxu0 %v3067_v42  ;;  %v497_v61 = vld [vmem:[%s6411_s1 + $0xb8] sm:$0xff]  ;;  %v600_v62 = vld [vmem:[%s6412_s2 + $0x88] sm:$0xff]  ;;  %v3073_v1 = vpack.c.bf16 %v492_v59, %v490_v58  ;;  %v494_v2 = vld [vmem:[%s6411_s1 + $0xa0] sm:$0xff]  ;;  %v450_v44 = vrot.slane %v4175_v26, 1 }
  0x1e   : > { %v602_v63 = vld [vmem:[%s6412_s2 + $0x98] sm:$0xff]  ;;  %v599_v4 = vld [vmem:[%s6412_s2 + $0x80] sm:$0xff]  ;;  %v601_v5 = vld [vmem:[%s6412_s2 + $0x90] sm:$0xff]  ;;  %v3075_v6 = vpack.c.bf16 %v497_v61, %v495_v60  ;;  %v451_v45 = vrot.slane %v4177_v27, 1  ;;  %s2973_s23 = sshll.u32 %s431_s21, 8  ;;  %s6369_s29 = scalar_lea.sflag [#allocation3], %s431_s21 }
  0x1f   : > { %v448_v40 = vsel %vm443_vm0, 0.0, %v444_v30  ;;  %v446_v41 = vsel %vm443_vm0, %v444_v30, %v445_v31  ;;  %3098 = vmatpush1.bf16.msra.mxu1 %v3097_v50  ;;  %v3103_v3 = vpack.c.bf16 %v602_v63, %v600_v62  ;;  %v496_v7 = vld [vmem:[%s6411_s1 + $0xb0] sm:$0xff]  ;;  %v604_v8 = vld [vmem:[%s6412_s2 + $0xa8] sm:$0xff]  ;;  %v606_v9 = vld [vmem:[%s6412_s2 + $0xb8] sm:$0xff]  ;;  %v3105_v13 = vpack.c.bf16 %v601_v5, %v599_v4  ;;  %s6300_s30 = scalar_lea.vmem [#allocation2], %s2973_s23 }
  0x20   : > { %457 = vrot.lane.b32.xlu0 %v448_v40, %s3992_s19  ;;  %v3794_v46 = vpack.i.bf16 %v4175_v26, %v446_v41  ;;  %3070 = vmatpush1.bf16.msra.mxu0 %v3069_v53  ;;  %v499_v10 = vld [vmem:[%s6411_s1 + $0xc8] sm:$0xff]  ;;  %v501_v11 = vld [vmem:[%s6411_s1 + $0xd8] sm:$0xff]  ;;  %v3077_v14 = vpack.c.bf16 %v496_v7, %v494_v2  ;;  %v498_v15 = vld [vmem:[%s6411_s1 + $0xc0] sm:$0xff]  ;;  %v3107_v16 = vpack.c.bf16 %v606_v9, %v604_v8  ;;  %v455_v52 = vsel %vm449_vm2, %v451_v45, 0.0  ;;  %s2907_s16 = sshll.u32 %s6300_s30, 4  ;;  %s6362_s16 = int_to_ptr.vmem [resolvable:$true] %s2907_s16 }
  0x21   : > { %3100 = vmatprep.subr.bf16.mxu1 %v3099_v54  ;;  %3072 = vmatprep.subr.bf16.mxu0 %v3071_v57  ;;  %v603_v17 = vld [vmem:[%s6412_s2 + $0xa0] sm:$0xff]  ;;  %v605_v18 = vld [vmem:[%s6412_s2 + $0xb0] sm:$0xff]  ;;  %v3079_v19 = vpack.c.bf16 %v501_v11, %v499_v10  ;;  %v608_v21 = vld [vmem:[%s6412_s2 + $0xc8] sm:$0xff]  ;;  %v452_v48 = vsel %vm449_vm2, %v450_v44, %v451_v45  ;;  %p3934_p0 = scmp.lt.s32.totalorder %s6362_s16, %s3932_s20 }
  0x22   : > { %v500_v20 = vld [vmem:[%s6411_s1 + $0xd0] sm:$0xff]  ;;  %v610_v22 = vld [vmem:[%s6412_s2 + $0xd8] sm:$0xff]  ;;  %v503_v23 = vld [vmem:[%s6411_s1 + $0xe8] sm:$0xff]  ;;  %v3109_v25 = vpack.c.bf16 %v605_v18, %v603_v17 }
  0x23   : > { %3102 = vmatpush1.bf16.msra.mxu1 %v3101_v0  ;;  %v505_v24 = vld [vmem:[%s6411_s1 + $0xf8] sm:$0xff]  ;;  %v3081_v28 = vpack.c.bf16 %v500_v20, %v498_v15  ;;  %v502_v29 = vld [vmem:[%s6411_s1 + $0xe0] sm:$0xff]  ;;  %v3111_v30 = vpack.c.bf16 %v610_v22, %v608_v21  ;;  %v609_v32 = vld [vmem:[%s6412_s2 + $0xd0] sm:$0xff] }
  0x24   : > { %3795 = vrot.lane.b32.xlu0 %v3794_v46, %s3992_s19  ;;  %3074 = vmatpush1.bf16.msra.mxu0 %v3073_v1  ;;  %v607_v31 = vld [vmem:[%s6412_s2 + $0xc0] sm:$0xff]  ;;  %v3083_v33 = vpack.c.bf16 %v505_v24, %v503_v23  ;;  %v504_v34 = vld [vmem:[%s6411_s1 + $0xf0] sm:$0xff]  ;;  %v612_v35 = vld [vmem:[%s6412_s2 + $0xe8] sm:$0xff]  ;;  %s3927_s19 = scalar_lea.vmem %s6362_s16, 4096 }
  0x25   : > { %3104 = vmatprep.subr.bf16.mxu1 %v3103_v3  ;;  %3076 = vmatprep.subr.bf16.mxu0 %v3075_v6  ;;  %v614_v36 = vld [vmem:[%s6412_s2 + $0xf8] sm:$0xff]  ;;  %v3113_v37 = vpack.c.bf16 %v609_v32, %v607_v31  ;;  %v3085_v38 = vpack.c.bf16 %v504_v34, %v502_v29  ;;  %v611_v40 = vld [vmem:[%s6412_s2 + $0xe0] sm:$0xff]  ;;  %v613_v41 = vld [vmem:[%s6412_s2 + $0xf0] sm:$0xff]  ;;  %p3928_p11 = scmp.ne.s32.totalorder %s6362_s16, %s3927_s19  ;;  %p3935_p1 = scmp.lt.s32.totalorder %s3933_s22, %s3927_s19 }
  0x26   : > { %v3115_v39 = vpack.c.bf16 %v614_v36, %v612_v35  ;;  %v3117_v42 = vpack.c.bf16 %v613_v41, %v611_v40  ;;  %v875_v55 = vld [vmem:[%s6415_s5 + $0x8] sm:$0xff]  ;;  %v877_v56 = vld [vmem:[%s6415_s5 + $0x18] sm:$0xff]  ;;  %v876_v58 = vld [vmem:[%s6415_s5 + $0x10] sm:$0xff] }
  0x27   : > { %3106 = vmatpush1.bf16.msra.mxu1 %v3105_v13  ;;  %v3127_v57 = vpack.c.bf16 %v877_v56, %v875_v55  ;;  %v879_v59 = vld [vmem:[%s6415_s5 + $0x28] sm:$0xff]  ;;  %v881_v60 = vld [vmem:[%s6415_s5 + $0x38] sm:$0xff]  ;;  %v878_v63 = vld [vmem:[%s6415_s5 + $0x20] sm:$0xff]  ;;  %p3929_p12 = pnand %p3928_p11, %p4104_p5  ;;  %p3936_p2 = por %p3935_p1, %p3934_p0 }
  0x28   : > { %3078 = vmatpush1.bf16.msra.mxu0 %v3077_v14  ;;  %3108 = vmatprep.subr.bf16.mxu1 %v3107_v16  ;;  %v3131_v62 = vpack.c.bf16 %v881_v60, %v879_v59  ;;  %v880_v0 = vld [vmem:[%s6415_s5 + $0x30] sm:$0xff]  ;;  %v883_v1 = vld [vmem:[%s6415_s5 + $0x48] sm:$0xff]  ;;  %v885_v2 = vld [vmem:[%s6415_s5 + $0x58] sm:$0xff] }
  0x29   : > { %3080 = vmatprep.subr.bf16.mxu0 %v3079_v19  ;;  %v3133_v3 = vpack.c.bf16 %v880_v0, %v878_v63  ;;  %v3135_v4 = vpack.c.bf16 %v885_v2, %v883_v1  ;;  %v882_v5 = vld [vmem:[%s6415_s5 + $0x40] sm:$0xff]  ;;  %v884_v6 = vld [vmem:[%s6415_s5 + $0x50] sm:$0xff]  ;;  %v887_v7 = vld [vmem:[%s6415_s5 + $0x68] sm:$0xff]  ;;  %p3930_p13 = pneg %p3929_p12 }
  0x2a   : > { %v889_v8 = vld [vmem:[%s6415_s5 + $0x78] sm:$0xff]  ;;  %v3137_v9 = vpack.c.bf16 %v884_v6, %v882_v5  ;;  %v886_v11 = vld [vmem:[%s6415_s5 + $0x60] sm:$0xff]  ;;  %v888_v13 = vld [vmem:[%s6415_s5 + $0x70] sm:$0xff] }
  0x2b   : > { %3110 = vmatpush1.bf16.msra.mxu1 %v3109_v25  ;;  %v3139_v10 = vpack.c.bf16 %v889_v8, %v887_v7  ;;  %v891_v14 = vld [vmem:[%s6415_s5 + $0x88] sm:$0xff]  ;;  %v893_v15 = vld [vmem:[%s6415_s5 + $0x98] sm:$0xff]  ;;  %v3141_v16 = vpack.c.bf16 %v888_v13, %v886_v11  ;;  %v890_v18 = vld [vmem:[%s6415_s5 + $0x80] sm:$0xff]  ;;  %p3937_p3 = pnand %p3936_p2, %p3930_p13 }
  0x2c   : > { %3082 = vmatpush1.bf16.msra.mxu0 %v3081_v28  ;;  %3112 = vmatprep.subr.bf16.mxu1 %v3111_v30  ;;  %v3143_v17 = vpack.c.bf16 %v893_v15, %v891_v14  ;;  %v892_v19 = vld [vmem:[%s6415_s5 + $0x90] sm:$0xff]  ;;  %v895_v20 = vld [vmem:[%s6415_s5 + $0xa8] sm:$0xff]  ;;  %v897_v21 = vld [vmem:[%s6415_s5 + $0xb8] sm:$0xff] }
  0x2d   : > { %3084 = vmatprep.subr.bf16.mxu0 %v3083_v33  ;;  %v3145_v22 = vpack.c.bf16 %v892_v19, %v890_v18  ;;  %v3147_v23 = vpack.c.bf16 %v897_v21, %v895_v20  ;;  %v894_v24 = vld [vmem:[%s6415_s5 + $0xa0] sm:$0xff]  ;;  %v896_v25 = vld [vmem:[%s6415_s5 + $0xb0] sm:$0xff]  ;;  %v899_v28 = vld [vmem:[%s6415_s5 + $0xc8] sm:$0xff] }
  0x2e   : > { %v901_v29 = vld [vmem:[%s6415_s5 + $0xd8] sm:$0xff]  ;;  %v3149_v30 = vpack.c.bf16 %v896_v25, %v894_v24  ;;  %v898_v32 = vld [vmem:[%s6415_s5 + $0xc0] sm:$0xff]  ;;  %v900_v33 = vld [vmem:[%s6415_s5 + $0xd0] sm:$0xff] }
  0x2f   : > { %3114 = vmatpush1.bf16.msra.mxu1 %v3113_v37  ;;  %v3151_v31 = vpack.c.bf16 %v901_v29, %v899_v28  ;;  %v903_v34 = vld [vmem:[%s6415_s5 + $0xe8] sm:$0xff]  ;;  %v905_v35 = vld [vmem:[%s6415_s5 + $0xf8] sm:$0xff]  ;;  %v3153_v36 = vpack.c.bf16 %v900_v33, %v898_v32  ;;  %v906_v44 = vld [vmem:[%s6415_s5 + $0x100] sm:$0xff] }
  0x30   : > { %3086 = vmatpush1.bf16.msra.mxu0 %v3085_v38  ;;  %3116 = vmatprep.subr.bf16.mxu1 %v3115_v39  ;;  %v3155_v37 = vpack.c.bf16 %v905_v35, %v903_v34  ;;  %v902_v38 = vld [vmem:[%s6415_s5 + $0xe0] sm:$0xff]  ;;  %v904_v39 = vld [vmem:[%s6415_s5 + $0xf0] sm:$0xff]  ;;  %v907_v40 = vld [vmem:[%s6415_s5 + $0x108] sm:$0xff] }
  0x31   : > { %v909_v41 = vld [vmem:[%s6415_s5 + $0x118] sm:$0xff]  ;;  %v908_v45 = vld [vmem:[%s6415_s5 + $0x110] sm:$0xff]  ;;  %v914_v55 = vld [vmem:[%s6415_s5 + $0x140] sm:$0xff] }
  0x32   : > { %v916_v56 = vld [vmem:[%s6415_s5 + $0x150] sm:$0xff]  ;;  %v918_v60 = vld [vmem:[%s6415_s5 + $0x160] sm:$0xff]  ;;  %v925_v63 = vld [vmem:[%s6415_s5 + $0x198] sm:$0xff] }
  0x33   : > { %3118 = vmatpush1.bf16.msra.mxu1 %v3117_v42  ;;  %v3157_v42 = vpack.c.bf16 %v904_v39, %v902_v38  ;;  %v922_v2 = vld [vmem:[%s6415_s5 + $0x180] sm:$0xff]  ;;  %v929_v5 = vld [vmem:[%s6415_s5 + $0x1b8] sm:$0xff]  ;;  %v1181_v28 = vld [vmem:[%s6416_s6 + $0x8] sm:$0xff] }
  0x34   : > { %3128 = vmatprep.subr.bf16.mxu1 %v3127_v57  ;;  %v921_v57 = vld [vmem:[%s6415_s5 + $0x178] sm:$0xff]  ;;  %v926_v8 = vld [vmem:[%s6415_s5 + $0x1a0] sm:$0xff]  ;;  %vm4864_vm4 = vmneg %vm443_vm0 }
  0x35   : > { %v933_v11 = vld [vmem:[%s6415_s5 + $0x1d8] sm:$0xff]  ;;  %v930_v15 = vld [vmem:[%s6415_s5 + $0x1c0] sm:$0xff] }
  0x36   : > { %v1183_v29 = vld [vmem:[%s6416_s6 + $0x18] sm:$0xff]  ;;  %v1180_v35 = vld [vmem:[%s6416_s6] sm:$0xff] }
  0x37   : > { %v3255_v34 = vpack.c.bf16 %v1183_v29, %v1181_v28  ;;  %v1187_v38 = vld [vmem:[%s6416_s6 + $0x38] sm:$0xff]  ;;  %v692_v39 = vld [vmem:[%s6413_s3] sm:$0xff] }
  0x8f   : > { %v469_v51 = vpop.permute.xlu1 %468 }
  0x92   : > { %v458_v43 = vpop.permute.xlu0 %457 }
  0x93   : > { %v464_v46 = vsel %vm463_vm1, %v4175_v26, %v458_v43  ;;  %v473_v26 = vsel %vm463_vm1, %v455_v52, %v469_v51  ;;  %v3159_v43 = vpack.c.bf16 %v909_v41, %v907_v40  ;;  %v912_v51 = vld [vmem:[%s6415_s5 + $0x130] sm:$0xff]  ;;  %v915_v52 = vld [vmem:[%s6415_s5 + $0x148] sm:$0xff] }
  0x94   : > { %571 = vmatmul.mubr.f32.vlgmr.msra.gmra.mrb[0].mxu0 %v464_v46  ;;  %v911_v46 = vld [vmem:[%s6415_s5 + $0x128] sm:$0xff] }
  0x95   : > { %576 = vmatprep.mubr.f32.mxu0 %v3991_v12 }
  0x96   : > { %v3796_v47 = vpop.permute.xlu0 %3795 }
  0x97   : > { %v3798_v49 = vunpack.i.h.bf16 %v3796_v47  ;;  %v3797_v50 = vunpack.i.l.bf16 %v3796_v47  ;;  %v913_v47 = vld [vmem:[%s6415_s5 + $0x138] sm:$0xff] }
  0x99   : > { %v465_v53 = vsel %vm463_vm1, %v4177_v27, %v3797_v50  ;;  %v472_v54 = vsel %vm463_vm1, %v452_v48, %v3798_v49  ;;  %v874_v27 = vld [vmem:[%s6415_s5] sm:$0xff]  ;;  %v3161_v48 = vpack.c.bf16 %v908_v45, %v906_v44  ;;  %v3163_v49 = vpack.c.bf16 %v913_v47, %v911_v46  ;;  %v1189_v44 = vld [vmem:[%s6416_s6 + $0x48] sm:$0xff]  ;;  %v1191_v45 = vld [vmem:[%s6416_s6 + $0x58] sm:$0xff] }
  0x9a   : > { %577 = vmatmul.mubr.f32.gmra.mrb[2].mxu0 %v465_v53  ;;  %680 = vmatmul.mubr.f32.vlgmr.msra.gmra.mrb[0].mxu1 %v472_v54  ;;  %v3129_v61 = vpack.c.bf16 %v876_v58, %v874_v27  ;;  %v910_v50 = vld [vmem:[%s6415_s5 + $0x120] sm:$0xff]  ;;  %v917_v53 = vld [vmem:[%s6415_s5 + $0x158] sm:$0xff]  ;;  %v919_v27 = vld [vmem:[%s6415_s5 + $0x168] sm:$0xff]  ;;  %v3169_v58 = vpack.c.bf16 %v916_v56, %v914_v55 }
  0x9b   : > { %685 = vmatprep.mubr.f32.mxu1 %v3991_v12  ;;  %785 = vmatprep.mubr.f32.mxu0 %v3991_v12  ;;  %v3165_v54 = vpack.c.bf16 %v912_v51, %v910_v50  ;;  %v3171_v59 = vpack.c.bf16 %v921_v57, %v919_v27  ;;  %v693_v46 = vld [vmem:[%s6413_s3 + $0x8] sm:$0xff]  ;;  %v1190_v50 = vld [vmem:[%s6416_s6 + $0x50] sm:$0xff]  ;;  %v1192_v55 = vld [vmem:[%s6416_s6 + $0x60] sm:$0xff] }
  0x9c   : > { %3130 = vmatpush1.bf16.msra.mxu1 %v3129_v61  ;;  %v920_v61 = vld [vmem:[%s6415_s5 + $0x170] sm:$0xff]  ;;  %v1193_v51 = vld [vmem:[%s6416_s6 + $0x68] sm:$0xff]  ;;  %v1199_v57 = vld [vmem:[%s6416_s6 + $0x98] sm:$0xff] }
  0x9d   : > { %3132 = vmatprep.subr.bf16.mxu1 %v3131_v62  ;;  %v923_v62 = vld [vmem:[%s6415_s5 + $0x188] sm:$0xff]  ;;  %v3173_v0 = vpack.c.bf16 %v920_v61, %v918_v60  ;;  %v1194_v56 = vld [vmem:[%s6416_s6 + $0x70] sm:$0xff]  ;;  %v1196_v61 = vld [vmem:[%s6416_s6 + $0x80] sm:$0xff] }
  0x9e   : > { %686 = vmatmul.mubr.f32.gmra.mrb[2].mxu1 %v473_v26  ;;  %v3167_v26 = vpack.c.bf16 %v917_v53, %v915_v52  ;;  %v3175_v1 = vpack.c.bf16 %v925_v63, %v923_v62  ;;  %v1195_v52 = vld [vmem:[%s6416_s6 + $0x78] sm:$0xff]  ;;  %v694_v53 = vld [vmem:[%s6413_s3 + $0x10] sm:$0xff]  ;;  %v1197_v27 = vld [vmem:[%s6416_s6 + $0x88] sm:$0xff] }
  0x9f   : > { %v3271_v60 = vpack.c.bf16 %v1199_v57, %v1197_v27  ;;  %v1198_v62 = vld [vmem:[%s6416_s6 + $0x90] sm:$0xff]  ;;  %v1201_v63 = vld [vmem:[%s6416_s6 + $0xa8] sm:$0xff]  ;;  %v934_v57 = vld [vmem:[%s6415_s5 + $0x1e0] sm:$0xff] }
  0xa0   : > { %3134 = vmatpush1.bf16.msra.mxu1 %v3133_v3  ;;  %v924_v3 = vld [vmem:[%s6415_s5 + $0x190] sm:$0xff] }
  0xa1   : > { %3136 = vmatprep.subr.bf16.mxu1 %v3135_v4  ;;  %v927_v4 = vld [vmem:[%s6415_s5 + $0x1a8] sm:$0xff]  ;;  %v3177_v6 = vpack.c.bf16 %v924_v3, %v922_v2  ;;  %v1200_v3 = vld [vmem:[%s6416_s6 + $0xa0] sm:$0xff]  ;;  %v1234_v27 = vld [vmem:[%s6416_s6 + $0x1b0] sm:$0xff] }
  0xa2   : > { %v3179_v7 = vpack.c.bf16 %v929_v5, %v927_v4  ;;  %v1202_v4 = vld [vmem:[%s6416_s6 + $0xb0] sm:$0xff]  ;;  %v1205_v5 = vld [vmem:[%s6416_s6 + $0xc8] sm:$0xff] }
  0xa4   : > { %3138 = vmatpush1.bf16.msra.mxu1 %v3137_v9  ;;  %v928_v9 = vld [vmem:[%s6415_s5 + $0x1b0] sm:$0xff] }
  0xa5   : > { %3140 = vmatprep.subr.bf16.mxu1 %v3139_v10  ;;  %v931_v10 = vld [vmem:[%s6415_s5 + $0x1c8] sm:$0xff]  ;;  %v3181_v13 = vpack.c.bf16 %v928_v9, %v926_v8  ;;  %v1204_v9 = vld [vmem:[%s6416_s6 + $0xc0] sm:$0xff] }
  0xa6   : > { %v3183_v14 = vpack.c.bf16 %v933_v11, %v931_v10  ;;  %v1206_v10 = vld [vmem:[%s6416_s6 + $0xd0] sm:$0xff]  ;;  %v1209_v11 = vld [vmem:[%s6416_s6 + $0xe8] sm:$0xff] }
  0xa8   : > { %3142 = vmatpush1.bf16.msra.mxu1 %v3141_v16  ;;  %v932_v16 = vld [vmem:[%s6415_s5 + $0x1d0] sm:$0xff] }
  0xa9   : > { %3144 = vmatprep.subr.bf16.mxu1 %v3143_v17  ;;  %v3185_v17 = vpack.c.bf16 %v932_v16, %v930_v15  ;;  %v1208_v16 = vld [vmem:[%s6416_s6 + $0xe0] sm:$0xff] }
  0xac   : > { %3146 = vmatpush1.bf16.msra.mxu1 %v3145_v22 }
  0xad   : > { %3148 = vmatprep.subr.bf16.mxu1 %v3147_v23 }
  0xb0   : > { %3150 = vmatpush1.bf16.msra.mxu1 %v3149_v30 }
  0xb1   : > { %3152 = vmatprep.subr.bf16.mxu1 %v3151_v31 }
  0xb4   : > { %3154 = vmatpush1.bf16.msra.mxu1 %v3153_v36  ;;  %v1182_v36 = vld [vmem:[%s6416_s6 + $0x10] sm:$0xff] }
  0xb5   : > { %3156 = vmatprep.subr.bf16.mxu1 %v3155_v37  ;;  %v1185_v37 = vld [vmem:[%s6416_s6 + $0x28] sm:$0xff]  ;;  %v3257_v40 = vpack.c.bf16 %v1182_v36, %v1180_v35  ;;  %v1220_v36 = vld [vmem:[%s6416_s6 + $0x140] sm:$0xff] }
  0xb6   : > { %v3259_v41 = vpack.c.bf16 %v1187_v38, %v1185_v37  ;;  %v1222_v37 = vld [vmem:[%s6416_s6 + $0x150] sm:$0xff]  ;;  %v1225_v38 = vld [vmem:[%s6416_s6 + $0x168] sm:$0xff] }
  0xb8   : > { %3158 = vmatpush1.bf16.msra.mxu1 %v3157_v42  ;;  %v1184_v42 = vld [vmem:[%s6416_s6 + $0x20] sm:$0xff] }
  0xb9   : > { %3160 = vmatprep.subr.bf16.mxu1 %v3159_v43  ;;  %v1186_v43 = vld [vmem:[%s6416_s6 + $0x30] sm:$0xff] }
  0xba   : > { %v3261_v47 = vpack.c.bf16 %v1186_v43, %v1184_v42  ;;  %v1224_v42 = vld [vmem:[%s6416_s6 + $0x160] sm:$0xff]  ;;  %v1226_v43 = vld [vmem:[%s6416_s6 + $0x170] sm:$0xff] }
  0xbc   : > { %3162 = vmatpush1.bf16.msra.mxu1 %v3161_v48  ;;  %v3263_v48 = vpack.c.bf16 %v1191_v45, %v1189_v44  ;;  %v1229_v44 = vld [vmem:[%s6416_s6 + $0x188] sm:$0xff]  ;;  %v1231_v45 = vld [vmem:[%s6416_s6 + $0x198] sm:$0xff] }
  0xbd   : > { %3164 = vmatprep.subr.bf16.mxu1 %v3163_v49  ;;  %v1188_v49 = vld [vmem:[%s6416_s6 + $0x40] sm:$0xff] }
  0xc0   : > { %3166 = vmatpush1.bf16.msra.mxu1 %v3165_v54  ;;  %v3265_v54 = vpack.c.bf16 %v1190_v50, %v1188_v49  ;;  %v1230_v49 = vld [vmem:[%s6416_s6 + $0x190] sm:$0xff] }
  0xc1   : > { %3168 = vmatprep.subr.bf16.mxu1 %v3167_v26  ;;  %v3267_v26 = vpack.c.bf16 %v1195_v52, %v1193_v51  ;;  %v1233_v51 = vld [vmem:[%s6416_s6 + $0x1a8] sm:$0xff]  ;;  %v1235_v52 = vld [vmem:[%s6416_s6 + $0x1b8] sm:$0xff] }
  0xc4   : > { %3170 = vmatpush1.bf16.msra.mxu1 %v3169_v58  ;;  %v695_v58 = vld [vmem:[%s6413_s3 + $0x18] sm:$0xff] }
  0xc5   : > { %3172 = vmatprep.subr.bf16.mxu1 %v3171_v59  ;;  %v3269_v59 = vpack.c.bf16 %v1194_v56, %v1192_v55  ;;  %v1232_v55 = vld [vmem:[%s6416_s6 + $0x1a0] sm:$0xff] }
  0xc8   : > { %3174 = vmatpush1.bf16.msra.mxu1 %v3173_v0  ;;  %v1203_v0 = vld [vmem:[%s6416_s6 + $0xb8] sm:$0xff] }
  0xc9   : > { %3176 = vmatprep.subr.bf16.mxu1 %v3175_v1  ;;  %v3273_v1 = vpack.c.bf16 %v1198_v62, %v1196_v61  ;;  %v3275_v2 = vpack.c.bf16 %v1203_v0, %v1201_v63  ;;  %v1237_v61 = vld [vmem:[%s6416_s6 + $0x1c8] sm:$0xff]  ;;  %v1239_v62 = vld [vmem:[%s6416_s6 + $0x1d8] sm:$0xff] }
  0xca   : > { %v3311_v63 = vpack.c.bf16 %v1239_v62, %v1237_v61  ;;  %v939_v0 = vld [vmem:[%s6415_s5 + $0x208] sm:$0xff]  ;;  %v953_v61 = vld [vmem:[%s6415_s5 + $0x278] sm:$0xff] }
  0xcc   : > { %3178 = vmatpush1.bf16.msra.mxu1 %v3177_v6  ;;  %v1207_v6 = vld [vmem:[%s6416_s6 + $0xd8] sm:$0xff] }
  0xcd   : > { %3180 = vmatprep.subr.bf16.mxu1 %v3179_v7  ;;  %v3277_v7 = vpack.c.bf16 %v1202_v4, %v1200_v3  ;;  %v3279_v8 = vpack.c.bf16 %v1207_v6, %v1205_v5  ;;  %v1238_v4 = vld [vmem:[%s6416_s6 + $0x1d0] sm:$0xff]  ;;  %v1241_v6 = vld [vmem:[%s6416_s6 + $0x1e8] sm:$0xff] }
  0xd0   : > { %3182 = vmatpush1.bf16.msra.mxu1 %v3181_v13  ;;  %v1211_v13 = vld [vmem:[%s6416_s6 + $0xf8] sm:$0xff] }
  0xd1   : > { %3184 = vmatprep.subr.bf16.mxu1 %v3183_v14  ;;  %v3281_v14 = vpack.c.bf16 %v1206_v10, %v1204_v9  ;;  %v3283_v15 = vpack.c.bf16 %v1211_v13, %v1209_v11  ;;  %v1240_v9 = vld [vmem:[%s6416_s6 + $0x1e0] sm:$0xff]  ;;  %v1242_v10 = vld [vmem:[%s6416_s6 + $0x1f0] sm:$0xff]  ;;  %v1245_v13 = vld [vmem:[%s6416_s6 + $0x208] sm:$0xff] }
  0xd2   : > { %v3317_v11 = vpack.c.bf16 %v1242_v10, %v1240_v9 }
  0xd4   : > { %3186 = vmatpush1.bf16.msra.mxu1 %v3185_v17  ;;  %v1210_v17 = vld [vmem:[%s6416_s6 + $0xf0] sm:$0xff] }
 0x167   : > { %v572_v18 = vpop.f32.mrb[0].mxu0 }
 0x168   : > { %v574_v19 = vpop.f32.mrb[1].mxu0 }
 0x16d   : > { %v578_v20 = vpop.f32.mrb[2].mxu0  ;;  %v681_v21 = vpop.f32.mrb[0].mxu1 }
 0x16e   : > { %v3121_v22 = vpack.c.bf16 %v578_v20, %v572_v18  ;;  %v580_v23 = vpop.f32.mrb[3].mxu0  ;;  %v683_v24 = vpop.f32.mrb[1].mxu1  ;;  %v1213_v18 = vld [vmem:[%s6416_s6 + $0x108] sm:$0xff]  ;;  %v3285_v20 = vpack.c.bf16 %v1210_v17, %v1208_v16  ;;  %v698_v16 = vlaneseq }
 0x16f   : > { %v3119_v25 = vpack.c.bf16 %v580_v23, %v574_v19  ;;  %v1215_v19 = vld [vmem:[%s6416_s6 + $0x118] sm:$0xff]  ;;  %v1214_v23 = vld [vmem:[%s6416_s6 + $0x110] sm:$0xff] }
 0x170   : > { %v699_v17 = vshrl.u32 %v698_v16, 7 }
 0x171   : > { %v687_v30 = vpop.f32.mrb[2].mxu1  ;;  %3120 = vmatprep.subr.bf16.mxu0 %v3119_v25  ;;  %v1219_v25 = vld [vmem:[%s6416_s6 + $0x138] sm:$0xff] }
 0x172   : > { %v3125_v31 = vpack.c.bf16 %v687_v30, %v681_v21  ;;  %v689_v32 = vpop.f32.mrb[3].mxu1  ;;  %3122 = vmatpush1.bf16.msra.mxu0 %v3121_v22  ;;  %v3287_v21 = vpack.c.bf16 %v1215_v19, %v1213_v18  ;;  %v1212_v22 = vld [vmem:[%s6416_s6 + $0x100] sm:$0xff]  ;;  %v4754_v18 = vsub.s32 0, %v699_v17 }
 0x173   : > { %v3123_v33 = vpack.c.bf16 %v689_v32, %v683_v24  ;;  %v1217_v24 = vld [vmem:[%s6416_s6 + $0x128] sm:$0xff]  ;;  %v3289_v28 = vpack.c.bf16 %v1214_v23, %v1212_v22  ;;  %v1216_v30 = vld [vmem:[%s6416_s6 + $0x120] sm:$0xff] }
 0x174   : > { %v3291_v29 = vpack.c.bf16 %v1219_v25, %v1217_v24  ;;  %v1221_v32 = vld [vmem:[%s6416_s6 + $0x148] sm:$0xff]  ;;  %v696_v19 = vld [vmem:[%s6414_s4] sm:$0x3] }
 0x175   : > { %3124 = vmatprep.subr.bf16.mxu0 %v3123_v33  ;;  %v1223_v33 = vld [vmem:[%s6416_s6 + $0x158] sm:$0xff] }
 0x176   : > { %3126 = vmatpush1.bf16.msra.mxu0 %v3125_v31  ;;  %v1218_v31 = vld [vmem:[%s6416_s6 + $0x130] sm:$0xff]  ;;  %v3295_v35 = vpack.c.bf16 %v1223_v33, %v1221_v32  ;;  %v945_v32 = vld [vmem:[%s6415_s5 + $0x238] sm:$0xff] }
 0x177   : > { %3256 = vmatprep.subr.bf16.mxu0 %v3255_v34  ;;  %v3293_v34 = vpack.c.bf16 %v1218_v31, %v1216_v30  ;;  %v943_v31 = vld [vmem:[%s6415_s5 + $0x228] sm:$0xff] }
 0x179   : > { %2976 = vmatmul.mubr.msk.f32.vlgmr.msra.gmra.mrb[4].mxu0 %vm708_vm3, %v692_v39  ;;  %v1227_v39 = vld [vmem:[%s6416_s6 + $0x178] sm:$0xff] }
 0x17a   : > { %791 = vmatprep.mubr.f32.mxu0 %v3991_v12  ;;  %3258 = vmatpush1.bf16.msra.mxu0 %v3257_v40  ;;  %v3297_v40 = vpack.c.bf16 %v1222_v37, %v1220_v36 }
 0x17b   : > { %3260 = vmatprep.subr.bf16.mxu0 %v3259_v41  ;;  %v3299_v41 = vpack.c.bf16 %v1227_v39, %v1225_v38  ;;  %v3195_v39 = vpack.c.bf16 %v945_v32, %v943_v31  ;;  %v1252_v32 = vld [vmem:[%s6416_s6 + $0x240] sm:$0xff] }
 0x17d   : > { %2977 = vmatmul.mubr.msk.f32.gmra.mrb[6].mxu0 %vm708_vm3, %v693_v46  ;;  %v3301_v46 = vpack.c.bf16 %v1226_v43, %v1224_v42  ;;  %v947_v43 = vld [vmem:[%s6415_s5 + $0x248] sm:$0xff] }
 0x17e   : > { %797 = vmatprep.mubr.f32.mxu0 %v3991_v12  ;;  %3262 = vmatpush1.bf16.msra.mxu0 %v3261_v47  ;;  %v3303_v47 = vpack.c.bf16 %v1231_v45, %v1229_v44  ;;  %v949_v44 = vld [vmem:[%s6415_s5 + $0x258] sm:$0xff] }
 0x17f   : > { %3264 = vmatprep.subr.bf16.mxu0 %v3263_v48  ;;  %v1228_v48 = vld [vmem:[%s6416_s6 + $0x180] sm:$0xff] }
 0x180   : > { %v3305_v50 = vpack.c.bf16 %v1230_v49, %v1228_v48  ;;  %v1244_v49 = vld [vmem:[%s6416_s6 + $0x200] sm:$0xff] }
 0x181   : > { %2978 = vmatmul.mubr.msk.f32.gmra.mrb[8].mxu0 %vm708_vm3, %v694_v53  ;;  %v3307_v53 = vpack.c.bf16 %v1235_v52, %v1233_v51  ;;  %v946_v51 = vld [vmem:[%s6415_s5 + $0x240] sm:$0xff] }
 0x182   : > { %803 = vmatprep.mubr.f32.mxu0 %v3991_v12  ;;  %3266 = vmatpush1.bf16.msra.mxu0 %v3265_v54  ;;  %v935_v54 = vld [vmem:[%s6415_s5 + $0x1e8] sm:$0xff] }
 0x183   : > { %3268 = vmatprep.subr.bf16.mxu0 %v3267_v26  ;;  %v937_v26 = vld [vmem:[%s6415_s5 + $0x1f8] sm:$0xff] }
 0x184   : > { %v3187_v56 = vpack.c.bf16 %v937_v26, %v935_v54  ;;  %v3199_v26 = vpack.c.bf16 %v949_v44, %v947_v43 }
 0x185   : > { %2979 = vmatmul.mubr.msk.f32.gmra.mrb[10].mxu0 %vm708_vm3, %v695_v58  ;;  %v936_v58 = vld [vmem:[%s6415_s5 + $0x1f0] sm:$0xff] }
 0x186   : > { %3270 = vmatpush1.bf16.msra.mxu0 %v3269_v59  ;;  %v3309_v59 = vpack.c.bf16 %v1234_v27, %v1232_v55  ;;  %3188 = vmatprep.subr.bf16.mxu1 %v3187_v56  ;;  %v948_v55 = vld [vmem:[%s6415_s5 + $0x250] sm:$0xff]  ;;  %v1249_v56 = vld [vmem:[%s6416_s6 + $0x228] sm:$0xff]  ;;  %v1251_v27 = vld [vmem:[%s6416_s6 + $0x238] sm:$0xff] }
 0x187   : > { %3272 = vmatprep.subr.bf16.mxu0 %v3271_v60  ;;  %v3189_v60 = vpack.c.bf16 %v936_v58, %v934_v57 }
 0x189   : > { %3190 = vmatpush1.bf16.msra.mxu1 %v3189_v60  ;;  %v951_v60 = vld [vmem:[%s6415_s5 + $0x268] sm:$0xff] }
 0x18a   : > { %3274 = vmatpush1.bf16.msra.mxu0 %v3273_v1  ;;  %v941_v1 = vld [vmem:[%s6415_s5 + $0x218] sm:$0xff] }
 0x18b   : > { %3276 = vmatprep.subr.bf16.mxu0 %v3275_v2  ;;  %v1236_v2 = vld [vmem:[%s6416_s6 + $0x1c0] sm:$0xff]  ;;  %v3191_v3 = vpack.c.bf16 %v941_v1, %v939_v0 }
 0x18c   : > { %v3313_v5 = vpack.c.bf16 %v1238_v4, %v1236_v2  ;;  %v3201_v4 = vpack.c.bf16 %v948_v55, %v946_v51  ;;  %v1258_v55 = vld [vmem:[%s6416_s6 + $0x270] sm:$0xff] }
 0x18d   : > { %3192 = vmatprep.subr.bf16.mxu1 %v3191_v3 }
 0x18e   : > { %3278 = vmatpush1.bf16.msra.mxu0 %v3277_v7  ;;  %v1243_v7 = vld [vmem:[%s6416_s6 + $0x1f8] sm:$0xff] }
 0x18f   : > { %3280 = vmatprep.subr.bf16.mxu0 %v3279_v8  ;;  %v3315_v8 = vpack.c.bf16 %v1243_v7, %v1241_v6  ;;  %v1248_v6 = vld [vmem:[%s6416_s6 + $0x220] sm:$0xff]  ;;  %v1250_v7 = vld [vmem:[%s6416_s6 + $0x230] sm:$0xff] }
 0x192   : > { %3282 = vmatpush1.bf16.msra.mxu0 %v3281_v14  ;;  %v1247_v14 = vld [vmem:[%s6416_s6 + $0x218] sm:$0xff] }
 0x193   : > { %3284 = vmatprep.subr.bf16.mxu0 %v3283_v15  ;;  %v3319_v15 = vpack.c.bf16 %v1247_v14, %v1245_v13  ;;  %v950_v14 = vld [vmem:[%s6415_s5 + $0x260] sm:$0xff] }
 0x196   : > { %3286 = vmatpush1.bf16.msra.mxu0 %v3285_v20  ;;  %v4759_v20 = vsub.s32 1, %v699_v17 }
 0x197   : > { %3288 = vmatprep.subr.bf16.mxu0 %v3287_v21  ;;  %v701_v21 = vrot.slane %v696_v19, %v4754_v18 }
 0x198   : > { %v4763_v22 = vrot.slane %v696_v19, %v4759_v20  ;;  %v1253_v19 = vld [vmem:[%s6416_s6 + $0x248] sm:$0xff] }
 0x19a   : > { %3290 = vmatpush1.bf16.msra.mxu0 %v3289_v28  ;;  %v938_v28 = vld [vmem:[%s6415_s5 + $0x200] sm:$0xff] }
 0x19b   : > { %3292 = vmatprep.subr.bf16.mxu0 %v3291_v29  ;;  %v940_v29 = vld [vmem:[%s6415_s5 + $0x210] sm:$0xff] }
 0x19e   : > { %3294 = vmatpush1.bf16.msra.mxu0 %v3293_v34 }
 0x19f   : > { %3296 = vmatprep.subr.bf16.mxu0 %v3295_v35  ;;  %v3193_v35 = vpack.c.bf16 %v940_v29, %v938_v28  ;;  %v957_v28 = vld [vmem:[%s6415_s5 + $0x298] sm:$0xff] }
 0x1a2   : > { %3298 = vmatpush1.bf16.msra.mxu0 %v3297_v40  ;;  %v942_v40 = vld [vmem:[%s6415_s5 + $0x220] sm:$0xff] }
 0x1a3   : > { %3300 = vmatprep.subr.bf16.mxu0 %v3299_v41  ;;  %v944_v41 = vld [vmem:[%s6415_s5 + $0x230] sm:$0xff] }
 0x1a4   : > { %v3197_v48 = vpack.c.bf16 %v944_v41, %v942_v40  ;;  %v956_v40 = vld [vmem:[%s6415_s5 + $0x290] sm:$0xff]  ;;  %v1257_v41 = vld [vmem:[%s6416_s6 + $0x268] sm:$0xff] }
 0x1a6   : > { %3302 = vmatpush1.bf16.msra.mxu0 %v3301_v46 }
 0x1a7   : > { %3304 = vmatprep.subr.bf16.mxu0 %v3303_v47 }
 0x1aa   : > { %3306 = vmatpush1.bf16.msra.mxu0 %v3305_v50  ;;  %v1246_v50 = vld [vmem:[%s6416_s6 + $0x210] sm:$0xff] }
 0x1ab   : > { %3308 = vmatprep.subr.bf16.mxu0 %v3307_v53  ;;  %v3321_v0 = vpack.c.bf16 %v1246_v50, %v1244_v49  ;;  %v961_v49 = vld [vmem:[%s6415_s5 + $0x2b8] sm:$0xff] }
 0x1ae   : > { %3310 = vmatpush1.bf16.msra.mxu0 %v3309_v59 }
 0x1af   : > { %3312 = vmatprep.subr.bf16.mxu0 %v3311_v63 }
 0x1b2   : > { %3314 = vmatpush1.bf16.msra.mxu0 %v3313_v5  ;;  %v3323_v5 = vpack.c.bf16 %v1251_v27, %v1249_v56  ;;  %v958_v56 = vld [vmem:[%s6415_s5 + $0x2a0] sm:$0xff] }
 0x1b3   : > { %3316 = vmatprep.subr.bf16.mxu0 %v3315_v8 }
 0x1b6   : > { %3318 = vmatpush1.bf16.msra.mxu0 %v3317_v11  ;;  %v3203_v11 = vpack.c.bf16 %v953_v61, %v951_v60  ;;  %v963_v60 = vld [vmem:[%s6415_s5 + $0x2c8] sm:$0xff]  ;;  %v965_v61 = vld [vmem:[%s6415_s5 + $0x2d8] sm:$0xff] }
 0x1b7   : > { %3320 = vmatprep.subr.bf16.mxu0 %v3319_v15  ;;  %v952_v15 = vld [vmem:[%s6415_s5 + $0x270] sm:$0xff] }
 0x1b8   : > { %v3205_v31 = vpack.c.bf16 %v952_v15, %v950_v14 }
 0x24c   : > { %v787_v23 = vpop.f32.mrb[4].mxu0 }
 0x24d   : > { %v788_v24 = vadd.f32 %v787_v23, %v701_v21  ;;  %v789_v25 = vpop.f32.mrb[5].mxu0 }
 0x24e   : > { %v790_v30 = vadd.f32 %v789_v25, %v4763_v22  ;;  %v955_v25 = vld [vmem:[%s6415_s5 + $0x288] sm:$0xff] }
 0x24f   : > { %v4780_v36 = vmax.f32 %v788_v24, 0.0  ;;  %v3325_v24 = vpack.c.bf16 %v1250_v7, %v1248_v6  ;;  %v3215_v6 = vpack.c.bf16 %v965_v61, %v963_v60  ;;  %v964_v7 = vld [vmem:[%s6415_s5 + $0x2d0] sm:$0xff] }
 0x250   : > { %v4778_v33 = vmax.f32 %v790_v30, 0.0  ;;  %v793_v34 = vpop.f32.mrb[6].mxu0 }
 0x251   : > { %v794_v37 = vadd.f32 %v793_v34, %v701_v21  ;;  %v795_v38 = vpop.f32.mrb[7].mxu0  ;;  %v850_v62 = vrot.slane %v4780_v36, 1  ;;  %v1254_v34 = vld [vmem:[%s6416_s6 + $0x250] sm:$0xff] }
 0x252   : > { %v796_v42 = vadd.f32 %v795_v38, %v4763_v22  ;;  %1066 = vmatprep.mubr.f32.mxu1 %v4778_v33  ;;  %v853_v58 = vrot.slane %v4778_v33, 1  ;;  %v827_v43 = vrot.slane %v4778_v33, 7  ;;  %v3329_v51 = vpack.c.bf16 %v1254_v34, %v1252_v32 }
 0x253   : > { %v4796_v45 = vmax.f32 %v794_v37, 0.0  ;;  %1067 = vmatmul.mubr.f32.vlgmr.msra.gmra.mrb[4].mxu1 %v4780_v36 }
 0x254   : > { %v4799_v46 = vmax.f32 %v796_v42, 0.0  ;;  %3194 = vmatpush1.bf16.msra.mxu1 %v3193_v35  ;;  %v799_v47 = vpop.f32.mrb[8].mxu0  ;;  %v954_v35 = vld [vmem:[%s6415_s5 + $0x280] sm:$0xff]  ;;  %v1259_v42 = vld [vmem:[%s6416_s6 + $0x278] sm:$0xff] }
 0x255   : > { %v851_v52 = vrot.slane %v4796_v45, 1  ;;  %v800_v53 = vadd.f32 %v799_v47, %v701_v21  ;;  %v801_v54 = vpop.f32.mrb[9].mxu0  ;;  %3196 = vmatprep.subr.bf16.mxu1 %v3195_v39  ;;  %v3207_v47 = vpack.c.bf16 %v957_v28, %v955_v25  ;;  %v1269_v25 = vld [vmem:[%s6416_s6 + $0x2c8] sm:$0xff]  ;;  %v1271_v28 = vld [vmem:[%s6416_s6 + $0x2d8] sm:$0xff] }
 0x256   : > { %v802_v57 = vadd.f32 %v801_v54, %v4763_v22  ;;  %1072 = vmatprep.mubr.f32.mxu1 %v4799_v46  ;;  %v854_v59 = vrot.slane %v4799_v46, 1  ;;  %v3331_v54 = vpack.c.bf16 %v1259_v42, %v1257_v41  ;;  %v972_v41 = vld [vmem:[%s6415_s5 + $0x310] sm:$0xff]  ;;  %v1273_v42 = vld [vmem:[%s6416_s6 + $0x2e8] sm:$0xff] }
 0x257   : > { %v4831_v63 = vmax.f32 %v800_v53, 0.0  ;;  %1073 = vmatmul.mubr.f32.gmra.mrb[6].mxu1 %v4796_v45  ;;  %v852_v10 = vsel %vm449_vm2, %v850_v62, %v851_v52  ;;  %v3209_v53 = vpack.c.bf16 %v956_v40, %v954_v35  ;;  %v3343_v35 = vpack.c.bf16 %v1271_v28, %v1269_v25  ;;  %v989_v25 = vld [vmem:[%s6415_s5 + $0x398] sm:$0xff] }
 0x258   : > { %v4834_v1 = vmax.f32 %v802_v57, 0.0  ;;  %3198 = vmatpush1.bf16.msra.mxu1 %v3197_v48  ;;  %v805_v2 = vpop.f32.mrb[10].mxu0  ;;  %v855_v3 = vsel %vm449_vm2, %v853_v58, %v854_v59  ;;  %v959_v48 = vld [vmem:[%s6415_s5 + $0x2a8] sm:$0xff]  ;;  %v960_v57 = vld [vmem:[%s6415_s5 + $0x2b0] sm:$0xff] }
 0x259   : > { %v806_v8 = vadd.f32 %v805_v2, %v701_v21  ;;  %v807_v9 = vpop.f32.mrb[11].mxu0  ;;  %1372 = vmatprep.mubr.f32.mxu0 %v855_v3  ;;  %3200 = vmatprep.subr.bf16.mxu1 %v3199_v26  ;;  %v856_v13 = vrot.slane %v4831_v63, 1  ;;  %v1255_v21 = vld [vmem:[%s6416_s6 + $0x258] sm:$0xff]  ;;  %v1256_v26 = vld [vmem:[%s6416_s6 + $0x260] sm:$0xff]  ;;  %v3211_v27 = vpack.c.bf16 %v961_v49, %v959_v48  ;;  %v1261_v58 = vld [vmem:[%s6416_s6 + $0x288] sm:$0xff] }
 0x25a   : > { %v808_v16 = vadd.f32 %v807_v9, %v4763_v22  ;;  %1078 = vmatprep.mubr.f32.mxu1 %v4834_v1  ;;  %1373 = vmatmul.mubr.f32.vlgmr.msra.gmra.mrb[12].mxu0 %v852_v10  ;;  %v858_v17 = vrot.slane %v4834_v1, 1  ;;  %v3327_v38 = vpack.c.bf16 %v1255_v21, %v1253_v19  ;;  %v3333_v62 = vpack.c.bf16 %v1258_v55, %v1256_v26  ;;  %v1260_v3 = vld [vmem:[%s6416_s6 + $0x280] sm:$0xff]  ;;  %v1267_v9 = vld [vmem:[%s6416_s6 + $0x2b8] sm:$0xff]  ;;  %v967_v10 = vld [vmem:[%s6415_s5 + $0x2e8] sm:$0xff] }
 0x25b   : > { %v4860_v23 = vmax.f32 %v806_v8, 0.0  ;;  %3322 = vmatpush1.bf16.msra.mxu0 %v3321_v0  ;;  %1079 = vmatmul.mubr.f32.gmra.mrb[8].mxu1 %v4831_v63  ;;  %v857_v37 = vsel %vm449_vm2, %v851_v52, %v856_v13  ;;  %v3213_v0 = vpack.c.bf16 %v960_v57, %v958_v56  ;;  %v1265_v8 = vld [vmem:[%s6416_s6 + $0x2a8] sm:$0xff]  ;;  %v966_v19 = vld [vmem:[%s6415_s5 + $0x2e0] sm:$0xff]  ;;  %v977_v48 = vld [vmem:[%s6415_s5 + $0x338] sm:$0xff] }
 0x25c   : > { %v4874_v29 = vmax.f32 %v808_v16, 0.0  ;;  %3202 = vmatpush1.bf16.msra.mxu1 %v3201_v4  ;;  %v859_v30 = vsel %vm449_vm2, %v854_v59, %v858_v17  ;;  %3324 = vmatprep.subr.bf16.mxu0 %v3323_v5  ;;  %v1263_v59 = vld [vmem:[%s6416_s6 + $0x298] sm:$0xff]  ;;  %v1262_v4 = vld [vmem:[%s6416_s6 + $0x290] sm:$0xff]  ;;  %v962_v5 = vld [vmem:[%s6415_s5 + $0x2c0] sm:$0xff]  ;;  %v3339_v15 = vpack.c.bf16 %v1267_v9, %v1265_v8 }
 0x25d   : > { %1378 = vmatprep.mubr.f32.mxu0 %v859_v30  ;;  %3204 = vmatprep.subr.bf16.mxu1 %v3203_v11  ;;  %v860_v39 = vrot.slane %v4860_v23, 1  ;;  %v3335_v2 = vpack.c.bf16 %v1263_v59, %v1261_v58  ;;  %v969_v11 = vld [vmem:[%s6415_s5 + $0x2f8] sm:$0xff]  ;;  %v3217_v14 = vpack.c.bf16 %v964_v7, %v962_v5  ;;  %v1264_v16 = vld [vmem:[%s6416_s6 + $0x2a0] sm:$0xff]  ;;  %v971_v30 = vld [vmem:[%s6415_s5 + $0x308] sm:$0xff] }
 0x25e   : > { %1084 = vmatprep.mubr.f32.mxu1 %v4874_v29  ;;  %1379 = vmatmul.mubr.f32.gmra.mrb[14].mxu0 %v857_v37  ;;  %v862_v44 = vrot.slane %v4874_v29, 1  ;;  %v3219_v21 = vpack.c.bf16 %v969_v11, %v967_v10  ;;  %v1268_v37 = vld [vmem:[%s6416_s6 + $0x2c0] sm:$0xff]  ;;  %v976_v55 = vld [vmem:[%s6415_s5 + $0x330] sm:$0xff]  ;;  %v1277_v56 = vld [vmem:[%s6416_s6 + $0x308] sm:$0xff] }
 0x25f   : > { %3326 = vmatpush1.bf16.msra.mxu0 %v3325_v24  ;;  %1085 = vmatmul.mubr.f32.gmra.mrb[10].mxu1 %v4860_v23  ;;  %v861_v50 = vsel %vm449_vm2, %v856_v13, %v860_v39  ;;  %v3337_v13 = vpack.c.bf16 %v1262_v4, %v1260_v3  ;;  %v968_v24 = vld [vmem:[%s6415_s5 + $0x2f0] sm:$0xff]  ;;  %v979_v57 = vld [vmem:[%s6415_s5 + $0x348] sm:$0xff]  ;;  %v981_v58 = vld [vmem:[%s6415_s5 + $0x358] sm:$0xff] }
 0x260   : > { %3206 = vmatpush1.bf16.msra.mxu1 %v3205_v31  ;;  %2981 = vmatprep.mubr.msk.f32.mxu1 %vm4864_vm4, %v827_v43  ;;  %v863_v52 = vsel %vm449_vm2, %v858_v17, %v862_v44  ;;  %v1266_v17 = vld [vmem:[%s6416_s6 + $0x2b0] sm:$0xff]  ;;  %v973_v31 = vld [vmem:[%s6415_s5 + $0x318] sm:$0xff]  ;;  %v3221_v34 = vpack.c.bf16 %v968_v24, %v966_v19  ;;  %v3231_v3 = vpack.c.bf16 %v981_v58, %v979_v57  ;;  %v1281_v5 = vld [vmem:[%s6416_s6 + $0x328] sm:$0xff] }
 0x261   : > { %1384 = vmatprep.mubr.f32.mxu0 %v863_v52  ;;  %3328 = vmatprep.subr.bf16.mxu0 %v3327_v38  ;;  %v3341_v32 = vpack.c.bf16 %v1266_v17, %v1264_v16  ;;  %v1270_v38 = vld [vmem:[%s6416_s6 + $0x2d0] sm:$0xff]  ;;  %v3223_v40 = vpack.c.bf16 %v973_v31, %v971_v30  ;;  %v1272_v52 = vld [vmem:[%s6416_s6 + $0x2e0] sm:$0xff]  ;;  %v983_v7 = vld [vmem:[%s6415_s5 + $0x368] sm:$0xff] }
 0x262   : > { %3208 = vmatprep.subr.bf16.mxu1 %v3207_v47  ;;  %1385 = vmatmul.mubr.f32.gmra.mrb[16].mxu0 %v861_v50  ;;  %v975_v47 = vld [vmem:[%s6415_s5 + $0x328] sm:$0xff]  ;;  %v3345_v49 = vpack.c.bf16 %v1270_v38, %v1268_v37  ;;  %v980_v4 = vld [vmem:[%s6415_s5 + $0x350] sm:$0xff]  ;;  %v985_v8 = vld [vmem:[%s6415_s5 + $0x378] sm:$0xff] }
 0x263   : > { %3330 = vmatpush1.bf16.msra.mxu0 %v3329_v51  ;;  %2984 = vmatprep.mubr.msk.f32.mxu0 %vm449_vm2, %v862_v44  ;;  %v1275_v44 = vld [vmem:[%s6416_s6 + $0x2f8] sm:$0xff]  ;;  %v3227_v26 = vpack.c.bf16 %v977_v48, %v975_v47  ;;  %v3235_v16 = vpack.c.bf16 %v985_v8, %v983_v7  ;;  %v984_v17 = vld [vmem:[%s6415_s5 + $0x370] sm:$0xff]  ;;  %v1285_v19 = vld [vmem:[%s6416_s6 + $0x348] sm:$0xff] }
 0x264   : > { %3210 = vmatpush1.bf16.msra.mxu1 %v3209_v53  ;;  %3332 = vmatprep.subr.bf16.mxu0 %v3331_v54  ;;  %v3347_v51 = vpack.c.bf16 %v1275_v44, %v1273_v42  ;;  %v1274_v53 = vld [vmem:[%s6416_s6 + $0x2f0] sm:$0xff]  ;;  %v974_v54 = vld [vmem:[%s6415_s5 + $0x320] sm:$0xff]  ;;  %v987_v24 = vld [vmem:[%s6415_s5 + $0x388] sm:$0xff] }
 0x265   : > { %3212 = vmatprep.subr.bf16.mxu1 %v3211_v27  ;;  %v1279_v27 = vld [vmem:[%s6416_s6 + $0x318] sm:$0xff]  ;;  %v3349_v59 = vpack.c.bf16 %v1274_v53, %v1272_v52  ;;  %v3229_v60 = vpack.c.bf16 %v976_v55, %v974_v54  ;;  %v3239_v37 = vpack.c.bf16 %v989_v25, %v987_v24  ;;  %v988_v38 = vld [vmem:[%s6415_s5 + $0x390] sm:$0xff]  ;;  %v1293_v54 = vld [vmem:[%s6416_s6 + $0x388] sm:$0xff] }
 0x266   : > { %2985 = vmatmul.mubr.msk.f32.gmra.mrb[18].mxu0 %vm449_vm2, %v860_v39  ;;  %v970_v39 = vld [vmem:[%s6415_s5 + $0x300] sm:$0xff]  ;;  %v3351_v61 = vpack.c.bf16 %v1279_v27, %v1277_v56  ;;  %v993_v42 = vld [vmem:[%s6415_s5 + $0x3b8] sm:$0xff]  ;;  %v992_v53 = vld [vmem:[%s6415_s5 + $0x3b0] sm:$0xff] }
 0x267   : > { %3334 = vmatpush1.bf16.msra.mxu0 %v3333_v62  ;;  %1461 = vmatprep.mubr.f32.mxu0 %v4778_v33  ;;  %v3225_v50 = vpack.c.bf16 %v972_v41, %v970_v39  ;;  %v1276_v62 = vld [vmem:[%s6416_s6 + $0x300] sm:$0xff]  ;;  %v1289_v39 = vld [vmem:[%s6416_s6 + $0x368] sm:$0xff]  ;;  %v997_v56 = vld [vmem:[%s6415_s5 + $0x3d8] sm:$0xff] }
 0x268   : > { %3214 = vmatpush1.bf16.msra.mxu1 %v3213_v0  ;;  %3336 = vmatprep.subr.bf16.mxu0 %v3335_v2  ;;  %v1278_v0 = vld [vmem:[%s6416_s6 + $0x310] sm:$0xff]  ;;  %v978_v2 = vld [vmem:[%s6415_s5 + $0x340] sm:$0xff]  ;;  %v991_v41 = vld [vmem:[%s6415_s5 + $0x3a8] sm:$0xff] }
 0x269   : > { %3216 = vmatprep.subr.bf16.mxu1 %v3215_v6  ;;  %v1283_v6 = vld [vmem:[%s6416_s6 + $0x338] sm:$0xff]  ;;  %v3353_v9 = vpack.c.bf16 %v1278_v0, %v1276_v62  ;;  %v3233_v10 = vpack.c.bf16 %v980_v4, %v978_v2  ;;  %v3243_v52 = vpack.c.bf16 %v993_v42, %v991_v41  ;;  %v995_v55 = vld [vmem:[%s6415_s5 + $0x3c8] sm:$0xff]  ;;  %v996_v0 = vld [vmem:[%s6415_s5 + $0x3d0] sm:$0xff]  ;;  %v834_v42 = vrot.slane %v4834_v1, 7 }
 0x26a   : > { %v3355_v11 = vpack.c.bf16 %v1283_v6, %v1281_v5  ;;  %v3247_v62 = vpack.c.bf16 %v997_v56, %v995_v55  ;;  %v1297_v2 = vld [vmem:[%s6416_s6 + $0x3a8] sm:$0xff]  ;;  %v1001_v5 = vld [vmem:[%s6415_s5 + $0x3f8] sm:$0xff]  ;;  %v1300_v24 = vld [vmem:[%s6416_s6 + $0x3c0] sm:$0xff] }
 0x26b   : > { %3338 = vmatpush1.bf16.msra.mxu0 %v3337_v13  ;;  %v1280_v13 = vld [vmem:[%s6416_s6 + $0x320] sm:$0xff]  ;;  %v999_v4 = vld [vmem:[%s6415_s5 + $0x3e8] sm:$0xff]  ;;  %v1302_v25 = vld [vmem:[%s6416_s6 + $0x3d0] sm:$0xff] }
 0x26c   : > { %3218 = vmatpush1.bf16.msra.mxu1 %v3217_v14  ;;  %3340 = vmatprep.subr.bf16.mxu0 %v3339_v15  ;;  %v1282_v14 = vld [vmem:[%s6416_s6 + $0x330] sm:$0xff]  ;;  %v982_v15 = vld [vmem:[%s6415_s5 + $0x360] sm:$0xff]  ;;  %v1780_v55 = vld [vmem:[%s6419_s9 + $0x48] sm:$0xff] }
 0x26d   : > { %3220 = vmatprep.subr.bf16.mxu1 %v3219_v21  ;;  %v1287_v21 = vld [vmem:[%s6416_s6 + $0x358] sm:$0xff]  ;;  %v3357_v28 = vpack.c.bf16 %v1282_v14, %v1280_v13  ;;  %v3237_v30 = vpack.c.bf16 %v984_v17, %v982_v15  ;;  %v3251_v13 = vpack.c.bf16 %v1001_v5, %v999_v4  ;;  %v1000_v14 = vld [vmem:[%s6415_s5 + $0x3f0] sm:$0xff]  ;;  %v1301_v15 = vld [vmem:[%s6416_s6 + $0x3c8] sm:$0xff] }
 0x26e   : > { %v3359_v31 = vpack.c.bf16 %v1287_v21, %v1285_v19  ;;  %v1782_v56 = vld [vmem:[%s6419_s9 + $0x58] sm:$0xff]  ;;  %v1788_v4 = vld [vmem:[%s6419_s9 + $0x88] sm:$0xff] }
 0x26f   : > { %3342 = vmatpush1.bf16.msra.mxu0 %v3341_v32  ;;  %v1284_v32 = vld [vmem:[%s6416_s6 + $0x340] sm:$0xff]  ;;  %v1790_v5 = vld [vmem:[%s6419_s9 + $0x98] sm:$0xff] }
 0x270   : > { %3222 = vmatpush1.bf16.msra.mxu1 %v3221_v34  ;;  %3344 = vmatprep.subr.bf16.mxu0 %v3343_v35  ;;  %v1286_v34 = vld [vmem:[%s6416_s6 + $0x350] sm:$0xff]  ;;  %v986_v35 = vld [vmem:[%s6415_s5 + $0x380] sm:$0xff] }
 0x271   : > { %3224 = vmatprep.subr.bf16.mxu1 %v3223_v40  ;;  %v1291_v40 = vld [vmem:[%s6416_s6 + $0x378] sm:$0xff]  ;;  %v3361_v44 = vpack.c.bf16 %v1286_v34, %v1284_v32  ;;  %v3241_v47 = vpack.c.bf16 %v988_v38, %v986_v35  ;;  %v830_v32 = vrot.slane %v4799_v46, 7  ;;  %v1304_v35 = vld [vmem:[%s6416_s6 + $0x3e0] sm:$0xff]  ;;  %v826_v38 = vrot.slane %v4780_v36, 7 }
 0x272   : > { %v3363_v48 = vpack.c.bf16 %v1291_v40, %v1289_v39  ;;  %v828_v39 = vrot.slane %v4796_v45, 7 }
 0x273   : > { %3346 = vmatpush1.bf16.msra.mxu0 %v3345_v49  ;;  %v1288_v49 = vld [vmem:[%s6416_s6 + $0x360] sm:$0xff]  ;;  %v831_v40 = vsel %vm443_vm0, %v827_v43, %v830_v32  ;;  %v836_v43 = vrot.slane %v4860_v23, 7 }
 0x274   : > { %3226 = vmatpush1.bf16.msra.mxu1 %v3225_v50  ;;  %3348 = vmatprep.subr.bf16.mxu0 %v3347_v51  ;;  %v1290_v50 = vld [vmem:[%s6416_s6 + $0x370] sm:$0xff]  ;;  %v990_v51 = vld [vmem:[%s6415_s5 + $0x3a0] sm:$0xff] }
 0x275   : > { %3228 = vmatprep.subr.bf16.mxu1 %v3227_v26  ;;  %v1295_v26 = vld [vmem:[%s6416_s6 + $0x398] sm:$0xff]  ;;  %v3365_v27 = vpack.c.bf16 %v1290_v50, %v1288_v49  ;;  %v3245_v57 = vpack.c.bf16 %v992_v53, %v990_v51  ;;  %v838_v49 = vrot.slane %v4874_v29, 7 }
 0x276   : > { %v3367_v58 = vpack.c.bf16 %v1295_v26, %v1293_v54  ;;  %v1775_v54 = vld [vmem:[%s6419_s9 + $0x20] sm:$0xff]  ;;  %v1777_v26 = vld [vmem:[%s6419_s9 + $0x30] sm:$0xff] }
 0x277   : > { %3350 = vmatpush1.bf16.msra.mxu0 %v3349_v59  ;;  %v1292_v59 = vld [vmem:[%s6416_s6 + $0x380] sm:$0xff]  ;;  %v839_v50 = vsel %vm443_vm0, %v834_v42, %v838_v49 }
 0x278   : > { %3230 = vmatpush1.bf16.msra.mxu1 %v3229_v60  ;;  %3352 = vmatprep.subr.bf16.mxu0 %v3351_v61  ;;  %v1294_v60 = vld [vmem:[%s6416_s6 + $0x390] sm:$0xff]  ;;  %v994_v61 = vld [vmem:[%s6415_s5 + $0x3c0] sm:$0xff] }
 0x279   : > { %3232 = vmatprep.subr.bf16.mxu1 %v3231_v3  ;;  %v1299_v3 = vld [vmem:[%s6416_s6 + $0x3b8] sm:$0xff]  ;;  %v3369_v6 = vpack.c.bf16 %v1294_v60, %v1292_v59  ;;  %v3249_v7 = vpack.c.bf16 %v996_v0, %v994_v61  ;;  %v1781_v59 = vld [vmem:[%s6419_s9 + $0x50] sm:$0xff]  ;;  %v1784_v60 = vld [vmem:[%s6419_s9 + $0x68] sm:$0xff] }
 0x27a   : > { %v3371_v8 = vpack.c.bf16 %v1299_v3, %v1297_v2  ;;  %v1786_v61 = vld [vmem:[%s6419_s9 + $0x78] sm:$0xff]  ;;  %v1783_v2 = vld [vmem:[%s6419_s9 + $0x60] sm:$0xff]  ;;  %v1785_v3 = vld [vmem:[%s6419_s9 + $0x70] sm:$0xff] }
 0x27b   : > { %3354 = vmatpush1.bf16.msra.mxu0 %v3353_v9  ;;  %v1296_v9 = vld [vmem:[%s6416_s6 + $0x3a0] sm:$0xff]  ;;  %v3411_v0 = vpack.c.bf16 %v1786_v61, %v1784_v60  ;;  %v1824_v60 = vld [vmem:[%s6419_s9 + $0x1a8] sm:$0xff]  ;;  %v1826_v61 = vld [vmem:[%s6419_s9 + $0x1b8] sm:$0xff] }
 0x27c   : > { %3234 = vmatpush1.bf16.msra.mxu1 %v3233_v10  ;;  %3356 = vmatprep.subr.bf16.mxu0 %v3355_v11  ;;  %v1298_v10 = vld [vmem:[%s6416_s6 + $0x3b0] sm:$0xff]  ;;  %v998_v11 = vld [vmem:[%s6415_s5 + $0x3e0] sm:$0xff] }
 0x27d   : > { %3236 = vmatprep.subr.bf16.mxu1 %v3235_v16  ;;  %v1303_v16 = vld [vmem:[%s6416_s6 + $0x3d8] sm:$0xff]  ;;  %v3373_v17 = vpack.c.bf16 %v1298_v10, %v1296_v9  ;;  %v3253_v19 = vpack.c.bf16 %v1000_v14, %v998_v11  ;;  %v1789_v9 = vld [vmem:[%s6419_s9 + $0x90] sm:$0xff]  ;;  %v1792_v10 = vld [vmem:[%s6419_s9 + $0xa8] sm:$0xff] }
 0x27e   : > { %v3375_v21 = vpack.c.bf16 %v1303_v16, %v1301_v15  ;;  %v1794_v11 = vld [vmem:[%s6419_s9 + $0xb8] sm:$0xff]  ;;  %v1791_v15 = vld [vmem:[%s6419_s9 + $0xa0] sm:$0xff]  ;;  %v1793_v16 = vld [vmem:[%s6419_s9 + $0xb0] sm:$0xff] }
 0x27f   : > { %3358 = vmatpush1.bf16.msra.mxu0 %v3357_v28  ;;  %v1305_v28 = vld [vmem:[%s6416_s6 + $0x3e8] sm:$0xff]  ;;  %v3419_v14 = vpack.c.bf16 %v1794_v11, %v1792_v10 }
 0x280   : > { %3238 = vmatpush1.bf16.msra.mxu1 %v3237_v30  ;;  %3360 = vmatprep.subr.bf16.mxu0 %v3359_v31  ;;  %v1307_v30 = vld [vmem:[%s6416_s6 + $0x3f8] sm:$0xff]  ;;  %v3377_v31 = vpack.c.bf16 %v1302_v25, %v1300_v24  ;;  %v1795_v25 = vld [vmem:[%s6419_s9 + $0xc0] sm:$0xff] }
 0x281   : > { %3240 = vmatprep.subr.bf16.mxu1 %v3239_v37  ;;  %v3379_v34 = vpack.c.bf16 %v1307_v30, %v1305_v28  ;;  %v1306_v37 = vld [vmem:[%s6416_s6 + $0x3f0] sm:$0xff]  ;;  %v1800_v30 = vld [vmem:[%s6419_s9 + $0xe8] sm:$0xff] }
 0x282   : > { %v3381_v41 = vpack.c.bf16 %v1306_v37, %v1304_v35  ;;  %v1797_v28 = vld [vmem:[%s6419_s9 + $0xd0] sm:$0xff]  ;;  %v1799_v35 = vld [vmem:[%s6419_s9 + $0xe0] sm:$0xff] }
 0x283   : > { %3362 = vmatpush1.bf16.msra.mxu0 %v3361_v44  ;;  %v829_v44 = vsel %vm443_vm0, %v826_v38, %v828_v39  ;;  %v1801_v37 = vld [vmem:[%s6419_s9 + $0xf0] sm:$0xff] }
 0x284   : > { %3242 = vmatpush1.bf16.msra.mxu1 %v3241_v47  ;;  %3364 = vmatprep.subr.bf16.mxu0 %v3363_v48  ;;  %v832_v47 = vrot.slane %v4831_v63, 7  ;;  %v835_v48 = vsel %vm443_vm0, %v830_v32, %v834_v42  ;;  %v3425_v32 = vpack.c.bf16 %v1797_v28, %v1795_v25  ;;  %v1803_v42 = vld [vmem:[%s6419_s9 + $0x100] sm:$0xff] }
 0x285   : > { %3244 = vmatprep.subr.bf16.mxu1 %v3243_v52 }
 0x286   : > { %v833_v33 = vsel %vm443_vm0, %v828_v39, %v832_v47  ;;  %v837_v51 = vsel %vm443_vm0, %v832_v47, %v836_v43  ;;  %v1806_v39 = vld [vmem:[%s6419_s9 + $0x118] sm:$0xff]  ;;  %v1808_v47 = vld [vmem:[%s6419_s9 + $0x128] sm:$0xff]  ;;  %v1807_v43 = vld [vmem:[%s6419_s9 + $0x120] sm:$0xff] }
 0x287   : > { %3366 = vmatpush1.bf16.msra.mxu0 %v3365_v27  ;;  %v3405_v27 = vpack.c.bf16 %v1777_v26, %v1775_v54  ;;  %v1815_v54 = vld [vmem:[%s6419_s9 + $0x160] sm:$0xff]  ;;  %v1817_v26 = vld [vmem:[%s6419_s9 + $0x170] sm:$0xff] }
 0x288   : > { %3246 = vmatpush1.bf16.msra.mxu1 %v3245_v57  ;;  %3368 = vmatprep.subr.bf16.mxu0 %v3367_v58  ;;  %v3407_v57 = vpack.c.bf16 %v1782_v56, %v1780_v55  ;;  %v1779_v58 = vld [vmem:[%s6419_s9 + $0x40] sm:$0xff]  ;;  %v1820_v55 = vld [vmem:[%s6419_s9 + $0x188] sm:$0xff]  ;;  %v1822_v56 = vld [vmem:[%s6419_s9 + $0x198] sm:$0xff] }
 0x289   : > { %3248 = vmatprep.subr.bf16.mxu1 %v3247_v62  ;;  %v3409_v62 = vpack.c.bf16 %v1781_v59, %v1779_v58  ;;  %v1819_v58 = vld [vmem:[%s6419_s9 + $0x180] sm:$0xff]  ;;  %v1821_v59 = vld [vmem:[%s6419_s9 + $0x190] sm:$0xff] }
 0x28b   : > { %3370 = vmatpush1.bf16.msra.mxu0 %v3369_v6  ;;  %v3413_v6 = vpack.c.bf16 %v1785_v3, %v1783_v2  ;;  %v1823_v2 = vld [vmem:[%s6419_s9 + $0x1a0] sm:$0xff]  ;;  %v1825_v3 = vld [vmem:[%s6419_s9 + $0x1b0] sm:$0xff] }
 0x28c   : > { %3250 = vmatpush1.bf16.msra.mxu1 %v3249_v7  ;;  %3372 = vmatprep.subr.bf16.mxu0 %v3371_v8  ;;  %v3415_v7 = vpack.c.bf16 %v1790_v5, %v1788_v4  ;;  %v1787_v8 = vld [vmem:[%s6419_s9 + $0x80] sm:$0xff]  ;;  %v1828_v4 = vld [vmem:[%s6419_s9 + $0x1c8] sm:$0xff]  ;;  %v1830_v5 = vld [vmem:[%s6419_s9 + $0x1d8] sm:$0xff] }
 0x28d   : > { %3252 = vmatprep.subr.bf16.mxu1 %v3251_v13  ;;  %v3417_v13 = vpack.c.bf16 %v1789_v9, %v1787_v8  ;;  %v1827_v8 = vld [vmem:[%s6419_s9 + $0x1c0] sm:$0xff]  ;;  %v1829_v9 = vld [vmem:[%s6419_s9 + $0x1d0] sm:$0xff] }
 0x28e   : > { %v3457_v10 = vpack.c.bf16 %v1829_v9, %v1827_v8  ;;  %v2146_v8 = vld [vmem:[%s6420_s10 + $0xa8] sm:$0xff]  ;;  %v2148_v9 = vld [vmem:[%s6420_s10 + $0xb8] sm:$0xff] }
 0x28f   : > { %3374 = vmatpush1.bf16.msra.mxu0 %v3373_v17  ;;  %v1796_v17 = vld [vmem:[%s6419_s9 + $0xc8] sm:$0xff] }
 0x290   : > { %3254 = vmatpush1.bf16.msra.mxu1 %v3253_v19  ;;  %3376 = vmatprep.subr.bf16.mxu0 %v3375_v21  ;;  %v1798_v19 = vld [vmem:[%s6419_s9 + $0xd8] sm:$0xff]  ;;  %v3421_v21 = vpack.c.bf16 %v1793_v16, %v1791_v15 }
 0x291   : > { %v3423_v24 = vpack.c.bf16 %v1798_v19, %v1796_v17 }
 0x293   : > { %2983 = vmatmul.mubr.msk.f32.vlgmr.msra.gmra.mrb[4].mxu1 %vm4864_vm4, %v826_v38  ;;  %3378 = vmatpush1.bf16.msra.mxu0 %v3377_v31  ;;  %v1802_v31 = vld [vmem:[%s6419_s9 + $0xf8] sm:$0xff]  ;;  %v1804_v38 = vld [vmem:[%s6419_s9 + $0x108] sm:$0xff] }
 0x294   : > { %1161 = vmatprep.mubr.f32.mxu1 %v831_v40  ;;  %3380 = vmatprep.subr.bf16.mxu0 %v3379_v34  ;;  %v3427_v34 = vpack.c.bf16 %v1802_v31, %v1800_v30  ;;  %v3429_v40 = vpack.c.bf16 %v1801_v37, %v1799_v35 }
 0x297   : > { %1162 = vmatmul.mubr.f32.gmra.mrb[6].mxu1 %v829_v44  ;;  %3382 = vmatpush1.bf16.msra.mxu0 %v3381_v41  ;;  %v3431_v41 = vpack.c.bf16 %v1806_v39, %v1804_v38  ;;  %v1805_v44 = vld [vmem:[%s6419_s9 + $0x110] sm:$0xff] }
 0x298   : > { %1167 = vmatprep.mubr.f32.mxu1 %v835_v48  ;;  %v1810_v48 = vld [vmem:[%s6419_s9 + $0x138] sm:$0xff]  ;;  %v3433_v49 = vpack.c.bf16 %v1805_v44, %v1803_v42  ;;  %v2126_v42 = vld [vmem:[%s6420_s10 + $0x8] sm:$0xff] }
 0x299   : > { %v2128_v44 = vld [vmem:[%s6420_s10 + $0x18] sm:$0xff] }
 0x29a   : > { %1462 = vmatmul.mubr.f32.vlgmr.msra.gmra.mrb[12].mxu0 %v4780_v36  ;;  %v1772_v36 = vld [vmem:[%s6419_s9 + $0x8] sm:$0xff] }
 0x29b   : > { %1168 = vmatmul.mubr.f32.gmra.mrb[8].mxu1 %v833_v33  ;;  %1467 = vmatprep.mubr.f32.mxu0 %v4799_v46  ;;  %v1771_v46 = vld [vmem:[%s6419_s9] sm:$0xff]  ;;  %v3435_v33 = vpack.c.bf16 %v1810_v48, %v1808_v47 }
 0x29c   : > { %1173 = vmatprep.mubr.f32.mxu1 %v839_v50  ;;  %v1809_v50 = vld [vmem:[%s6419_s9 + $0x130] sm:$0xff] }
 0x29e   : > { %1468 = vmatmul.mubr.f32.gmra.mrb[14].mxu0 %v4796_v45  ;;  %v1774_v45 = vld [vmem:[%s6419_s9 + $0x18] sm:$0xff] }
 0x29f   : > { %1174 = vmatmul.mubr.f32.gmra.mrb[10].mxu1 %v837_v51  ;;  %1473 = vmatprep.mubr.f32.mxu0 %v4834_v1  ;;  %v3399_v1 = vpack.c.bf16 %v1774_v45, %v1772_v36  ;;  %v1812_v51 = vld [vmem:[%s6419_s9 + $0x148] sm:$0xff]  ;;  %v1814_v36 = vld [vmem:[%s6419_s9 + $0x158] sm:$0xff]  ;;  %v3437_v45 = vpack.c.bf16 %v1809_v50, %v1807_v43  ;;  %v2125_v43 = vld [vmem:[%s6420_s10] sm:$0xff] }
 0x2a0   : > { %1594 = vmatprep.mubr.f32.mxu1 %v3991_v12  ;;  %v2127_v50 = vld [vmem:[%s6420_s10 + $0x10] sm:$0xff] }
 0x2a1   : > { %3400 = vmatprep.subr.bf16.mxu0 %v3399_v1  ;;  %v1811_v1 = vld [vmem:[%s6419_s9 + $0x140] sm:$0xff] }
 0x2a2   : > { %1474 = vmatmul.mubr.f32.gmra.mrb[16].mxu0 %v4831_v63  ;;  %v1773_v63 = vld [vmem:[%s6419_s9 + $0x10] sm:$0xff] }
 0x2a3   : > { %1479 = vmatprep.mubr.f32.mxu0 %v4874_v29  ;;  %v1778_v29 = vld [vmem:[%s6419_s9 + $0x38] sm:$0xff]  ;;  %v3401_v52 = vpack.c.bf16 %v1773_v63, %v1771_v46  ;;  %v3439_v46 = vpack.c.bf16 %v1814_v36, %v1812_v51  ;;  %v1813_v63 = vld [vmem:[%s6419_s9 + $0x150] sm:$0xff]  ;;  %v2130_v51 = vld [vmem:[%s6420_s10 + $0x28] sm:$0xff] }
 0x2a4   : > { %v2132_v36 = vld [vmem:[%s6420_s10 + $0x38] sm:$0xff] }
 0x2a5   : > { %3402 = vmatpush1.bf16.msra.mxu0 %v3401_v52  ;;  %v3441_v52 = vpack.c.bf16 %v1813_v63, %v1811_v1  ;;  %v3531_v1 = vpack.c.bf16 %v2132_v36, %v2130_v51  ;;  %v2129_v63 = vld [vmem:[%s6420_s10 + $0x20] sm:$0xff]  ;;  %v2163_v36 = vld [vmem:[%s6420_s10 + $0x130] sm:$0xff] }
 0x2a6   : > { %1480 = vmatmul.mubr.f32.gmra.mrb[18].mxu0 %v4860_v23  ;;  %v1776_v23 = vld [vmem:[%s6419_s9 + $0x28] sm:$0xff]  ;;  %v2161_v51 = vld [vmem:[%s6420_s10 + $0x120] sm:$0xff] }
 0x2a7   : > { %v3403_v53 = vpack.c.bf16 %v1778_v29, %v1776_v23  ;;  %v1816_v23 = vld [vmem:[%s6419_s9 + $0x168] sm:$0xff]  ;;  %v1818_v29 = vld [vmem:[%s6419_s9 + $0x178] sm:$0xff] }
 0x2a9   : > { %3404 = vmatprep.subr.bf16.mxu0 %v3403_v53  ;;  %v3443_v53 = vpack.c.bf16 %v1818_v29, %v1816_v23  ;;  %v2131_v23 = vld [vmem:[%s6420_s10 + $0x30] sm:$0xff]  ;;  %v2134_v29 = vld [vmem:[%s6420_s10 + $0x48] sm:$0xff] }
 0x2aa   : > { %3406 = vmatpush1.bf16.msra.mxu0 %v3405_v27  ;;  %v3445_v27 = vpack.c.bf16 %v1817_v26, %v1815_v54  ;;  %v3533_v54 = vpack.c.bf16 %v2131_v23, %v2129_v63  ;;  %v2165_v23 = vld [vmem:[%s6420_s10 + $0x140] sm:$0xff] }
 0x2ab   : > { %3408 = vmatprep.subr.bf16.mxu0 %v3407_v57  ;;  %v3447_v57 = vpack.c.bf16 %v1822_v56, %v1820_v55  ;;  %v2133_v55 = vld [vmem:[%s6420_s10 + $0x40] sm:$0xff]  ;;  %v2135_v56 = vld [vmem:[%s6420_s10 + $0x50] sm:$0xff] }
 0x2ae   : > { %3410 = vmatpush1.bf16.msra.mxu0 %v3409_v62  ;;  %v3449_v62 = vpack.c.bf16 %v1821_v59, %v1819_v58  ;;  %v1488_v58 = vld [vmem:[%s6417_s7 + $0x10] sm:$0xff]  ;;  %v3537_v59 = vpack.c.bf16 %v2135_v56, %v2133_v55  ;;  %v2169_v55 = vld [vmem:[%s6420_s10 + $0x160] sm:$0xff] }
 0x2af   : > { %3412 = vmatprep.subr.bf16.mxu0 %v3411_v0  ;;  %v3451_v0 = vpack.c.bf16 %v1826_v61, %v1824_v60  ;;  %v2137_v61 = vld [vmem:[%s6420_s10 + $0x60] sm:$0xff]  ;;  %v2171_v56 = vld [vmem:[%s6420_s10 + $0x170] sm:$0xff] }
 0x2b2   : > { %3414 = vmatpush1.bf16.msra.mxu0 %v3413_v6  ;;  %v3453_v6 = vpack.c.bf16 %v1825_v3, %v1823_v2  ;;  %v2144_v2 = vld [vmem:[%s6420_s10 + $0x98] sm:$0xff] }
 0x2b3   : > { %3416 = vmatprep.subr.bf16.mxu0 %v3415_v7  ;;  %v3455_v7 = vpack.c.bf16 %v1830_v5, %v1828_v4  ;;  %v1489_v3 = vld [vmem:[%s6417_s7 + $0x18] sm:$0xff] }
 0x2b6   : > { %3418 = vmatpush1.bf16.msra.mxu0 %v3417_v13 }
 0x2b7   : > { %3420 = vmatprep.subr.bf16.mxu0 %v3419_v14 }
 0x2ba   : > { %3422 = vmatpush1.bf16.msra.mxu0 %v3421_v21 }
 0x2bb   : > { %3424 = vmatprep.subr.bf16.mxu0 %v3423_v24 }
 0x2be   : > { %3426 = vmatpush1.bf16.msra.mxu0 %v3425_v32 }
 0x2bf   : > { %3428 = vmatprep.subr.bf16.mxu0 %v3427_v34 }
 0x2c2   : > { %3430 = vmatpush1.bf16.msra.mxu0 %v3429_v40 }
 0x2c3   : > { %3432 = vmatprep.subr.bf16.mxu0 %v3431_v41 }
 0x2c6   : > { %3434 = vmatpush1.bf16.msra.mxu0 %v3433_v49 }
 0x2c7   : > { %3436 = vmatprep.subr.bf16.mxu0 %v3435_v33  ;;  %v3527_v33 = vpack.c.bf16 %v2128_v44, %v2126_v42 }
 0x2ca   : > { %3438 = vmatpush1.bf16.msra.mxu0 %v3437_v45  ;;  %v1486_v45 = vld [vmem:[%s6417_s7] sm:$0xff] }
 0x2cb   : > { %3440 = vmatprep.subr.bf16.mxu0 %v3439_v46  ;;  %v3529_v46 = vpack.c.bf16 %v2127_v50, %v2125_v43 }
 0x2ce   : > { %3442 = vmatpush1.bf16.msra.mxu0 %v3441_v52  ;;  %v2136_v52 = vld [vmem:[%s6420_s10 + $0x58] sm:$0xff] }
 0x2cf   : > { %3444 = vmatprep.subr.bf16.mxu0 %v3443_v53  ;;  %v1487_v53 = vld [vmem:[%s6417_s7 + $0x8] sm:$0xff]  ;;  %v3535_v26 = vpack.c.bf16 %v2136_v52, %v2134_v29  ;;  %v2167_v29 = vld [vmem:[%s6420_s10 + $0x150] sm:$0xff] }
 0x2d0   : > { %v2170_v52 = vld [vmem:[%s6420_s10 + $0x168] sm:$0xff] }
 0x2d2   : > { %3446 = vmatpush1.bf16.msra.mxu0 %v3445_v27  ;;  %v2138_v27 = vld [vmem:[%s6420_s10 + $0x68] sm:$0xff] }
 0x2d3   : > { %3448 = vmatprep.subr.bf16.mxu0 %v3447_v57  ;;  %v2140_v57 = vld [vmem:[%s6420_s10 + $0x78] sm:$0xff] }
 0x2d4   : > { %v3539_v60 = vpack.c.bf16 %v2140_v57, %v2138_v27  ;;  %v2174_v27 = vld [vmem:[%s6420_s10 + $0x188] sm:$0xff]  ;;  %v2176_v57 = vld [vmem:[%s6420_s10 + $0x198] sm:$0xff] }
 0x2d6   : > { %3450 = vmatpush1.bf16.msra.mxu0 %v3449_v62  ;;  %v2139_v62 = vld [vmem:[%s6420_s10 + $0x70] sm:$0xff] }
 0x2d7   : > { %3452 = vmatprep.subr.bf16.mxu0 %v3451_v0  ;;  %v2142_v0 = vld [vmem:[%s6420_s10 + $0x88] sm:$0xff]  ;;  %v3541_v4 = vpack.c.bf16 %v2139_v62, %v2137_v61  ;;  %v2175_v61 = vld [vmem:[%s6420_s10 + $0x190] sm:$0xff] }
 0x2d8   : > { %v3543_v5 = vpack.c.bf16 %v2144_v2, %v2142_v0  ;;  %v2178_v0 = vld [vmem:[%s6420_s10 + $0x1a8] sm:$0xff]  ;;  %v2180_v2 = vld [vmem:[%s6420_s10 + $0x1b8] sm:$0xff] }
 0x2da   : > { %3454 = vmatpush1.bf16.msra.mxu0 %v3453_v6  ;;  %v2141_v6 = vld [vmem:[%s6420_s10 + $0x80] sm:$0xff] }
 0x2db   : > { %3456 = vmatprep.subr.bf16.mxu0 %v3455_v7  ;;  %v2143_v7 = vld [vmem:[%s6420_s10 + $0x90] sm:$0xff] }
 0x2de   : > { %3458 = vmatpush1.bf16.msra.mxu0 %v3457_v10  ;;  %v1490_v10 = vld [vmem:[%s6417_s7 + $0x20] sm:$0xff] }
 0x366   : > { %v1157_v11 = vpop.f32.mrb[4].mxu1 }
 0x367   : > { %v1159_v13 = vpop.f32.mrb[5].mxu1 }
 0x36a   : > { %v1163_v14 = vpop.f32.mrb[6].mxu1 }
 0x36b   : > { %v3385_v15 = vpack.c.bf16 %v1163_v14, %v1157_v11  ;;  %v1165_v16 = vpop.f32.mrb[7].mxu1  ;;  %v3545_v11 = vpack.c.bf16 %v2143_v7, %v2141_v6  ;;  %v2145_v14 = vld [vmem:[%s6420_s10 + $0xa0] sm:$0xff] }
 0x36c   : > { %v3383_v17 = vpack.c.bf16 %v1165_v16, %v1159_v13  ;;  %v3547_v13 = vpack.c.bf16 %v2148_v9, %v2146_v8  ;;  %v2150_v16 = vld [vmem:[%s6420_s10 + $0xc8] sm:$0xff]  ;;  %v2177_v6 = vld [vmem:[%s6420_s10 + $0x1a0] sm:$0xff]  ;;  %v2179_v8 = vld [vmem:[%s6420_s10 + $0x1b0] sm:$0xff] }
 0x36d   : > { %v1463_v19 = vpop.f32.mrb[12].mxu0  ;;  %v1831_v9 = vld [vmem:[%s6419_s9 + $0x1e0] sm:$0xff] }
 0x36e   : > { %v1169_v21 = vpop.f32.mrb[8].mxu1  ;;  %v1465_v24 = vpop.f32.mrb[13].mxu0  ;;  %3384 = vmatprep.subr.bf16.mxu1 %v3383_v17  ;;  %v2152_v17 = vld [vmem:[%s6420_s10 + $0xd8] sm:$0xff] }
 0x36f   : > { %v1171_v25 = vpop.f32.mrb[9].mxu1  ;;  %3386 = vmatpush1.bf16.msra.mxu1 %v3385_v15  ;;  %v2147_v15 = vld [vmem:[%s6420_s10 + $0xb0] sm:$0xff] }
 0x371   : > { %v1469_v28 = vpop.f32.mrb[14].mxu0 }
 0x372   : > { %v3393_v30 = vpack.c.bf16 %v1469_v28, %v1463_v19  ;;  %v1175_v31 = vpop.f32.mrb[10].mxu1  ;;  %v1471_v32 = vpop.f32.mrb[15].mxu0  ;;  %v1491_v19 = vld [vmem:[%s6417_s7 + $0x28] sm:$0xff]  ;;  %v2151_v28 = vld [vmem:[%s6420_s10 + $0xd0] sm:$0xff] }
 0x373   : > { %v3389_v34 = vpack.c.bf16 %v1175_v31, %v1169_v21  ;;  %v3391_v35 = vpack.c.bf16 %v1471_v32, %v1465_v24  ;;  %v1177_v37 = vpop.f32.mrb[11].mxu1  ;;  %v3549_v21 = vpack.c.bf16 %v2147_v15, %v2145_v14  ;;  %v3551_v24 = vpack.c.bf16 %v2152_v17, %v2150_v16  ;;  %v2156_v31 = vld [vmem:[%s6420_s10 + $0xf8] sm:$0xff]  ;;  %v1492_v32 = vld [vmem:[%s6417_s7 + $0x30] sm:$0xff]  ;;  %v2182_v14 = vld [vmem:[%s6420_s10 + $0x1c8] sm:$0xff] }
 0x374   : > { %v3387_v38 = vpack.c.bf16 %v1177_v37, %v1171_v25  ;;  %v2149_v25 = vld [vmem:[%s6420_s10 + $0xc0] sm:$0xff]  ;;  %v2184_v15 = vld [vmem:[%s6420_s10 + $0x1d8] sm:$0xff]  ;;  %v1836_v17 = vld [vmem:[%s6419_s9 + $0x208] sm:$0xff] }
 0x375   : > { %v1475_v39 = vpop.f32.mrb[16].mxu0  ;;  %v2153_v37 = vld [vmem:[%s6420_s10 + $0xe0] sm:$0xff]  ;;  %v3583_v16 = vpack.c.bf16 %v2184_v15, %v2182_v14 }
 0x376   : > { %v1477_v40 = vpop.f32.mrb[17].mxu0  ;;  %3388 = vmatprep.subr.bf16.mxu1 %v3387_v38  ;;  %v2155_v38 = vld [vmem:[%s6420_s10 + $0xf0] sm:$0xff] }
 0x377   : > { %3390 = vmatpush1.bf16.msra.mxu1 %v3389_v34  ;;  %v3553_v34 = vpack.c.bf16 %v2151_v28, %v2149_v25  ;;  %v3557_v42 = vpack.c.bf16 %v2155_v38, %v2153_v37  ;;  %v2183_v25 = vld [vmem:[%s6420_s10 + $0x1d0] sm:$0xff]  ;;  %v2190_v38 = vld [vmem:[%s6420_s10 + $0x208] sm:$0xff] }
 0x378   : > { %3392 = vmatprep.subr.bf16.mxu1 %v3391_v35 }
 0x379   : > { %v1481_v41 = vpop.f32.mrb[18].mxu0 }
 0x37a   : > { %v3397_v47 = vpack.c.bf16 %v1481_v41, %v1475_v39  ;;  %v1483_v48 = vpop.f32.mrb[19].mxu0  ;;  %v2158_v39 = vld [vmem:[%s6420_s10 + $0x108] sm:$0xff]  ;;  %v1493_v41 = vld [vmem:[%s6417_s7 + $0x38] sm:$0xff] }
 0x37b   : > { %v3395_v49 = vpack.c.bf16 %v1483_v48, %v1477_v40  ;;  %3394 = vmatpush1.bf16.msra.mxu1 %v3393_v30  ;;  %v2154_v30 = vld [vmem:[%s6420_s10 + $0xe8] sm:$0xff]  ;;  %v2160_v40 = vld [vmem:[%s6420_s10 + $0x118] sm:$0xff]  ;;  %v2159_v48 = vld [vmem:[%s6420_s10 + $0x110] sm:$0xff] }
 0x37c   : > { %v3555_v35 = vpack.c.bf16 %v2156_v31, %v2154_v30  ;;  %v3559_v44 = vpack.c.bf16 %v2160_v40, %v2158_v39  ;;  %v2186_v30 = vld [vmem:[%s6420_s10 + $0x1e8] sm:$0xff]  ;;  %v2188_v31 = vld [vmem:[%s6420_s10 + $0x1f8] sm:$0xff] }
 0x37d   : > { %3396 = vmatprep.subr.bf16.mxu1 %v3395_v49  ;;  %v2162_v49 = vld [vmem:[%s6420_s10 + $0x128] sm:$0xff]  ;;  %v2192_v39 = vld [vmem:[%s6420_s10 + $0x218] sm:$0xff] }
 0x37e   : > { %v3591_v40 = vpack.c.bf16 %v2192_v39, %v2190_v38  ;;  %v1849_v39 = vld [vmem:[%s6419_s9 + $0x270] sm:$0xff] }
 0x37f   : > { %3398 = vmatpush1.bf16.msra.mxu1 %v3397_v47  ;;  %v2157_v47 = vld [vmem:[%s6420_s10 + $0x100] sm:$0xff] }
 0x380   : > { %3528 = vmatprep.subr.bf16.mxu1 %v3527_v33  ;;  %v2164_v33 = vld [vmem:[%s6420_s10 + $0x138] sm:$0xff]  ;;  %v3561_v43 = vpack.c.bf16 %v2159_v48, %v2157_v47 }
 0x381   : > { %v3563_v50 = vpack.c.bf16 %v2164_v33, %v2162_v49  ;;  %v1835_v33 = vld [vmem:[%s6419_s9 + $0x200] sm:$0xff] }
 0x382   : > { %2986 = vmatmul.mubr.msk.f32.vlgmr.msra.gmra.mrb[12].mxu1 %vm463_vm1, %v1486_v45  ;;  %v2166_v45 = vld [vmem:[%s6420_s10 + $0x148] sm:$0xff] }
 0x383   : > { %1600 = vmatprep.mubr.f32.mxu1 %v3991_v12  ;;  %3530 = vmatpush1.bf16.msra.mxu1 %v3529_v46  ;;  %v2168_v46 = vld [vmem:[%s6420_s10 + $0x158] sm:$0xff] }
 0x384   : > { %3532 = vmatprep.subr.bf16.mxu1 %v3531_v1  ;;  %v3565_v1 = vpack.c.bf16 %v2163_v36, %v2161_v51  ;;  %v3567_v63 = vpack.c.bf16 %v2168_v46, %v2166_v45  ;;  %v1840_v51 = vld [vmem:[%s6419_s9 + $0x228] sm:$0xff]  ;;  %v1842_v36 = vld [vmem:[%s6419_s9 + $0x238] sm:$0xff] }
 0x386   : > { %2987 = vmatmul.mubr.msk.f32.gmra.mrb[14].mxu1 %vm463_vm1, %v1487_v53  ;;  %v2172_v53 = vld [vmem:[%s6420_s10 + $0x178] sm:$0xff] }
 0x387   : > { %1606 = vmatprep.mubr.f32.mxu1 %v3991_v12  ;;  %3534 = vmatpush1.bf16.msra.mxu1 %v3533_v54  ;;  %v3569_v54 = vpack.c.bf16 %v2167_v29, %v2165_v23 }
 0x388   : > { %3536 = vmatprep.subr.bf16.mxu1 %v3535_v26  ;;  %v3571_v26 = vpack.c.bf16 %v2172_v53, %v2170_v52  ;;  %v3467_v52 = vpack.c.bf16 %v1842_v36, %v1840_v51  ;;  %v1839_v53 = vld [vmem:[%s6419_s9 + $0x220] sm:$0xff] }
 0x38a   : > { %2988 = vmatmul.mubr.msk.f32.gmra.mrb[16].mxu1 %vm463_vm1, %v1488_v58  ;;  %v3573_v58 = vpack.c.bf16 %v2171_v56, %v2169_v55  ;;  %v1844_v55 = vld [vmem:[%s6419_s9 + $0x248] sm:$0xff]  ;;  %v1846_v56 = vld [vmem:[%s6419_s9 + $0x258] sm:$0xff] }
 0x38b   : > { %1612 = vmatprep.mubr.f32.mxu1 %v3991_v12  ;;  %3538 = vmatpush1.bf16.msra.mxu1 %v3537_v59  ;;  %v3575_v59 = vpack.c.bf16 %v2176_v57, %v2174_v27 }
 0x38c   : > { %3540 = vmatprep.subr.bf16.mxu1 %v3539_v60  ;;  %v2173_v60 = vld [vmem:[%s6420_s10 + $0x180] sm:$0xff] }
 0x38d   : > { %v3577_v62 = vpack.c.bf16 %v2175_v61, %v2173_v60  ;;  %v2189_v60 = vld [vmem:[%s6420_s10 + $0x200] sm:$0xff]  ;;  %v2191_v61 = vld [vmem:[%s6420_s10 + $0x210] sm:$0xff] }
 0x38e   : > { %2989 = vmatmul.mubr.msk.f32.gmra.mrb[18].mxu1 %vm463_vm1, %v1489_v3  ;;  %v3579_v3 = vpack.c.bf16 %v2180_v2, %v2178_v0 }
 0x38f   : > { %1618 = vmatprep.mubr.f32.mxu1 %v3991_v12  ;;  %3542 = vmatpush1.bf16.msra.mxu1 %v3541_v4  ;;  %v1832_v4 = vld [vmem:[%s6419_s9 + $0x1e8] sm:$0xff] }
 0x390   : > { %3544 = vmatprep.subr.bf16.mxu1 %v3543_v5  ;;  %v1834_v5 = vld [vmem:[%s6419_s9 + $0x1f8] sm:$0xff] }
 0x391   : > { %v3459_v7 = vpack.c.bf16 %v1834_v5, %v1832_v4  ;;  %v3471_v4 = vpack.c.bf16 %v1846_v56, %v1844_v55  ;;  %v1845_v5 = vld [vmem:[%s6419_s9 + $0x250] sm:$0xff] }
 0x392   : > { %2990 = vmatmul.mubr.msk.f32.gmra.mrb[20].mxu1 %vm463_vm1, %v1490_v10  ;;  %v1833_v10 = vld [vmem:[%s6419_s9 + $0x1f0] sm:$0xff] }
 0x393   : > { %1624 = vmatprep.mubr.f32.mxu1 %v3991_v12  ;;  %3546 = vmatpush1.bf16.msra.mxu1 %v3545_v11  ;;  %v3581_v11 = vpack.c.bf16 %v2179_v8, %v2177_v6  ;;  %v2194_v6 = vld [vmem:[%s6420_s10 + $0x228] sm:$0xff] }
 0x394   : > { %3548 = vmatprep.subr.bf16.mxu1 %v3547_v13  ;;  %v3461_v13 = vpack.c.bf16 %v1833_v10, %v1831_v9  ;;  %3460 = vmatprep.subr.bf16.mxu0 %v3459_v7  ;;  %v2196_v7 = vld [vmem:[%s6420_s10 + $0x238] sm:$0xff] }
 0x396   : > { %2991 = vmatmul.mubr.msk.f32.gmra.mrb[22].mxu1 %vm463_vm1, %v1491_v19  ;;  %3462 = vmatpush1.bf16.msra.mxu0 %v3461_v13  ;;  %v1838_v19 = vld [vmem:[%s6419_s9 + $0x218] sm:$0xff] }
 0x397   : > { %1630 = vmatprep.mubr.f32.mxu1 %v3991_v12  ;;  %3550 = vmatpush1.bf16.msra.mxu1 %v3549_v21  ;;  %v2181_v21 = vld [vmem:[%s6420_s10 + $0x1c0] sm:$0xff]  ;;  %v1850_v13 = vld [vmem:[%s6419_s9 + $0x278] sm:$0xff] }
 0x398   : > { %3552 = vmatprep.subr.bf16.mxu1 %v3551_v24  ;;  %v3463_v24 = vpack.c.bf16 %v1838_v19, %v1836_v17  ;;  %v3585_v28 = vpack.c.bf16 %v2183_v25, %v2181_v21  ;;  %v3595_v25 = vpack.c.bf16 %v2196_v7, %v2194_v6 }
 0x39a   : > { %2992 = vmatmul.mubr.msk.f32.gmra.mrb[24].mxu1 %vm463_vm1, %v1492_v32  ;;  %3464 = vmatprep.subr.bf16.mxu0 %v3463_v24  ;;  %v3587_v32 = vpack.c.bf16 %v2188_v31, %v2186_v30  ;;  %v2195_v30 = vld [vmem:[%s6420_s10 + $0x230] sm:$0xff]  ;;  %v1847_v31 = vld [vmem:[%s6419_s9 + $0x260] sm:$0xff] }
 0x39b   : > { %1636 = vmatprep.mubr.f32.mxu1 %v3991_v12  ;;  %3554 = vmatpush1.bf16.msra.mxu1 %v3553_v34  ;;  %v2185_v34 = vld [vmem:[%s6420_s10 + $0x1e0] sm:$0xff] }
 0x39c   : > { %3556 = vmatprep.subr.bf16.mxu1 %v3555_v35  ;;  %v2187_v35 = vld [vmem:[%s6420_s10 + $0x1f0] sm:$0xff] }
 0x39d   : > { %v3589_v37 = vpack.c.bf16 %v2187_v35, %v2185_v34 }
 0x39e   : > { %2993 = vmatmul.mubr.msk.f32.gmra.mrb[26].mxu1 %vm463_vm1, %v1493_v41  ;;  %v1494_v41 = vld [vmem:[%s6418_s8] sm:$0x3] }
 0x39f   : > { %3558 = vmatpush1.bf16.msra.mxu1 %v3557_v42  ;;  %v5656_v42 = vrot.slane %v1494_v41, %v4754_v18 }
 0x3a0   : > { %3560 = vmatprep.subr.bf16.mxu1 %v3559_v44  ;;  %v5659_v44 = vrot.slane %v1494_v41, %v4759_v20  ;;  %v2200_v41 = vld [vmem:[%s6420_s10 + $0x258] sm:$0xff] }
 0x3a3   : > { %3562 = vmatpush1.bf16.msra.mxu1 %v3561_v43  ;;  %v1837_v43 = vld [vmem:[%s6419_s9 + $0x210] sm:$0xff] }
 0x3a4   : > { %3564 = vmatprep.subr.bf16.mxu1 %v3563_v50 }
 0x3a7   : > { %3566 = vmatpush1.bf16.msra.mxu1 %v3565_v1  ;;  %v3465_v1 = vpack.c.bf16 %v1837_v43, %v1835_v33  ;;  %v1854_v33 = vld [vmem:[%s6419_s9 + $0x298] sm:$0xff] }
 0x3a8   : > { %3568 = vmatprep.subr.bf16.mxu1 %v3567_v63 }
 0x3ab   : > { %3570 = vmatpush1.bf16.msra.mxu1 %v3569_v54  ;;  %v1841_v54 = vld [vmem:[%s6419_s9 + $0x230] sm:$0xff] }
 0x3ac   : > { %3572 = vmatprep.subr.bf16.mxu1 %v3571_v26 }
 0x3af   : > { %3574 = vmatpush1.bf16.msra.mxu1 %v3573_v58 }
 0x3b0   : > { %3576 = vmatprep.subr.bf16.mxu1 %v3575_v59  ;;  %v3469_v59 = vpack.c.bf16 %v1841_v54, %v1839_v53  ;;  %v2199_v53 = vld [vmem:[%s6420_s10 + $0x250] sm:$0xff]  ;;  %v1851_v54 = vld [vmem:[%s6419_s9 + $0x280] sm:$0xff] }
 0x3b3   : > { %3578 = vmatpush1.bf16.msra.mxu1 %v3577_v62  ;;  %v1843_v62 = vld [vmem:[%s6419_s9 + $0x240] sm:$0xff] }
 0x3b4   : > { %3580 = vmatprep.subr.bf16.mxu1 %v3579_v3  ;;  %v3473_v24 = vpack.c.bf16 %v1845_v5, %v1843_v62 }
 0x3b7   : > { %3582 = vmatpush1.bf16.msra.mxu1 %v3581_v11  ;;  %v1848_v11 = vld [vmem:[%s6419_s9 + $0x268] sm:$0xff] }
 0x3b8   : > { %3584 = vmatprep.subr.bf16.mxu1 %v3583_v16  ;;  %v3593_v16 = vpack.c.bf16 %v2191_v61, %v2189_v60  ;;  %v2202_v60 = vld [vmem:[%s6420_s10 + $0x268] sm:$0xff]  ;;  %v2204_v61 = vld [vmem:[%s6420_s10 + $0x278] sm:$0xff] }
 0x3bb   : > { %3586 = vmatpush1.bf16.msra.mxu1 %v3585_v28  ;;  %v2193_v28 = vld [vmem:[%s6420_s10 + $0x220] sm:$0xff] }
 0x3bc   : > { %3588 = vmatprep.subr.bf16.mxu1 %v3587_v32  ;;  %v3597_v51 = vpack.c.bf16 %v2195_v30, %v2193_v28  ;;  %v1857_v28 = vld [vmem:[%s6419_s9 + $0x2b0] sm:$0xff]  ;;  %v2206_v30 = vld [vmem:[%s6420_s10 + $0x288] sm:$0xff] }
 0x3bf   : > { %3590 = vmatpush1.bf16.msra.mxu1 %v3589_v37  ;;  %v3475_v37 = vpack.c.bf16 %v1850_v13, %v1848_v11  ;;  %v3603_v11 = vpack.c.bf16 %v2204_v61, %v2202_v60  ;;  %v2201_v13 = vld [vmem:[%s6420_s10 + $0x260] sm:$0xff] }
 0x3c0   : > { %3592 = vmatprep.subr.bf16.mxu1 %v3591_v40  ;;  %v2198_v40 = vld [vmem:[%s6420_s10 + $0x248] sm:$0xff] }
 0x455   : > { %v1596_v47 = vpop.f32.mrb[12].mxu1 }
 0x456   : > { %v1597_v48 = vadd.f32 %v1596_v47, %v5656_v42  ;;  %v1598_v49 = vpop.f32.mrb[13].mxu1 }
 0x457   : > { %v1599_v50 = vadd.f32 %v1598_v49, %v5659_v44  ;;  %v1852_v49 = vld [vmem:[%s6419_s9 + $0x288] sm:$0xff] }
 0x458   : > { %v5677_v63 = vmax.f32 %v1597_v48, 0.0  ;;  %v3479_v56 = vpack.c.bf16 %v1854_v33, %v1852_v49 }
 0x459   : > { %v5675_v45 = vmax.f32 %v1599_v50, 0.0  ;;  %v1602_v46 = vpop.f32.mrb[14].mxu1 }
 0x45a   : > { %v1603_v23 = vadd.f32 %v1602_v46, %v5656_v42  ;;  %v1604_v29 = vpop.f32.mrb[15].mxu1  ;;  %v1723_v14 = vrot.slane %v5677_v63, 1 }
 0x45b   : > { %v1605_v26 = vadd.f32 %v1604_v29, %v5659_v44  ;;  %1963 = vmatprep.mubr.f32.mxu0 %v5675_v45  ;;  %v1726_v9 = vrot.slane %v5675_v45, 1  ;;  %v3599_v29 = vpack.c.bf16 %v2200_v41, %v2198_v40 }
 0x45c   : > { %v5694_v27 = vmax.f32 %v1603_v23, 0.0  ;;  %1964 = vmatmul.mubr.f32.vlgmr.msra.gmra.mrb[20].mxu0 %v5677_v63  ;;  %v3477_v23 = vpack.c.bf16 %v1849_v39, %v1847_v31  ;;  %v2208_v31 = vld [vmem:[%s6420_s10 + $0x298] sm:$0xff] }
 0x45d   : > { %v5697_v57 = vmax.f32 %v1605_v26, 0.0  ;;  %3466 = vmatpush1.bf16.msra.mxu0 %v3465_v1  ;;  %v1608_v58 = vpop.f32.mrb[16].mxu1  ;;  %v3607_v33 = vpack.c.bf16 %v2208_v31, %v2206_v30  ;;  %v1868_v31 = vld [vmem:[%s6419_s9 + $0x308] sm:$0xff] }
 0x45e   : > { %v1724_v0 = vrot.slane %v5694_v27, 1  ;;  %v1609_v2 = vadd.f32 %v1608_v58, %v5656_v42  ;;  %v1610_v3 = vpop.f32.mrb[17].mxu1  ;;  %3468 = vmatprep.subr.bf16.mxu0 %v3467_v52  ;;  %v2197_v52 = vld [vmem:[%s6420_s10 + $0x240] sm:$0xff] }
 0x45f   : > { %v1611_v8 = vadd.f32 %v1610_v3, %v5659_v44  ;;  %1969 = vmatprep.mubr.f32.mxu0 %v5697_v57  ;;  %v1727_v10 = vrot.slane %v5697_v57, 1  ;;  %v1858_v3 = vld [vmem:[%s6419_s9 + $0x2b8] sm:$0xff]  ;;  %v3601_v6 = vpack.c.bf16 %v2199_v53, %v2197_v52  ;;  %v1861_v53 = vld [vmem:[%s6419_s9 + $0x2d0] sm:$0xff] }
 0x460   : > { %v5730_v15 = vmax.f32 %v1609_v2, 0.0  ;;  %1970 = vmatmul.mubr.f32.gmra.mrb[22].mxu0 %v5694_v27  ;;  %v1725_v35 = vsel %vm449_vm2, %v1723_v14, %v1724_v0  ;;  %v1856_v2 = vld [vmem:[%s6419_s9 + $0x2a8] sm:$0xff]  ;;  %v2203_v14 = vld [vmem:[%s6420_s10 + $0x270] sm:$0xff] }
 0x461   : > { %v5733_v17 = vmax.f32 %v1611_v8, 0.0  ;;  %3470 = vmatpush1.bf16.msra.mxu0 %v3469_v59  ;;  %v1614_v19 = vpop.f32.mrb[18].mxu1  ;;  %v1728_v21 = vsel %vm449_vm2, %v1726_v9, %v1727_v10  ;;  %v1853_v59 = vld [vmem:[%s6419_s9 + $0x290] sm:$0xff]  ;;  %v3605_v40 = vpack.c.bf16 %v2203_v14, %v2201_v13 }
 0x462   : > { %v1615_v32 = vadd.f32 %v1614_v19, %v5656_v42  ;;  %v1616_v34 = vpop.f32.mrb[19].mxu1  ;;  %2317 = vmatprep.mubr.f32.mxu1 %v1728_v21  ;;  %3472 = vmatprep.subr.bf16.mxu0 %v3471_v4  ;;  %v1729_v38 = vrot.slane %v5730_v15, 1 }
 0x463   : > { %v1617_v47 = vadd.f32 %v1616_v34, %v5659_v44  ;;  %1975 = vmatprep.mubr.f32.mxu0 %v5733_v17  ;;  %2318 = vmatmul.mubr.f32.vlgmr.msra.gmra.mrb[28].mxu1 %v1725_v35  ;;  %v1731_v48 = vrot.slane %v5733_v17, 1  ;;  %v1860_v35 = vld [vmem:[%s6419_s9 + $0x2c8] sm:$0xff] }
 0x464   : > { %v5766_v43 = vmax.f32 %v1615_v32, 0.0  ;;  %3594 = vmatpush1.bf16.msra.mxu1 %v3593_v16  ;;  %1976 = vmatmul.mubr.f32.gmra.mrb[24].mxu0 %v5730_v15  ;;  %v1730_v50 = vsel %vm449_vm2, %v1724_v0, %v1729_v38  ;;  %v1855_v16 = vld [vmem:[%s6419_s9 + $0x2a0] sm:$0xff] }
 0x465   : > { %v5770_v36 = vmax.f32 %v1617_v47, 0.0  ;;  %3474 = vmatpush1.bf16.msra.mxu0 %v3473_v24  ;;  %v1620_v46 = vpop.f32.mrb[20].mxu1  ;;  %v1732_v1 = vsel %vm449_vm2, %v1727_v10, %v1731_v48  ;;  %3596 = vmatprep.subr.bf16.mxu1 %v3595_v25  ;;  %v3481_v10 = vpack.c.bf16 %v1853_v59, %v1851_v54  ;;  %v3483_v24 = vpack.c.bf16 %v1858_v3, %v1856_v2  ;;  %v2210_v54 = vld [vmem:[%s6420_s10 + $0x2a8] sm:$0xff]  ;;  %v1866_v59 = vld [vmem:[%s6419_s9 + $0x2f8] sm:$0xff] }
 0x466   : > { %v1621_v26 = vadd.f32 %v1620_v46, %v5656_v42  ;;  %v1622_v55 = vpop.f32.mrb[21].mxu1  ;;  %2323 = vmatprep.mubr.f32.mxu1 %v1732_v1  ;;  %3476 = vmatprep.subr.bf16.mxu0 %v3475_v37  ;;  %v1733_v58 = vrot.slane %v5766_v43, 1  ;;  %v1862_v37 = vld [vmem:[%s6419_s9 + $0x2d8] sm:$0xff]  ;;  %v3485_v49 = vpack.c.bf16 %v1857_v28, %v1855_v16  ;;  %v1859_v46 = vld [vmem:[%s6419_s9 + $0x2c0] sm:$0xff] }
 0x467   : > { %v1623_v62 = vadd.f32 %v1622_v55, %v5659_v44  ;;  %1981 = vmatprep.mubr.f32.mxu0 %v5770_v36  ;;  %2324 = vmatmul.mubr.f32.gmra.mrb[30].mxu1 %v1730_v50  ;;  %v1735_v0 = vrot.slane %v5770_v36, 1  ;;  %v2205_v50 = vld [vmem:[%s6420_s10 + $0x280] sm:$0xff]  ;;  %v1687_v22 = vrot.slane %v5770_v36, 7 }
 0x468   : > { %v5802_v4 = vmax.f32 %v1621_v26, 0.0  ;;  %3598 = vmatpush1.bf16.msra.mxu1 %v3597_v51  ;;  %1982 = vmatmul.mubr.f32.gmra.mrb[26].mxu0 %v5766_v43  ;;  %v1734_v5 = vsel %vm449_vm2, %v1729_v38, %v1733_v58  ;;  %v2207_v51 = vld [vmem:[%s6420_s10 + $0x290] sm:$0xff]  ;;  %v2212_v26 = vld [vmem:[%s6420_s10 + $0x2b8] sm:$0xff]  ;;  %v1863_v16 = vld [vmem:[%s6419_s9 + $0x2e0] sm:$0xff] }
 0x469   : > { %v5806_v7 = vmax.f32 %v1623_v62, 0.0  ;;  %3478 = vmatpush1.bf16.msra.mxu0 %v3477_v23  ;;  %v1626_v8 = vpop.f32.mrb[22].mxu1  ;;  %v1736_v9 = vsel %vm449_vm2, %v1731_v48, %v1735_v0  ;;  %3600 = vmatprep.subr.bf16.mxu1 %v3599_v29  ;;  %v3487_v29 = vpack.c.bf16 %v1862_v37, %v1860_v35  ;;  %v3609_v62 = vpack.c.bf16 %v2207_v51, %v2205_v50  ;;  %v2218_v50 = vld [vmem:[%s6420_s10 + $0x2e8] sm:$0xff]  ;;  %v2220_v51 = vld [vmem:[%s6420_s10 + $0x2f8] sm:$0xff] }
 0x46a   : > { %v1627_v19 = vadd.f32 %v1626_v8, %v5656_v42  ;;  %v1628_v21 = vpop.f32.mrb[23].mxu1  ;;  %2329 = vmatprep.mubr.f32.mxu1 %v1736_v9  ;;  %3480 = vmatprep.subr.bf16.mxu0 %v3479_v56  ;;  %v1737_v25 = vrot.slane %v5802_v4, 1  ;;  %v2209_v8 = vld [vmem:[%s6420_s10 + $0x2a0] sm:$0xff]  ;;  %v2211_v9 = vld [vmem:[%s6420_s10 + $0x2b0] sm:$0xff] }
 0x46b   : > { %v1629_v32 = vadd.f32 %v1628_v21, %v5659_v44  ;;  %1987 = vmatprep.mubr.f32.mxu0 %v5806_v7  ;;  %2330 = vmatmul.mubr.f32.gmra.mrb[32].mxu1 %v1734_v5  ;;  %v1739_v34 = vrot.slane %v5806_v7, 1  ;;  %v3489_v5 = vpack.c.bf16 %v1861_v53, %v1859_v46  ;;  %v3613_v30 = vpack.c.bf16 %v2211_v9, %v2209_v8  ;;  %v1878_v8 = vld [vmem:[%s6419_s9 + $0x358] sm:$0xff] }
 0x46c   : > { %v5838_v38 = vmax.f32 %v1627_v19, 0.0  ;;  %3602 = vmatpush1.bf16.msra.mxu1 %v3601_v6  ;;  %1988 = vmatmul.mubr.f32.gmra.mrb[28].mxu0 %v5802_v4  ;;  %v1738_v39 = vsel %vm449_vm2, %v1733_v58, %v1737_v25  ;;  %v1864_v58 = vld [vmem:[%s6419_s9 + $0x2e8] sm:$0xff]  ;;  %v3611_v6 = vpack.c.bf16 %v2212_v26, %v2210_v54  ;;  %v1865_v19 = vld [vmem:[%s6419_s9 + $0x2f0] sm:$0xff]  ;;  %v1676_v46 = vrot.slane %v5675_v45, 7 }
 0x46d   : > { %v5842_v41 = vmax.f32 %v1629_v32, 0.0  ;;  %3482 = vmatpush1.bf16.msra.mxu0 %v3481_v10  ;;  %v1632_v47 = vpop.f32.mrb[24].mxu1  ;;  %v1740_v48 = vsel %vm449_vm2, %v1735_v0, %v1739_v34  ;;  %3604 = vmatprep.subr.bf16.mxu1 %v3603_v11  ;;  %v3491_v13 = vpack.c.bf16 %v1866_v59, %v1864_v58  ;;  %v1870_v32 = vld [vmem:[%s6419_s9 + $0x318] sm:$0xff]  ;;  %v3493_v37 = vpack.c.bf16 %v1865_v19, %v1863_v16  ;;  %v2217_v58 = vld [vmem:[%s6420_s10 + $0x2e0] sm:$0xff]  ;;  %v2219_v59 = vld [vmem:[%s6420_s10 + $0x2f0] sm:$0xff] }
 0x46e   : > { %v1633_v1 = vadd.f32 %v1632_v47, %v5656_v42  ;;  %v1634_v23 = vpop.f32.mrb[25].mxu1  ;;  %2335 = vmatprep.mubr.f32.mxu1 %v1740_v48  ;;  %3484 = vmatprep.subr.bf16.mxu0 %v3483_v24  ;;  %v1741_v52 = vrot.slane %v5838_v38, 1  ;;  %v2214_v24 = vld [vmem:[%s6420_s10 + $0x2c8] sm:$0xff]  ;;  %v1867_v47 = vld [vmem:[%s6419_s9 + $0x300] sm:$0xff]  ;;  %v3621_v9 = vpack.c.bf16 %v2219_v59, %v2217_v58  ;;  %v1890_v59 = vld [vmem:[%s6419_s9 + $0x3b8] sm:$0xff] }
 0x46f   : > { %v1635_v55 = vadd.f32 %v1634_v23, %v5659_v44  ;;  %1993 = vmatprep.mubr.f32.mxu0 %v5842_v41  ;;  %2336 = vmatmul.mubr.f32.gmra.mrb[34].mxu1 %v1738_v39  ;;  %v1743_v56 = vrot.slane %v5842_v41, 1  ;;  %v2213_v39 = vld [vmem:[%s6420_s10 + $0x2c0] sm:$0xff]  ;;  %v3495_v23 = vpack.c.bf16 %v1870_v32, %v1868_v31  ;;  %v1888_v58 = vld [vmem:[%s6419_s9 + $0x3a8] sm:$0xff] }
 0x470   : > { %v5874_v60 = vmax.f32 %v1633_v1, 0.0  ;;  %3606 = vmatpush1.bf16.msra.mxu1 %v3605_v40  ;;  %1994 = vmatmul.mubr.f32.gmra.mrb[30].mxu0 %v5838_v38  ;;  %v1742_v61 = vsel %vm449_vm2, %v1737_v25, %v1741_v52  ;;  %v2216_v25 = vld [vmem:[%s6420_s10 + $0x2d8] sm:$0xff]  ;;  %v2215_v40 = vld [vmem:[%s6420_s10 + $0x2d0] sm:$0xff]  ;;  %v1875_v16 = vld [vmem:[%s6419_s9 + $0x340] sm:$0xff] }
 0x471   : > { %v5878_v0 = vmax.f32 %v1635_v55, 0.0  ;;  %3486 = vmatpush1.bf16.msra.mxu0 %v3485_v49  ;;  %v1638_v2 = vpop.f32.mrb[26].mxu1  ;;  %v1744_v3 = vsel %vm449_vm2, %v1739_v34, %v1743_v56  ;;  %3608 = vmatprep.subr.bf16.mxu1 %v3607_v33  ;;  %v3615_v48 = vpack.c.bf16 %v2216_v25, %v2214_v24  ;;  %v1869_v33 = vld [vmem:[%s6419_s9 + $0x310] sm:$0xff]  ;;  %v3617_v54 = vpack.c.bf16 %v2215_v40, %v2213_v39  ;;  %v2228_v24 = vld [vmem:[%s6420_s10 + $0x338] sm:$0xff]  ;;  %v1880_v25 = vld [vmem:[%s6419_s9 + $0x368] sm:$0xff] }
 0x472   : > { %v1639_v10 = vadd.f32 %v1638_v2, %v5656_v42  ;;  %v1640_v11 = vpop.f32.mrb[27].mxu1  ;;  %2341 = vmatprep.mubr.f32.mxu1 %v1744_v3  ;;  %3488 = vmatprep.subr.bf16.mxu0 %v3487_v29  ;;  %v1745_v14 = vrot.slane %v5874_v60, 1  ;;  %v1872_v29 = vld [vmem:[%s6419_s9 + $0x328] sm:$0xff]  ;;  %v3497_v55 = vpack.c.bf16 %v1869_v33, %v1867_v47  ;;  %v1873_v2 = vld [vmem:[%s6419_s9 + $0x330] sm:$0xff]  ;;  %v1879_v39 = vld [vmem:[%s6419_s9 + $0x360] sm:$0xff] }
 0x473   : > { %v1641_v21 = vadd.f32 %v1640_v11, %v5659_v44  ;;  %1999 = vmatprep.mubr.f32.mxu0 %v5878_v0  ;;  %2342 = vmatmul.mubr.f32.gmra.mrb[36].mxu1 %v1742_v61  ;;  %v1747_v42 = vrot.slane %v5878_v0, 1  ;;  %v1871_v61 = vld [vmem:[%s6419_s9 + $0x320] sm:$0xff]  ;;  %v2222_v3 = vld [vmem:[%s6420_s10 + $0x308] sm:$0xff]  ;;  %v1881_v47 = vld [vmem:[%s6419_s9 + $0x370] sm:$0xff] }
 0x474   : > { %v5904_v28 = vmax.f32 %v1639_v10, 0.0  ;;  %3610 = vmatpush1.bf16.msra.mxu1 %v3609_v62  ;;  %2000 = vmatmul.mubr.f32.gmra.mrb[32].mxu0 %v5874_v60  ;;  %v1746_v44 = vsel %vm449_vm2, %v1741_v52, %v1745_v14  ;;  %v1874_v52 = vld [vmem:[%s6419_s9 + $0x338] sm:$0xff]  ;;  %v3501_v10 = vpack.c.bf16 %v1873_v2, %v1871_v61  ;;  %v1884_v33 = vld [vmem:[%s6419_s9 + $0x388] sm:$0xff] }
 0x475   : > { %v5914_v34 = vmax.f32 %v1641_v21, 0.0  ;;  %3490 = vmatpush1.bf16.msra.mxu0 %v3489_v5  ;;  %v1748_v35 = vsel %vm449_vm2, %v1743_v56, %v1747_v42  ;;  %3612 = vmatprep.subr.bf16.mxu1 %v3611_v6  ;;  %v3619_v56 = vpack.c.bf16 %v2220_v51, %v2218_v50  ;;  %v3499_v62 = vpack.c.bf16 %v1874_v52, %v1872_v29  ;;  %v2224_v5 = vld [vmem:[%s6420_s10 + $0x318] sm:$0xff]  ;;  %v1876_v6 = vld [vmem:[%s6419_s9 + $0x348] sm:$0xff]  ;;  %v1877_v21 = vld [vmem:[%s6419_s9 + $0x350] sm:$0xff] }
 0x476   : > { %2347 = vmatprep.mubr.f32.mxu1 %v1748_v35  ;;  %3492 = vmatprep.subr.bf16.mxu0 %v3491_v13  ;;  %v1749_v49 = vrot.slane %v5904_v28, 1  ;;  %v3623_v11 = vpack.c.bf16 %v2224_v5, %v2222_v3  ;;  %v2221_v13 = vld [vmem:[%s6420_s10 + $0x300] sm:$0xff]  ;;  %v3503_v19 = vpack.c.bf16 %v1878_v8, %v1876_v6  ;;  %v3505_v31 = vpack.c.bf16 %v1877_v21, %v1875_v16  ;;  %v1886_v50 = vld [vmem:[%s6419_s9 + $0x398] sm:$0xff]  ;;  %v2231_v52 = vld [vmem:[%s6420_s10 + $0x350] sm:$0xff] }
 0x477   : > { %2005 = vmatprep.mubr.f32.mxu0 %v5914_v34  ;;  %2348 = vmatmul.mubr.f32.gmra.mrb[38].mxu1 %v1746_v44  ;;  %v1751_v1 = vrot.slane %v5914_v34, 1  ;;  %v1882_v44 = vld [vmem:[%s6419_s9 + $0x378] sm:$0xff]  ;;  %v2225_v35 = vld [vmem:[%s6420_s10 + $0x320] sm:$0xff]  ;;  %v2235_v5 = vld [vmem:[%s6420_s10 + $0x370] sm:$0xff]  ;;  %v3515_v8 = vpack.c.bf16 %v1890_v59, %v1888_v58  ;;  %v1679_v59 = vrot.slane %v5697_v57, 7 }
 0x478   : > { %3614 = vmatpush1.bf16.msra.mxu1 %v3613_v30  ;;  %2006 = vmatmul.mubr.f32.gmra.mrb[34].mxu0 %v5904_v28  ;;  %v1750_v53 = vsel %vm449_vm2, %v1745_v14, %v1749_v49  ;;  %v2223_v14 = vld [vmem:[%s6420_s10 + $0x310] sm:$0xff]  ;;  %v3507_v40 = vpack.c.bf16 %v1882_v44, %v1880_v25  ;;  %v2229_v29 = vld [vmem:[%s6420_s10 + $0x340] sm:$0xff] }
 0x479   : > { %3494 = vmatpush1.bf16.msra.mxu0 %v3493_v37  ;;  %2995 = vmatprep.mubr.msk.f32.mxu0 %vm4864_vm4, %v1676_v46  ;;  %v1752_v26 = vsel %vm449_vm2, %v1747_v42, %v1751_v1  ;;  %v2226_v42 = vld [vmem:[%s6420_s10 + $0x328] sm:$0xff]  ;;  %v3625_v30 = vpack.c.bf16 %v2223_v14, %v2221_v13  ;;  %v2227_v37 = vld [vmem:[%s6420_s10 + $0x330] sm:$0xff]  ;;  %v3633_v61 = vpack.c.bf16 %v2231_v52, %v2229_v29  ;;  %v2233_v3 = vld [vmem:[%s6420_s10 + $0x360] sm:$0xff] }
 0x47a   : > { %2353 = vmatprep.mubr.f32.mxu1 %v1752_v26  ;;  %3616 = vmatprep.subr.bf16.mxu1 %v3615_v48  ;;  %v3627_v32 = vpack.c.bf16 %v2228_v24, %v2226_v42  ;;  %v2230_v48 = vld [vmem:[%s6420_s10 + $0x348] sm:$0xff]  ;;  %v3629_v51 = vpack.c.bf16 %v2227_v37, %v2225_v35  ;;  %v1885_v26 = vld [vmem:[%s6419_s9 + $0x390] sm:$0xff]  ;;  %v1887_v6 = vld [vmem:[%s6419_s9 + $0x3a0] sm:$0xff]  ;;  %v3637_v16 = vpack.c.bf16 %v2235_v5, %v2233_v3  ;;  %v1675_v3 = vrot.slane %v5677_v63, 7 }
 0x47b   : > { %3496 = vmatprep.subr.bf16.mxu0 %v3495_v23  ;;  %2354 = vmatmul.mubr.f32.gmra.mrb[40].mxu1 %v1750_v53  ;;  %v1883_v53 = vld [vmem:[%s6419_s9 + $0x380] sm:$0xff]  ;;  %v1892_v13 = vld [vmem:[%s6419_s9 + $0x3c8] sm:$0xff]  ;;  %v1894_v14 = vld [vmem:[%s6419_s9 + $0x3d8] sm:$0xff]  ;;  %v1677_v5 = vrot.slane %v5694_v27, 7 }
 0x47c   : > { %3618 = vmatpush1.bf16.msra.mxu1 %v3617_v54  ;;  %2998 = vmatprep.mubr.msk.f32.mxu1 %vm449_vm2, %v1751_v1  ;;  %v3509_v1 = vpack.c.bf16 %v1881_v47, %v1879_v39  ;;  %v3511_v54 = vpack.c.bf16 %v1886_v50, %v1884_v33  ;;  %v2237_v42 = vld [vmem:[%s6420_s10 + $0x380] sm:$0xff]  ;;  %v2239_v24 = vld [vmem:[%s6420_s10 + $0x390] sm:$0xff]  ;;  %v3519_v44 = vpack.c.bf16 %v1894_v14, %v1892_v13  ;;  %v1896_v35 = vld [vmem:[%s6419_s9 + $0x3e8] sm:$0xff] }
 0x47d   : > { %3498 = vmatpush1.bf16.msra.mxu0 %v3497_v55  ;;  %3620 = vmatprep.subr.bf16.mxu1 %v3619_v56  ;;  %v2234_v55 = vld [vmem:[%s6420_s10 + $0x368] sm:$0xff]  ;;  %v2236_v56 = vld [vmem:[%s6420_s10 + $0x378] sm:$0xff]  ;;  %v1891_v25 = vld [vmem:[%s6419_s9 + $0x3c0] sm:$0xff]  ;;  %v3641_v39 = vpack.c.bf16 %v2239_v24, %v2237_v42  ;;  %v1695_v42 = vrot.slane %v5842_v41, 7  ;;  %v1693_v24 = vrot.slane %v5838_v38, 7 }
 0x47e   : > { %3500 = vmatprep.subr.bf16.mxu0 %v3499_v62  ;;  %v3513_v62 = vpack.c.bf16 %v1885_v26, %v1883_v53  ;;  %v3635_v2 = vpack.c.bf16 %v2236_v56, %v2234_v55  ;;  %v1898_v37 = vld [vmem:[%s6419_s9 + $0x3f8] sm:$0xff]  ;;  %v1895_v33 = vld [vmem:[%s6419_s9 + $0x3e0] sm:$0xff]  ;;  %v2247_v26 = vld [vmem:[%s6420_s10 + $0x3d0] sm:$0xff] }
 0x47f   : > { %2999 = vmatmul.mubr.msk.f32.gmra.mrb[42].mxu1 %vm449_vm2, %v1749_v49  ;;  %v2232_v49 = vld [vmem:[%s6420_s10 + $0x358] sm:$0xff]  ;;  %v3523_v50 = vpack.c.bf16 %v1898_v37, %v1896_v35  ;;  %v2250_v55 = vld [vmem:[%s6420_s10 + $0x3e8] sm:$0xff] }
 0x480   : > { %3622 = vmatpush1.bf16.msra.mxu1 %v3621_v9  ;;  %2430 = vmatprep.mubr.f32.mxu1 %v5675_v45  ;;  %v3631_v23 = vpack.c.bf16 %v2232_v49, %v2230_v48  ;;  %v1889_v9 = vld [vmem:[%s6419_s9 + $0x3b0] sm:$0xff]  ;;  %v2241_v48 = vld [vmem:[%s6420_s10 + $0x3a0] sm:$0xff]  ;;  %v2252_v56 = vld [vmem:[%s6420_s10 + $0x3f8] sm:$0xff] }
 0x481   : > { %3502 = vmatpush1.bf16.msra.mxu0 %v3501_v10  ;;  %3624 = vmatprep.subr.bf16.mxu1 %v3623_v11  ;;  %v2238_v10 = vld [vmem:[%s6420_s10 + $0x388] sm:$0xff]  ;;  %v2240_v11 = vld [vmem:[%s6420_s10 + $0x398] sm:$0xff]  ;;  %v2243_v49 = vld [vmem:[%s6420_s10 + $0x3b0] sm:$0xff] }
 0x482   : > { %3504 = vmatprep.subr.bf16.mxu0 %v3503_v19  ;;  %v3517_v19 = vpack.c.bf16 %v1889_v9, %v1887_v6  ;;  %v3639_v21 = vpack.c.bf16 %v2240_v11, %v2238_v10  ;;  %v3645_v29 = vpack.c.bf16 %v2243_v49, %v2241_v48  ;;  %v1680_v6 = vsel %vm443_vm0, %v1676_v46, %v1679_v59 }
 0x483   : > { %v1683_v9 = vrot.slane %v5733_v17, 7  ;;  %v1678_v10 = vsel %vm443_vm0, %v1675_v3, %v1677_v5  ;;  %v1681_v11 = vrot.slane %v5730_v15, 7  ;;  %v1685_v46 = vrot.slane %v5766_v43, 7 }
 0x484   : > { %3626 = vmatpush1.bf16.msra.mxu1 %v3625_v30  ;;  %v1893_v30 = vld [vmem:[%s6419_s9 + $0x3d0] sm:$0xff] }
 0x485   : > { %3506 = vmatpush1.bf16.msra.mxu0 %v3505_v31  ;;  %3628 = vmatprep.subr.bf16.mxu1 %v3627_v32  ;;  %v2242_v31 = vld [vmem:[%s6420_s10 + $0x3a8] sm:$0xff]  ;;  %v2244_v32 = vld [vmem:[%s6420_s10 + $0x3b8] sm:$0xff]  ;;  %v1684_v13 = vsel %vm443_vm0, %v1679_v59, %v1683_v9  ;;  %v1682_v45 = vsel %vm443_vm0, %v1677_v5, %v1681_v11  ;;  %v1688_v14 = vsel %vm443_vm0, %v1683_v9, %v1687_v22 }
 0x486   : > { %3508 = vmatprep.subr.bf16.mxu0 %v3507_v40  ;;  %v3521_v40 = vpack.c.bf16 %v1893_v30, %v1891_v25  ;;  %v3643_v47 = vpack.c.bf16 %v2244_v32, %v2242_v31  ;;  %v1699_v25 = vrot.slane %v5878_v0, 7  ;;  %v1703_v30 = vrot.slane %v5914_v34, 7 }
 0x487   : > { %v1701_v31 = vrot.slane %v5904_v28, 7 }
 0x488   : > { %3630 = vmatpush1.bf16.msra.mxu1 %v3629_v51  ;;  %v1897_v51 = vld [vmem:[%s6419_s9 + $0x3f0] sm:$0xff] }
 0x489   : > { %3510 = vmatpush1.bf16.msra.mxu0 %v3509_v1  ;;  %3632 = vmatprep.subr.bf16.mxu1 %v3631_v23  ;;  %v2246_v1 = vld [vmem:[%s6420_s10 + $0x3c8] sm:$0xff]  ;;  %v2248_v23 = vld [vmem:[%s6420_s10 + $0x3d8] sm:$0xff]  ;;  %v3525_v52 = vpack.c.bf16 %v1897_v51, %v1895_v33 }
 0x48a   : > { %3512 = vmatprep.subr.bf16.mxu0 %v3511_v54  ;;  %v3647_v53 = vpack.c.bf16 %v2248_v23, %v2246_v1  ;;  %v2245_v54 = vld [vmem:[%s6420_s10 + $0x3c0] sm:$0xff] }
 0x48b   : > { %v3649_v58 = vpack.c.bf16 %v2247_v26, %v2245_v54 }
 0x48c   : > { %3634 = vmatpush1.bf16.msra.mxu1 %v3633_v61  ;;  %v3651_v61 = vpack.c.bf16 %v2252_v56, %v2250_v55 }
 0x48d   : > { %3514 = vmatpush1.bf16.msra.mxu0 %v3513_v62  ;;  %3636 = vmatprep.subr.bf16.mxu1 %v3635_v2  ;;  %v2249_v62 = vld [vmem:[%s6420_s10 + $0x3e0] sm:$0xff]  ;;  %v2251_v2 = vld [vmem:[%s6420_s10 + $0x3f0] sm:$0xff] }
 0x48e   : > { %3516 = vmatprep.subr.bf16.mxu0 %v3515_v8  ;;  %v3653_v8 = vpack.c.bf16 %v2251_v2, %v2249_v62 }
 0x490   : > { %3638 = vmatpush1.bf16.msra.mxu1 %v3637_v16  ;;  %v1691_v16 = vrot.slane %v5806_v7, 7 }
 0x491   : > { %3518 = vmatpush1.bf16.msra.mxu0 %v3517_v19  ;;  %3640 = vmatprep.subr.bf16.mxu1 %v3639_v21  ;;  %v1686_v19 = vsel %vm443_vm0, %v1681_v11, %v1685_v46  ;;  %v1689_v21 = vrot.slane %v5802_v4, 7 }
 0x492   : > { %3520 = vmatprep.subr.bf16.mxu0 %v3519_v44  ;;  %v1697_v44 = vrot.slane %v5874_v60, 7 }
 0x494   : > { %3642 = vmatpush1.bf16.msra.mxu1 %v3641_v39 }
 0x495   : > { %3522 = vmatpush1.bf16.msra.mxu0 %v3521_v40  ;;  %3644 = vmatprep.subr.bf16.mxu1 %v3643_v47 }
 0x496   : > { %3524 = vmatprep.subr.bf16.mxu0 %v3523_v50 }
 0x498   : > { %3646 = vmatpush1.bf16.msra.mxu1 %v3645_v29 }
 0x499   : > { %3526 = vmatpush1.bf16.msra.mxu0 %v3525_v52  ;;  %3648 = vmatprep.subr.bf16.mxu1 %v3647_v53 }
 0x49c   : > { %2997 = vmatmul.mubr.msk.f32.vlgmr.msra.gmra.mrb[20].mxu0 %vm4864_vm4, %v1675_v3  ;;  %3650 = vmatpush1.bf16.msra.mxu1 %v3649_v58 }
 0x49d   : > { %2082 = vmatprep.mubr.f32.mxu0 %v1680_v6  ;;  %3652 = vmatprep.subr.bf16.mxu1 %v3651_v61 }
 0x4a0   : > { %2083 = vmatmul.mubr.f32.gmra.mrb[22].mxu0 %v1678_v10  ;;  %3654 = vmatpush1.bf16.msra.mxu1 %v3653_v8 }
 0x4a1   : > { %2088 = vmatprep.mubr.f32.mxu0 %v1684_v13 }
 0x4a3   : > { %2431 = vmatmul.mubr.f32.vlgmr.msra.gmra.mrb[28].mxu1 %v5677_v63  ;;  %v1692_v63 = vsel %vm443_vm0, %v1687_v22, %v1691_v16 }
 0x4a4   : > { %2089 = vmatmul.mubr.f32.gmra.mrb[24].mxu0 %v1682_v45  ;;  %2436 = vmatprep.mubr.f32.mxu1 %v5697_v57  ;;  %v1690_v57 = vsel %vm443_vm0, %v1685_v46, %v1689_v21 }
 0x4a5   : > { %2094 = vmatprep.mubr.f32.mxu0 %v1688_v14 }
 0x4a7   : > { %2437 = vmatmul.mubr.f32.gmra.mrb[30].mxu1 %v5694_v27  ;;  %v1696_v27 = vsel %vm443_vm0, %v1691_v16, %v1695_v42 }
 0x4a8   : > { %2095 = vmatmul.mubr.f32.gmra.mrb[26].mxu0 %v1686_v19  ;;  %2442 = vmatprep.mubr.f32.mxu1 %v5733_v17  ;;  %v1694_v17 = vsel %vm443_vm0, %v1689_v21, %v1693_v24 }
 0x4a9   : > { %2100 = vmatprep.mubr.f32.mxu0 %v1692_v63 }
 0x4ab   : > { %2443 = vmatmul.mubr.f32.gmra.mrb[32].mxu1 %v5730_v15  ;;  %v1700_v15 = vsel %vm443_vm0, %v1695_v42, %v1699_v25  ;;  %v2479_v42 = vld [vmem:[%s6421_s11] sm:$0xff] }
 0x4ac   : > { %2101 = vmatmul.mubr.f32.gmra.mrb[28].mxu0 %v1690_v57  ;;  %2448 = vmatprep.mubr.f32.mxu1 %v5770_v36  ;;  %v1698_v36 = vsel %vm443_vm0, %v1693_v24, %v1697_v44  ;;  %v2488_v57 = vld [vmem:[%s6421_s11 + $0x48] sm:$0xff] }
 0x4ad   : > { %2106 = vmatprep.mubr.f32.mxu0 %v1696_v27  ;;  %v2480_v24 = vld [vmem:[%s6421_s11 + $0x8] sm:$0xff]  ;;  %v2489_v27 = vld [vmem:[%s6421_s11 + $0x50] sm:$0xff] }
 0x4af   : > { %2449 = vmatmul.mubr.f32.gmra.mrb[34].mxu1 %v5766_v43  ;;  %v1704_v43 = vsel %vm443_vm0, %v1699_v25, %v1703_v30  ;;  %v2481_v25 = vld [vmem:[%s6421_s11 + $0x10] sm:$0xff]  ;;  %v2483_v30 = vld [vmem:[%s6421_s11 + $0x20] sm:$0xff] }
 0x4b0   : > { %2107 = vmatmul.mubr.f32.gmra.mrb[30].mxu0 %v1694_v17  ;;  %2454 = vmatprep.mubr.f32.mxu1 %v5806_v7  ;;  %v1702_v7 = vsel %vm443_vm0, %v1697_v44, %v1701_v31  ;;  %v2490_v17 = vld [vmem:[%s6421_s11 + $0x58] sm:$0xff]  ;;  %v2484_v31 = vld [vmem:[%s6421_s11 + $0x28] sm:$0xff] }
 0x4b1   : > { %2112 = vmatprep.mubr.f32.mxu0 %v1700_v15  ;;  %v2482_v44 = vld [vmem:[%s6421_s11 + $0x18] sm:$0xff]  ;;  %v2491_v15 = vld [vmem:[%s6421_s11 + $0x60] sm:$0xff] }
 0x4b3   : > { %2455 = vmatmul.mubr.f32.gmra.mrb[36].mxu1 %v5802_v4 }
 0x4b4   : > { %2113 = vmatmul.mubr.f32.gmra.mrb[32].mxu0 %v1698_v36  ;;  %2460 = vmatprep.mubr.f32.mxu1 %v5842_v41  ;;  %v2492_v36 = vld [vmem:[%s6421_s11 + $0x68] sm:$0xff] }
 0x4b5   : > { %2118 = vmatprep.mubr.f32.mxu0 %v1704_v43  ;;  %v2493_v43 = vld [vmem:[%s6421_s11 + $0x70] sm:$0xff] }
 0x4b7   : > { %2461 = vmatmul.mubr.f32.gmra.mrb[38].mxu1 %v5838_v38 }
 0x4b8   : > { %2119 = vmatmul.mubr.f32.gmra.mrb[34].mxu0 %v1702_v7  ;;  %2466 = vmatprep.mubr.f32.mxu1 %v5878_v0  ;;  %v2485_v7 = vld [vmem:[%s6421_s11 + $0x30] sm:$0xff] }
 0x4b9   : > { %2571 = vmatprep.mubr.f32.mxu0 %v3991_v12 }
 0x4bb   : > { %2467 = vmatmul.mubr.f32.gmra.mrb[40].mxu1 %v5874_v60 }
 0x4bc   : > { %2472 = vmatprep.mubr.f32.mxu1 %v5914_v34 }
 0x4bf   : > { %2473 = vmatmul.mubr.f32.gmra.mrb[42].mxu1 %v5904_v28 }
 0x4c0   : > { %2625 = vmatprep.mubr.f32.mxu1 %v3991_v12 }
 0x56f   : > { %v2078_v4 = vpop.f32.mrb[20].mxu0 }
 0x570   : > { %v2080_v41 = vpop.f32.mrb[21].mxu0 }
 0x573   : > { %v2084_v32 = vpop.f32.mrb[22].mxu0 }
 0x574   : > { %v3657_v35 = vpack.c.bf16 %v2084_v32, %v2078_v4  ;;  %v2086_v38 = vpop.f32.mrb[23].mxu0  ;;  %v2494_v4 = vld [vmem:[%s6421_s11 + $0x78] sm:$0xff]  ;;  %v2487_v32 = vld [vmem:[%s6421_s11 + $0x40] sm:$0xff] }
 0x575   : > { %v3655_v37 = vpack.c.bf16 %v2086_v38, %v2080_v41  ;;  %v2486_v41 = vld [vmem:[%s6421_s11 + $0x38] sm:$0xff] }
 0x576   : > { %v2432_v39 = vpop.f32.mrb[28].mxu1 }
 0x577   : > { %v2090_v40 = vpop.f32.mrb[24].mxu0  ;;  %v2434_v47 = vpop.f32.mrb[29].mxu1  ;;  %3656 = vmatprep.subr.bf16.mxu0 %v3655_v37  ;;  %3687 = vmatprep.subr.bf16.mxu1 %v3655_v37 }
 0x578   : > { %v2092_v0 = vpop.f32.mrb[25].mxu0  ;;  %3658 = vmatpush1.bf16.msra.mxu0 %v3657_v35  ;;  %3695 = vmatpush1.bf16.msra.mxu1 %v3657_v35  ;;  %v2495_v35 = vld [vmem:[%s6422_s12] sm:$0x3] }
 0x579   : > { %v6251_v38 = vrot.slane %v2495_v35, %v4754_v18  ;;  %v6254_v37 = vrot.slane %v2495_v35, %v4759_v20 }
 0x57a   : > { %v2438_v60 = vpop.f32.mrb[30].mxu1 }
 0x57b   : > { %v3673_v34 = vpack.c.bf16 %v2438_v60, %v2432_v39  ;;  %v2096_v48 = vpop.f32.mrb[26].mxu0  ;;  %v2440_v28 = vpop.f32.mrb[31].mxu1 }
 0x57c   : > { %v3661_v49 = vpack.c.bf16 %v2096_v48, %v2090_v40  ;;  %v3671_v33 = vpack.c.bf16 %v2440_v28, %v2434_v47  ;;  %v2098_v50 = vpop.f32.mrb[27].mxu0 }
 0x57d   : > { %v3659_v51 = vpack.c.bf16 %v2098_v50, %v2092_v0 }
 0x57e   : > { %v2444_v1 = vpop.f32.mrb[32].mxu1 }
 0x57f   : > { %v2102_v23 = vpop.f32.mrb[28].mxu0  ;;  %v2446_v29 = vpop.f32.mrb[33].mxu1  ;;  %3660 = vmatprep.subr.bf16.mxu0 %v3659_v51  ;;  %3688 = vmatprep.subr.bf16.mxu1 %v3659_v51 }
 0x580   : > { %v2104_v52 = vpop.f32.mrb[29].mxu0  ;;  %3662 = vmatpush1.bf16.msra.mxu0 %v3661_v49  ;;  %3696 = vmatpush1.bf16.msra.mxu1 %v3661_v49 }
 0x582   : > { %v2450_v53 = vpop.f32.mrb[34].mxu1 }
 0x583   : > { %v3677_v54 = vpack.c.bf16 %v2450_v53, %v2444_v1  ;;  %v2108_v26 = vpop.f32.mrb[30].mxu0  ;;  %v2452_v55 = vpop.f32.mrb[35].mxu1 }
 0x584   : > { %v3665_v56 = vpack.c.bf16 %v2108_v26, %v2102_v23  ;;  %v3675_v58 = vpack.c.bf16 %v2452_v55, %v2446_v29  ;;  %v2110_v59 = vpop.f32.mrb[31].mxu0 }
 0x585   : > { %v3663_v61 = vpack.c.bf16 %v2110_v59, %v2104_v52 }
 0x586   : > { %v2456_v62 = vpop.f32.mrb[36].mxu1 }
 0x587   : > { %v2114_v2 = vpop.f32.mrb[32].mxu0  ;;  %v2458_v3 = vpop.f32.mrb[37].mxu1  ;;  %3664 = vmatprep.subr.bf16.mxu0 %v3663_v61  ;;  %3689 = vmatprep.subr.bf16.mxu1 %v3663_v61 }
 0x588   : > { %v2116_v5 = vpop.f32.mrb[33].mxu0  ;;  %3666 = vmatpush1.bf16.msra.mxu0 %v3665_v56  ;;  %3697 = vmatpush1.bf16.msra.mxu1 %v3665_v56 }
 0x58a   : > { %v2462_v6 = vpop.f32.mrb[38].mxu1 }
 0x58b   : > { %v3681_v8 = vpack.c.bf16 %v2462_v6, %v2456_v62  ;;  %v2120_v9 = vpop.f32.mrb[34].mxu0  ;;  %v2464_v10 = vpop.f32.mrb[39].mxu1 }
 0x58c   : > { %v3669_v11 = vpack.c.bf16 %v2120_v9, %v2114_v2  ;;  %v3679_v13 = vpack.c.bf16 %v2464_v10, %v2458_v3  ;;  %v2122_v22 = vpop.f32.mrb[35].mxu0 }
 0x58d   : > { %v3667_v45 = vpack.c.bf16 %v2122_v22, %v2116_v5 }
 0x58e   : > { %v2468_v46 = vpop.f32.mrb[40].mxu1 }
 0x58f   : > { %v2470_v14 = vpop.f32.mrb[41].mxu1  ;;  %3668 = vmatprep.subr.bf16.mxu0 %v3667_v45  ;;  %3690 = vmatprep.subr.bf16.mxu1 %v3667_v45 }
 0x590   : > { %3670 = vmatpush1.bf16.msra.mxu0 %v3669_v11  ;;  %3698 = vmatpush1.bf16.msra.mxu1 %v3669_v11 }
 0x591   : > { %3672 = vmatprep.subr.bf16.mxu0 %v3671_v33  ;;  %3691 = vmatprep.subr.bf16.mxu1 %v3671_v33 }
 0x592   : > { %v2474_v16 = vpop.f32.mrb[42].mxu1 }
 0x593   : > { %v3685_v19 = vpack.c.bf16 %v2474_v16, %v2468_v46  ;;  %v2476_v21 = vpop.f32.mrb[43].mxu1 }
 0x594   : > { %v3683_v63 = vpack.c.bf16 %v2476_v21, %v2470_v14  ;;  %3674 = vmatpush1.bf16.msra.mxu0 %v3673_v34  ;;  %3699 = vmatpush1.bf16.msra.mxu1 %v3673_v34 }
 0x595   : > { %3676 = vmatprep.subr.bf16.mxu0 %v3675_v58  ;;  %3692 = vmatprep.subr.bf16.mxu1 %v3675_v58 }
 0x598   : > { %3678 = vmatpush1.bf16.msra.mxu0 %v3677_v54  ;;  %3700 = vmatpush1.bf16.msra.mxu1 %v3677_v54 }
 0x599   : > { %3680 = vmatprep.subr.bf16.mxu0 %v3679_v13  ;;  %3693 = vmatprep.subr.bf16.mxu1 %v3679_v13 }
 0x59c   : > { %3682 = vmatpush1.bf16.msra.mxu0 %v3681_v8  ;;  %3701 = vmatpush1.bf16.msra.mxu1 %v3681_v8 }
 0x59d   : > { %3684 = vmatprep.subr.bf16.mxu0 %v3683_v63  ;;  %3694 = vmatprep.subr.bf16.mxu1 %v3683_v63 }
 0x5a0   : > { %3686 = vmatpush1.bf16.msra.mxu0 %v3685_v19  ;;  %3702 = vmatpush1.bf16.msra.mxu1 %v3685_v19 }
 0x5a3   : > { %2572 = vmatmul.mubr.f32.vlgmr.msra.gmra.mrb[36].mxu0 %v2479_v42  ;;  %2626 = vmatmul.mubr.f32.vlgmr.msra.gmra.mrb[44].mxu1 %v2488_v57 }
 0x5a4   : > { %2577 = vmatprep.mubr.f32.mxu0 %v3991_v12  ;;  %2631 = vmatprep.mubr.f32.mxu1 %v3991_v12 }
 0x5a7   : > { %2578 = vmatmul.mubr.f32.gmra.mrb[38].mxu0 %v2480_v24  ;;  %2632 = vmatmul.mubr.f32.gmra.mrb[46].mxu1 %v2489_v27 }
 0x5a8   : > { %2583 = vmatprep.mubr.f32.mxu0 %v3991_v12  ;;  %2637 = vmatprep.mubr.f32.mxu1 %v3991_v12 }
 0x5ab   : > { %2584 = vmatmul.mubr.f32.gmra.mrb[40].mxu0 %v2481_v25  ;;  %2638 = vmatmul.mubr.f32.gmra.mrb[48].mxu1 %v2490_v17 }
 0x5ac   : > { %2589 = vmatprep.mubr.f32.mxu0 %v3991_v12  ;;  %2643 = vmatprep.mubr.f32.mxu1 %v3991_v12 }
 0x5af   : > { %2590 = vmatmul.mubr.f32.gmra.mrb[42].mxu0 %v2482_v44  ;;  %2644 = vmatmul.mubr.f32.gmra.mrb[50].mxu1 %v2491_v15 }
 0x5b0   : > { %2595 = vmatprep.mubr.f32.mxu0 %v3991_v12  ;;  %2649 = vmatprep.mubr.f32.mxu1 %v3991_v12 }
 0x5b3   : > { %2596 = vmatmul.mubr.f32.gmra.mrb[44].mxu0 %v2483_v30  ;;  %2650 = vmatmul.mubr.f32.gmra.mrb[52].mxu1 %v2492_v36 }
 0x5b4   : > { %2601 = vmatprep.mubr.f32.mxu0 %v3991_v12  ;;  %2655 = vmatprep.mubr.f32.mxu1 %v3991_v12 }
 0x5b7   : > { %2602 = vmatmul.mubr.f32.gmra.mrb[46].mxu0 %v2484_v31  ;;  %2656 = vmatmul.mubr.f32.gmra.mrb[54].mxu1 %v2493_v43 }
 0x5b8   : > { %2607 = vmatprep.mubr.f32.mxu0 %v3991_v12  ;;  %2661 = vmatprep.mubr.f32.mxu1 %v3991_v12 }
 0x5bb   : > { %2608 = vmatmul.mubr.f32.gmra.mrb[48].mxu0 %v2485_v7  ;;  %2662 = vmatmul.mubr.f32.gmra.mrb[56].mxu1 %v2494_v4 }
 0x5bc   : > { %2613 = vmatprep.mubr.f32.mxu0 %v3991_v12 }
 0x5bf   : > { %2614 = vmatmul.mubr.f32.gmra.mrb[50].mxu0 %v2486_v41 }
 0x5c0   : > { %2619 = vmatprep.mubr.f32.mxu0 %v3991_v12 }
 0x5c3   : > { %2620 = vmatmul.mubr.f32.gmra.mrb[52].mxu0 %v2487_v32 }
 0x676   : > { %v2573_v39 = vpop.f32.mrb[36].mxu0  ;;  %v2627_v40 = vpop.f32.mrb[44].mxu1 }
 0x677   : > { %v2574_v47 = vadd.f32 %v2573_v39, %v6251_v38  ;;  %v2575_v12 = vpop.f32.mrb[37].mxu0  ;;  %v2628_v0 = vadd.f32 %v2627_v40, %v6251_v38  ;;  %v2629_v60 = vpop.f32.mrb[45].mxu1 }
 0x678   : > { %v2576_v34 = vadd.f32 %v2575_v12, %v6254_v37  ;;  %v2630_v48 = vadd.f32 %v2629_v60, %v6254_v37 }
 0x679   : > { %v3000_v28 = vmul.f32 -1.442695, %v2574_v47  ;;  %v3018_v49 = vmul.f32 -1.442695, %v2628_v0 }
 0x67a   : > { %v3001_v33 = vmul.f32 -1.442695, %v2576_v34  ;;  %v2579_v18 = vpop.f32.mrb[38].mxu0  ;;  %v3019_v50 = vmul.f32 -1.442695, %v2630_v48  ;;  %v2633_v51 = vpop.f32.mrb[46].mxu1 }
 0x67b   : > { %3799 = vpow2.f32 %v3000_v28  ;;  %v2580_v20 = vadd.f32 %v2579_v18, %v6251_v38  ;;  %v2581_v1 = vpop.f32.mrb[39].mxu0  ;;  %v2634_v23 = vadd.f32 %v2633_v51, %v6251_v38  ;;  %v2635_v29 = vpop.f32.mrb[47].mxu1 }
 0x67c   : > { %3801 = vpow2.f32 %v3001_v33  ;;  %v2582_v52 = vadd.f32 %v2581_v1, %v6254_v37  ;;  %v2636_v53 = vadd.f32 %v2635_v29, %v6254_v37 }
 0x67d   : > { %v3002_v54 = vmul.f32 -1.442695, %v2580_v20  ;;  %3803 = vpow2.f32 %v3018_v49  ;;  %v3020_v26 = vmul.f32 -1.442695, %v2634_v23 }
 0x67e   : > { %v3003_v55 = vmul.f32 -1.442695, %v2582_v52  ;;  %v2585_v56 = vpop.f32.mrb[40].mxu0  ;;  %3805 = vpow2.f32 %v3019_v50  ;;  %v3021_v58 = vmul.f32 -1.442695, %v2636_v53  ;;  %v2639_v59 = vpop.f32.mrb[48].mxu1 }
 0x67f   : > { %3807 = vpow2.f32 %v3002_v54  ;;  %v2586_v61 = vadd.f32 %v2585_v56, %v6251_v38  ;;  %v2587_v62 = vpop.f32.mrb[41].mxu0  ;;  %v2640_v2 = vadd.f32 %v2639_v59, %v6251_v38  ;;  %v2641_v3 = vpop.f32.mrb[49].mxu1 }
 0x680   : > { %3809 = vpow2.f32 %v3003_v55  ;;  %v2588_v5 = vadd.f32 %v2587_v62, %v6254_v37  ;;  %v2642_v6 = vadd.f32 %v2641_v3, %v6254_v37 }
 0x681   : > { %v3004_v8 = vmul.f32 -1.442695, %v2586_v61  ;;  %3811 = vpow2.f32 %v3020_v26  ;;  %v3022_v9 = vmul.f32 -1.442695, %v2640_v2 }
 0x682   : > { %v3005_v10 = vmul.f32 -1.442695, %v2588_v5  ;;  %v2591_v11 = vpop.f32.mrb[42].mxu0  ;;  %3813 = vpow2.f32 %v3021_v58  ;;  %v3023_v13 = vmul.f32 -1.442695, %v2642_v6  ;;  %v6268_v22 = vpop.f32.mrb[50].mxu1 }
 0x683   : > { %3815 = vpow2.f32 %v3004_v8  ;;  %v2592_v45 = vadd.f32 %v2591_v11, %v6251_v38  ;;  %v2593_v46 = vpop.f32.mrb[43].mxu0  ;;  %v2647_v14 = vpop.f32.mrb[51].mxu1  ;;  %v2646_v62 = vadd.f32 %v6268_v22, %v6251_v38 }
 0x684   : > { %3817 = vpow2.f32 %v3005_v10  ;;  %v2594_v16 = vadd.f32 %v2593_v46, %v6254_v37  ;;  %v6273_v19 = vadd.f32 %v2647_v14, %v6254_v37 }
 0x685   : > { %v3800_v21 = vpop.eup %3799  ;;  %v3006_v63 = vmul.f32 -1.442695, %v2592_v45  ;;  %3819 = vpow2.f32 %v3022_v9  ;;  %v3024_v14 = vmul.f32 -1.442695, %v2646_v62 }
 0x686   : > { %v3802_v42 = vpop.eup %3801  ;;  %v2764_v57 = vadd.f32 1.0, %v3800_v21  ;;  %v2597_v24 = vpop.f32.mrb[44].mxu0  ;;  %3821 = vpow2.f32 %v3023_v13  ;;  %v3007_v47 = vmul.f32 -1.442695, %v2594_v16 }
 0x687   : > { %v3804_v27 = vpop.eup %3803  ;;  %v2765_v25 = vadd.f32 1.0, %v3802_v42  ;;  %3823 = vpow2.f32 %v3006_v63  ;;  %v2599_v17 = vpop.f32.mrb[45].mxu0  ;;  %v2598_v12 = vadd.f32 %v2597_v24, %v6251_v38 }
 0x688   : > { %v6275_v44 = vpop.f32.mrb[52].mxu1  ;;  %v3806_v15 = vpop.eup %3805  ;;  %3825 = vrcp.f32 %v2764_v57  ;;  %v2782_v30 = vadd.f32 1.0, %v3804_v27  ;;  %v2600_v36 = vadd.f32 %v2599_v17, %v6254_v37  ;;  %v3025_v27 = vmul.f32 -1.442695, %v6273_v19 }
 0x689   : > { %v2653_v31 = vpop.f32.mrb[53].mxu1  ;;  %v3808_v43 = vpop.eup %3807  ;;  %3827 = vrcp.f32 %v2765_v25  ;;  %v2783_v7 = vadd.f32 1.0, %v3806_v15  ;;  %v3008_v52 = vmul.f32 -1.442695, %v2598_v12  ;;  %v2652_v42 = vadd.f32 %v6275_v44, %v6251_v38 }
 0x68a   : > { %v6279_v4 = vadd.f32 %v2653_v31, %v6254_v37  ;;  %v3810_v41 = vpop.eup %3809  ;;  %v2766_v32 = vadd.f32 1.0, %v3808_v43  ;;  %3829 = vrcp.f32 %v2782_v30  ;;  %v2603_v35 = vpop.f32.mrb[46].mxu0  ;;  %v3009_v6 = vmul.f32 -1.442695, %v2600_v36 }
 0x68b   : > { %v3812_v39 = vpop.eup %3811  ;;  %v2767_v40 = vadd.f32 1.0, %v3810_v41  ;;  %3831 = vrcp.f32 %v2783_v7  ;;  %v2605_v0 = vpop.f32.mrb[47].mxu0  ;;  %v2604_v55 = vadd.f32 %v2603_v35, %v6251_v38  ;;  %v3026_v43 = vmul.f32 -1.442695, %v2652_v42 }
 0x68c   : > { %v6283_v60 = vpop.f32.mrb[54].mxu1  ;;  %v3814_v34 = vpop.eup %3813  ;;  %3833 = vrcp.f32 %v2766_v32  ;;  %v2784_v48 = vadd.f32 1.0, %v3812_v39  ;;  %v2606_v28 = vadd.f32 %v2605_v0, %v6254_v37  ;;  %v3027_v39 = vmul.f32 -1.442695, %v6279_v4 }
 0x68d   : > { %v2659_v49 = vpop.f32.mrb[55].mxu1  ;;  %v3816_v33 = vpop.eup %3815  ;;  %3835 = vrcp.f32 %v2767_v40  ;;  %v2785_v20 = vadd.f32 1.0, %v3814_v34  ;;  %v3010_v22 = vmul.f32 -1.442695, %v2604_v55 }
 0x68e   : > { %v6289_v18 = vadd.f32 %v2659_v49, %v6254_v37  ;;  %v3818_v50 = vpop.eup %3817  ;;  %v2768_v51 = vadd.f32 1.0, %v3816_v33  ;;  %3837 = vrcp.f32 %v2784_v48  ;;  %v2609_v1 = vpop.f32.mrb[48].mxu0  ;;  %v3011_v63 = vmul.f32 -1.442695, %v2606_v28 }
 0x68f   : > { %v3820_v23 = vpop.eup %3819  ;;  %v2769_v29 = vadd.f32 1.0, %v3818_v50  ;;  %3839 = vpow2.f32 %v3007_v47  ;;  %v2611_v53 = vpop.f32.mrb[49].mxu0  ;;  %v2610_v16 = vadd.f32 %v2609_v1, %v6251_v38 }
 0x690   : > { %v6291_v54 = vpop.f32.mrb[56].mxu1  ;;  %v3822_v26 = vpop.eup %3821  ;;  %3841 = vrcp.f32 %v2768_v51  ;;  %v2612_v56 = vadd.f32 %v2611_v53, %v6254_v37  ;;  %v2786_v61 = vadd.f32 1.0, %v3820_v23 }
 0x691   : > { %v2665_v58 = vpop.f32.mrb[57].mxu1  ;;  %v3824_v59 = vpop.eup %3823  ;;  %3843 = vrcp.f32 %v2769_v29  ;;  %v2787_v10 = vadd.f32 1.0, %v3822_v26  ;;  %v3012_v44 = vmul.f32 -1.442695, %v2610_v16 }
 0x692   : > { %v6298_v2 = vadd.f32 %v2665_v58, %v6254_v37  ;;  %v3826_v3 = vpop.eup %3825  ;;  %v2770_v5 = vadd.f32 1.0, %v3824_v59  ;;  %3845 = vrcp.f32 %v2785_v20  ;;  %v2615_v8 = vpop.f32.mrb[50].mxu0  ;;  %v3013_v41 = vmul.f32 -1.442695, %v2612_v56 }
 0x693   : > { %v3828_v9 = vpop.eup %3827  ;;  %2860 = vst [vmem:[%s6300_s30] sm:$0xff] %v3826_v3  ;;  %3847 = vpow2.f32 %v3008_v52  ;;  %v2617_v11 = vpop.f32.mrb[51].mxu0  ;;  %v2616_v19 = vadd.f32 %v2615_v8, %v6251_v38 }
 0x694   : > { %v3830_v13 = vpop.eup %3829  ;;  %3032 = vst [vmem:[%s6300_s30 + $0x80] sm:$0xff] %v3828_v9  ;;  %3849 = vrcp.f32 %v2770_v5  ;;  %v6305_v45 = vadd.f32 %v2617_v11, %v6254_v37  ;;  %v2664_v5 = vadd.f32 %v6291_v54, %v6251_v38 }
 0x695   : > { %v3832_v46 = vpop.eup %3831  ;;  %2869 = vst [vmem:[%s6300_s30 + $0x48] sm:$0xff] %v3830_v13  ;;  %3851 = vrcp.f32 %v2786_v61  ;;  %v3014_v12 = vmul.f32 -1.442695, %v2616_v19  ;;  %v3029_v61 = vmul.f32 -1.442695, %v6289_v18 }
 0x696   : > { %v3834_v21 = vpop.eup %3833  ;;  %3041 = vst [vmem:[%s6300_s30 + $0xc8] sm:$0xff] %v3832_v46  ;;  %3853 = vpow2.f32 %v3009_v6  ;;  %v6312_v57 = vpop.f32.mrb[52].mxu0  ;;  %v3015_v23 = vmul.f32 -1.442695, %v6305_v45 }
 0x697   : > { %v3836_v24 = vpop.eup %3835  ;;  %2861 = vst [vmem:[%s6300_s30 + $0x8] sm:$0xff] %v3834_v21  ;;  %3855 = vrcp.f32 %v2787_v10  ;;  %v2623_v25 = vpop.f32.mrb[53].mxu0  ;;  %v2622_v56 = vadd.f32 %v6312_v57, %v6251_v38 }
 0x698   : > { %v3838_v17 = vpop.eup %3837  ;;  %3033 = vst [vmem:[%s6300_s30 + $0x88] sm:$0xff] %v3836_v24  ;;  %3857 = vpow2.f32 %v3010_v22  ;;  %v6318_v15 = vadd.f32 %v2623_v25, %v6254_v37  ;;  %v2658_v37 = vadd.f32 %v6283_v60, %v6251_v38  ;;  %v3030_v22 = vmul.f32 -1.442695, %v2664_v5 }
 0x699   : > { %v3840_v30 = vpop.eup %3839  ;;  %2870 = vst [vmem:[%s6300_s30 + $0x50] sm:$0xff] %v3838_v17  ;;  %3859 = vpow2.f32 %v3024_v14  ;;  %v3016_v10 = vmul.f32 -1.442695, %v2622_v56  ;;  %v3031_v14 = vmul.f32 -1.442695, %v6298_v2 }
 0x69a   : > { %v3842_v36 = vpop.eup %3841  ;;  %v2771_v31 = vadd.f32 1.0, %v3840_v30  ;;  %3861 = vpow2.f32 %v3011_v63  ;;  %v3028_v48 = vmul.f32 -1.442695, %v2658_v37  ;;  %v3017_v54 = vmul.f32 -1.442695, %v6318_v15 }
 0x69b   : > { %v3844_v7 = vpop.eup %3843  ;;  %2862 = vst [vmem:[%s6300_s30 + $0x10] sm:$0xff] %v3842_v36  ;;  %3863 = vpow2.f32 %v3025_v27 }
 0x69c   : > { %v3846_v32 = vpop.eup %3845  ;;  %3034 = vst [vmem:[%s6300_s30 + $0x90] sm:$0xff] %v3844_v7  ;;  %3865 = vrcp.f32 %v2771_v31 }
 0x69d   : > { %v3848_v35 = vpop.eup %3847  ;;  %3042 = vst [vmem:[%s6300_s30 + $0xd0] sm:$0xff] %v3846_v32  ;;  %3867 = vpow2.f32 %v3012_v44 }
 0x69e   : > { %v3850_v40 = vpop.eup %3849  ;;  %v2772_v47 = vadd.f32 1.0, %v3848_v35  ;;  %3869 = vpow2.f32 %v3026_v43 }
 0x69f   : > { %v3852_v0 = vpop.eup %3851  ;;  %2863 = vst [vmem:[%s6300_s30 + $0x18] sm:$0xff] %v3850_v40  ;;  %3871 = vpow2.f32 %v3013_v41 }
 0x6a0   : > { %v3854_v34 = vpop.eup %3853  ;;  %3873 = vrcp.f32 %v2772_v47  ;;  %2871 = vst [vmem:[%s6300_s30 + $0x58] sm:$0xff] %v3852_v0 }
 0x6a1   : > { %v3856_v28 = vpop.eup %3855  ;;  %v2773_v49 = vadd.f32 1.0, %v3854_v34  ;;  %3875 = vpow2.f32 %v3027_v39 }
 0x6a2   : > { %v3858_v60 = vpop.eup %3857  ;;  %3043 = vst [vmem:[%s6300_s30 + $0xd8] sm:$0xff] %v3856_v28  ;;  %3877 = vpow2.f32 %v3014_v12 }
 0x6a3   : > { %v3860_v4 = vpop.eup %3859  ;;  %3879 = vrcp.f32 %v2773_v49  ;;  %v2774_v33 = vadd.f32 1.0, %v3858_v60 }
 0x6a4   : > { %v3862_v50 = vpop.eup %3861  ;;  %v2788_v51 = vadd.f32 1.0, %v3860_v4  ;;  %3881 = vpow2.f32 %v3028_v48 }
 0x6a5   : > { %v3864_v20 = vpop.eup %3863  ;;  %3883 = vrcp.f32 %v2774_v33  ;;  %v2775_v1 = vadd.f32 1.0, %v3862_v50 }
 0x6a6   : > { %v3866_v29 = vpop.eup %3865  ;;  %3885 = vrcp.f32 %v2788_v51  ;;  %v2789_v52 = vadd.f32 1.0, %v3864_v20 }
 0x6a7   : > { %v3868_v53 = vpop.eup %3867  ;;  %3035 = vst [vmem:[%s6300_s30 + $0x98] sm:$0xff] %v3866_v29  ;;  %3887 = vrcp.f32 %v2775_v1 }
 0x6a8   : > { %v3870_v26 = vpop.eup %3869  ;;  %3889 = vrcp.f32 %v2789_v52  ;;  %v2776_v55 = vadd.f32 1.0, %v3868_v53 }
 0x6a9   : > { %v3872_v58 = vpop.eup %3871  ;;  %v2790_v59 = vadd.f32 1.0, %v3870_v26  ;;  %3891 = vpow2.f32 %v3015_v23 }
 0x6aa   : > { %v3874_v62 = vpop.eup %3873  ;;  %3893 = vrcp.f32 %v2776_v55  ;;  %v2777_v3 = vadd.f32 1.0, %v3872_v58 }
 0x6ab   : > { %v3876_v6 = vpop.eup %3875  ;;  %2864 = vst [vmem:[%s6300_s30 + $0x20] sm:$0xff] %v3874_v62  ;;  %3895 = vrcp.f32 %v2790_v59 }
 0x6ac   : > { %v3878_v8 = vpop.eup %3877  ;;  %3897 = vrcp.f32 %v2777_v3  ;;  %v2791_v9 = vadd.f32 1.0, %v3876_v6 }
 0x6ad   : > { %v3880_v11 = vpop.eup %3879  ;;  %v2778_v13 = vadd.f32 1.0, %v3878_v8  ;;  %3899 = vpow2.f32 %v3029_v61 }
 0x6ae   : > { %v3882_v18 = vpop.eup %3881  ;;  %3036 = vst [vmem:[%s6300_s30 + $0xa0] sm:$0xff] %v3880_v11  ;;  %3901 = vrcp.f32 %v2791_v9 }
 0x6af   : > { %v3884_v45 = vpop.eup %3883  ;;  %3903 = vrcp.f32 %v2778_v13  ;;  %v2792_v38 = vadd.f32 1.0, %v3882_v18 }
 0x6b0   : > { %v3886_v46 = vpop.eup %3885  ;;  %2865 = vst [vmem:[%s6300_s30 + $0x28] sm:$0xff] %v3884_v45  ;;  %3905 = vpow2.f32 %v3016_v10 }
 0x6b1   : > { %v3888_v16 = vpop.eup %3887  ;;  %2872 = vst [vmem:[%s6300_s30 + $0x60] sm:$0xff] %v3886_v46  ;;  %3907 = vrcp.f32 %v2792_v38 }
 0x6b2   : > { %v3890_v21 = vpop.eup %3889  ;;  %3037 = vst [vmem:[%s6300_s30 + $0xa8] sm:$0xff] %v3888_v16  ;;  %3909 = vpow2.f32 %v3030_v22 }
 0x6b3   : > { %v3892_v63 = vpop.eup %3891  ;;  %3044 = vst [vmem:[%s6300_s30 + $0xe0] sm:$0xff] %v3890_v21  ;;  %3911 = vpow2.f32 %v3017_v54 }
 0x6b4   : > { %v3894_v42 = vpop.eup %3893  ;;  %v2779_v57 = vadd.f32 1.0, %v3892_v63  ;;  %3913 = vpow2.f32 %v3031_v14 }
 0x6b5   : > { %v3896_v24 = vpop.eup %3895  ;;  %2866 = vst [vmem:[%s6300_s30 + $0x30] sm:$0xff] %v3894_v42 }
 0x6b6   : > { %v3898_v2 = vpop.eup %3897  ;;  %2873 = vst [vmem:[%s6300_s30 + $0x68] sm:$0xff] %v3896_v24  ;;  %3915 = vrcp.f32 %v2779_v57 }
 0x6b7   : > { %v3900_v27 = vpop.eup %3899  ;;  %3038 = vst [vmem:[%s6300_s30 + $0xb0] sm:$0xff] %v3898_v2 }
 0x6b8   : > { %v3902_v25 = vpop.eup %3901  ;;  %v2793_v17 = vadd.f32 1.0, %v3900_v27 }
 0x6b9   : > { %v3904_v15 = vpop.eup %3903  ;;  %3045 = vst [vmem:[%s6300_s30 + $0xe8] sm:$0xff] %v3902_v25 }
 0x6ba   : > { %v3906_v30 = vpop.eup %3905  ;;  %2867 = vst [vmem:[%s6300_s30 + $0x38] sm:$0xff] %v3904_v15  ;;  %3917 = vrcp.f32 %v2793_v17 }
 0x6bb   : > { %v3908_v44 = vpop.eup %3907  ;;  %v2780_v36 = vadd.f32 1.0, %v3906_v30 }
 0x6bc   : > { %v3910_v31 = vpop.eup %3909  ;;  %2874 = vst [vmem:[%s6300_s30 + $0x70] sm:$0xff] %v3908_v44 }
 0x6bd   : > { %v3912_v43 = vpop.eup %3911  ;;  %3919 = vrcp.f32 %v2780_v36  ;;  %v2794_v19 = vadd.f32 1.0, %v3910_v31 }
 0x6be   : > { %v3914_v7 = vpop.eup %3913  ;;  %v2781_v41 = vadd.f32 1.0, %v3912_v43 }
 0x6bf   : > { %3921 = vrcp.f32 %v2794_v19  ;;  %v2795_v32 = vadd.f32 1.0, %v3914_v7 }
 0x6c0   : > { %v3916_v37 = vpop.eup %3915  ;;  %3923 = vrcp.f32 %v2781_v41 }
 0x6c1   : > { %3039 = vst [vmem:[%s6300_s30 + $0xb8] sm:$0xff] %v3916_v37  ;;  %3925 = vrcp.f32 %v2795_v32 }
 0x6c4   : > { %v3918_v35 = vpop.eup %3917 }
 0x6c5   : > { %3046 = vst [vmem:[%s6300_s30 + $0xf0] sm:$0xff] %v3918_v35 }
 0x6c7   : > { %v3920_v39 = vpop.eup %3919 }
 0x6c8   : > { %2868 = vst [vmem:[%s6300_s30 + $0x40] sm:$0xff] %v3920_v39 }
 0x6c9   : > { %v3922_v40 = vpop.eup %3921 }
 0x6ca   : > { %v3924_v47 = vpop.eup %3923  ;;  %2875 = vst [vmem:[%s6300_s30 + $0x78] sm:$0xff] %v3922_v40 }
 0x6cb   : > { %v3926_v12 = vpop.eup %3925  ;;  %3040 = vst [vmem:[%s6300_s30 + $0xc0] sm:$0xff] %v3924_v47 }
 0x6cc   : > { %3047 = vst [vmem:[%s6300_s30 + $0xf8] sm:$0xff] %v3926_v12 }
 0x6cd   : > { %3940 = shalt.err (!%p3937_p3)
}
 0x6ce   : > { %s3941_s21 = scalar_lea.hbm %s6360_s14, 4096  ;;  %s3945_s15 = scalar_lea.hbm %s6423_s13, 8192 }
 0x6cf   : > { %p3942_p4 = scmp.ne.s32.totalorder %s6360_s14, %s3941_s21  ;;  %p3946_p9 = scmp.lt.u32.totalorder %s6360_s14, %s6423_s13 }
 0x6d0   : > { %p3947_p10 = scmp.lt.u32.totalorder %s3945_s15, %s3941_s21  ;;  %p3949_p12 = scmp.lt.u32.totalorder %s3941_s21, %s6360_s14 }
 0x6d1   : > { %p3943_p7 = pnand %p3942_p4, %p4104_p5 }
 0x6d2   : > { %p3948_p11 = por %p3947_p10, %p3946_p9 }
 0x6d3   : > { %p3944_p8 = pneg %p3943_p7 }
 0x6d4   : > { %p3950_p13 = por %p3949_p12, %p3948_p11 }
 0x6d6   : > { %p3951_p0 = pnand %p3950_p13, %p3944_p8 }
 0x6d8   : > { %3954 = shalt.err (!%p3951_p0)
}
 0x6d9   : > { %s3994_s19 = smov 128   ;;  %s3995_s17 = smov 8  }
 0x6da   : > { %3751 = dma.vmem_to_hbm [thread:$0]  (%p4104_p5), %s6362_s16, 4096, %s6360_s14, %s6369_s29, %s3994_s19, %s3994_s19, %s3995_s17  }
 0x6db PF: > { %p3757_p1 = scmp.ge.s32.totalorder %s3989_s28, 2  ;;  %s2922_s22 = sand.u32 1, %s3977_s25  }
 0x6dc   : > { %s2923_s21 = scalar_lea.sflag [#allocation3], %s2922_s22 }
 0x6dd   : > { %p3754_p2 = pnand %p3757_p1, %p4108_p6 }
 0x6df   : > { %3972 = dma.done.wait (!%p3754_p2), %s2923_s21, 4096  }
 0x6e0   : > { %3974 = vsyncadd (!%p3754_p2), %s2923_s21, 4294963200  ;;  %s6437_s28 = sld [smem:[#allocation6_spill]]  ;;  %s6438_s23 = sld [smem:[#allocation5_spill]] }
 0x6e1   : > { %s6439_s27 = sld [smem:[#allocation7_spill]]  ;;  %s6440_s25 = smov %s3981_s26 }
 0x6e6   : > { %p23_p3 = scmp.ge.s32.totalorder %s6437_s28, 4   ;;  %s6441_s26 = smov %s6438_s23 }
 0x6e8   :  { %25 = sbr.rel (!%p23_p3) target bundleno = 3 (0x3), region = 108 }
 0x6ef   :  { %2928 = vsyncpa [#allocation3], 1 }
 0x6f0   :  { %2930 = vsyncpa [#allocation3 + $0x1], 1 }

</bundles_post_ra>
